<compile_context>
chip_gen: v7x
topology: tpu7x:2x2x1
jax: 0.10.0
libtpu: 0.0.40
codegen_flags: <defaults>
</compile_context>

<pallas_src>
import functools
import math

import jax
import jax.numpy as jnp
from jax.experimental import pallas as pl
from jax.experimental.pallas import tpu as pltpu


_MAX_BOX_TILE = 128   # box rows per grid step when tiling (multiple of 128)


# ----------------------------- Pallas kernels --------------------------------
def _pairs_all_kernel(phr_ref, box_ref, w1pd_ref, w1p_ref, w1b_ref,
                      b1_ref, w2t_ref, b2_ref, out_ref):
    """All (phrase, box) pairs for one (batch, box-tile) grid step.

    phr_ref : (1, P, D) f32       box_ref : (1, TB, D) f32
    w1pd_ref: (2D, 2H) bf16       w1p_ref / w1b_ref : (D, 2H) bf16
    b1_ref  : (1, 2H) f32         w2t_ref : (8, 2H) f32     b2_ref : (8, 1) f32
    out_ref : (1, 1, 8, P*TB) f32 (row 0 = sim logit, rows 1..6 = reg, row 7 = pad)
    """
    _, P, D = phr_ref.shape
    TB = box_ref.shape[1]
    H2 = b1_ref.shape[1]
    R = P * TB
    bf16 = jnp.bfloat16

    phr = phr_ref[0]                                   # (P, D)
    box = box_ref[0]                                   # (TB, D)

    # Hoisted phrase-only / box-only first-layer terms (tiny, not R-sized).
    hp = jnp.dot(phr.astype(bf16), w1p_ref[...],
                 preferred_element_type=jnp.float32)   # (P, 2H)
    hb = jnp.dot(box.astype(bf16), w1b_ref[...],
                 preferred_element_type=jnp.float32)   # (TB, 2H)

    # Pairwise prod / diff built by 3-D broadcast, packed along K to one K=2D matmul.
    prod = (phr[:, None, :] * box[None, :, :]).astype(bf16)    # (P, TB, D)
    diff = (phr[:, None, :] - box[None, :, :]).astype(bf16)    # (P, TB, D)
    pd = jnp.concatenate([prod, diff], axis=-1).reshape(R, 2 * D)

    h = jnp.dot(pd, w1pd_ref[...], preferred_element_type=jnp.float32)   # (R, 2H)
    h = h.reshape(P, TB, H2) + hp[:, None, :] + hb[None, :, :] + b1_ref[...]
    h = jnp.maximum(h, 0.01 * h)                                # LeakyReLU(0.01)

    # Fused block-diagonal second layer, produced directly as (8, R): lane-dense.
    out = jnp.einsum('ok,rk->or', w2t_ref[...], h.reshape(R, H2),
                     preferred_element_type=jnp.float32) + b2_ref[...]
    out_ref[...] = out.reshape(1, 1, 8, R)


def _pairs_topn_kernel(phr_ref, box_ref, w1pd_ref, w1p_ref, w1b_ref,
                       b1_ref, w2t_ref, b2_ref, out_ref):
    """Per-phrase topN candidate boxes, all batches flattened into one row axis.

    phr_ref : (BP, D) f32         box_ref : (BP, T, D) f32
    out_ref : (8, BP*T) f32
    """
    BP, D = phr_ref.shape
    T = box_ref.shape[1]
    H2 = b1_ref.shape[1]
    R = BP * T
    bf16 = jnp.bfloat16

    phr = phr_ref[...]                                 # (BP, D)
    box = box_ref[...]                                 # (BP, T, D)

    hp = jnp.dot(phr.astype(bf16), w1p_ref[...],
                 preferred_element_type=jnp.float32)   # (BP, 2H)
    hb = jnp.dot(box.reshape(R, D).astype(bf16), w1b_ref[...],
                 preferred_element_type=jnp.float32)   # (R, 2H)

    prod = (phr[:, None, :] * box).astype(bf16)        # (BP, T, D)
    diff = (phr[:, None, :] - box).astype(bf16)
    pd = jnp.concatenate([prod, diff], axis=-1).reshape(R, 2 * D)

    h = jnp.dot(pd, w1pd_ref[...], preferred_element_type=jnp.float32)   # (R, 2H)
    h = h + hb + b1_ref[...]
    h = h.reshape(BP, T, H2) + hp[:, None, :]
    h = jnp.maximum(h, 0.01 * h).reshape(R, H2)

    out = jnp.einsum('ok,rk->or', w2t_ref[...], h,
                     preferred_element_type=jnp.float32) + b2_ref[...]
    out_ref[...] = out


# ----------------------------- Pallas wrappers --------------------------------
def _weight_specs(D, H2):
    """Grid-invariant weight BlockSpecs (constant index maps)."""
    zmap = lambda *a: (0, 0)
    return [
        pl.BlockSpec((2 * D, H2), zmap),   # w1pd
        pl.BlockSpec((D, H2), zmap),       # w1p
        pl.BlockSpec((D, H2), zmap),       # w1b
        pl.BlockSpec((1, H2), zmap),       # b1
        pl.BlockSpec((8, H2), zmap),       # w2t
        pl.BlockSpec((8, 1), zmap),        # b2
    ]


def pair_prediction_all(phrase_embed, box_features, fused):
    """`prediction`: every phrase paired with every proposal box."""
    B, P, D = phrase_embed.shape
    Nb = box_features.shape[1]
    H2 = fused["b1"].shape[1]

    if Nb <= _MAX_BOX_TILE:
        TB, Nb_pad, box_in = Nb, Nb, box_features
    else:
        TB = _MAX_BOX_TILE
        Nb_pad = ((Nb + TB - 1) // TB) * TB
        box_in = jnp.pad(box_features, ((0, 0), (0, Nb_pad - Nb), (0, 0)))
    NT = Nb_pad // TB
    R = P * TB

    flops = (2 * B * P * Nb_pad * (2 * D * H2 + H2 * 8)
             + 2 * B * NT * (P + TB) * D * H2)
    bytes_accessed = ((B * P * D * NT + B * Nb_pad * D) * 4
                      + B * NT * 8 * R * 4 + 6 * D * H2 * 2)
    cost = pl.CostEstimate(flops=flops, transcendentals=0,
                           bytes_accessed=bytes_accessed)

    out = pl.pallas_call(
        _pairs_all_kernel,
        grid=(B, NT),
        in_specs=[
            pl.BlockSpec((1, P, D), lambda b, j: (b, 0, 0)),
            pl.BlockSpec((1, TB, D), lambda b, j: (b, j, 0)),
            *_weight_specs(D, H2),
        ],
        out_specs=pl.BlockSpec((1, 1, 8, R), lambda b, j: (b, j, 0, 0)),
        out_shape=jax.ShapeDtypeStruct((B, NT, 8, R), jnp.float32),
        compiler_params=pltpu.CompilerParams(
            dimension_semantics=("parallel", "parallel")),
        cost_estimate=cost,
    )(phrase_embed, box_in,
      fused["w1pd"], fused["w1p"], fused["w1b"],
      fused["b1"], fused["w2t"], fused["b2"])

    # (B, NT, 8, P, TB) -> (B, 8, P, Nb): cheap XLA-side layout plumbing.
    out = out.reshape(B, NT, 8, P, TB)
    out = jnp.transpose(out, (0, 2, 3, 1, 4)).reshape(B, 8, P, Nb_pad)[..., :Nb]
    sim = out[:, 0]                                        # (B, P, Nb)
    reg = jnp.transpose(out[:, 1:7], (0, 2, 3, 1))         # (B, P, Nb, 6)
    return sim, reg


def pair_prediction_topn(phrase_embed, box_feats_topn, fused):
    """`prediction_topN`: each phrase paired with its own topN candidate boxes."""
    B, P, T, D = box_feats_topn.shape
    H2 = fused["b1"].shape[1]
    BP = B * P
    # Pad the flattened (batch*phrase) axis so the lane-dense (8, BP_pad*T) output
    # has a last dim that is a multiple of 128 (unmasked vst).
    step = max(8, 128 // math.gcd(T, 128))
    BP_pad = ((BP + step - 1) // step) * step
    Rp = BP_pad * T

    phr_flat = phrase_embed.reshape(BP, D)
    box_flat = box_feats_topn.reshape(BP, T, D)
    if BP_pad != BP:
        phr_flat = jnp.pad(phr_flat, ((0, BP_pad - BP), (0, 0)))
        box_flat = jnp.pad(box_flat, ((0, BP_pad - BP), (0, 0), (0, 0)))

    flops = 2 * Rp * (3 * D * H2 + H2 * 8) + 2 * BP_pad * D * H2
    bytes_accessed = (phr_flat.size + box_flat.size) * 4 + 8 * Rp * 4 + 6 * D * H2 * 2
    cost = pl.CostEstimate(flops=flops, transcendentals=0,
                           bytes_accessed=bytes_accessed)

    out = pl.pallas_call(
        _pairs_topn_kernel,
        grid=(1,),
        in_specs=[
            pl.BlockSpec((BP_pad, D), lambda i: (0, 0)),
            pl.BlockSpec((BP_pad, T, D), lambda i: (0, 0, 0)),
            *_weight_specs(D, H2),
        ],
        out_specs=pl.BlockSpec((8, Rp), lambda i: (0, 0)),
        out_shape=jax.ShapeDtypeStruct((8, Rp), jnp.float32),
        compiler_params=pltpu.CompilerParams(
            dimension_semantics=("arbitrary",)),
        cost_estimate=cost,
    )(phr_flat, box_flat,
      fused["w1pd"], fused["w1p"], fused["w1b"],
      fused["b1"], fused["w2t"], fused["b2"])

    out = out[:, :BP * T].reshape(8, B, P, T)
    sim = out[0]                                           # (B, P, T)
    reg = jnp.transpose(out[1:7], (1, 2, 3, 0))            # (B, P, T, 6)
    return sim, reg


# ----------------------------- plain-JAX reference ---------------------------
def pair_prediction_ref(phrase_embed, box_feats, params):
    B, P, M, D = box_feats.shape
    phr = jnp.broadcast_to(phrase_embed[:, :, None, :], (B, P, M, D))
    fusion = jnp.concatenate(
        [phr * box_feats, phr - box_feats, phr, box_feats], axis=-1)

    def mlp(x, w1, b1, w2, b2):
        h = x @ w1 + b1
        h = jnp.where(h > 0, h, 0.01 * h)
        return h @ w2 + b2

    sim = mlp(fusion, params["w1s"], params["b1s"][0],
              params["w2s"], params["b2s"][0])[..., 0]
    reg = mlp(fusion, params["w1r"], params["b1r"][0],
              params["w2r"], params["b2r"][0])
    return sim, reg


# ----------------------------- parameter handling -----------------------------
def init_head_params(key, in_dim, hidden, out_dim):
    k1, k2 = jax.random.split(key)
    return {
        "w1": jax.random.normal(k1, (in_dim, hidden), jnp.float32) * 0.05,
        "b1": jnp.zeros((1, hidden), jnp.float32),
        "w2": jax.random.normal(k2, (hidden, out_dim), jnp.float32) * 0.05,
        "b2": jnp.zeros((1, out_dim), jnp.float32),
    }


def fuse_head_params(sim_head, reg_head):
    """Fuse a (sim, reg) head pair into one kernel parameter set.

    w1pd : (2D, 2H) bf16  — stacked [W1_prod ; W1_diff] for [sim || reg]
    w1p  : (D, 2H)  bf16  — phrase-only slice       w1b : (D, 2H) bf16 — box-only slice
    w2t  : (8, 2H)  f32   — row 0 = sim head, rows 1..6 = reg head, row 7 = 0
    """
    in_dim, hidden = sim_head["w1"].shape              # (4D, H)
    d = in_dim // 4
    w1s, w1r = sim_head["w1"], reg_head["w1"]
    cat = lambda a, b: jnp.concatenate([a, b], axis=1)
    w1pd = cat(w1s[:2 * d], w1r[:2 * d])               # (2D, 2H)
    w1p = cat(w1s[2 * d:3 * d], w1r[2 * d:3 * d])      # (D, 2H)
    w1b = cat(w1s[3 * d:], w1r[3 * d:])                # (D, 2H)
    b1 = cat(sim_head["b1"], reg_head["b1"])           # (1, 2H)
    w2t = jnp.zeros((8, 2 * hidden), jnp.float32)
    w2t = w2t.at[0:1, :hidden].set(sim_head["w2"].T)   # sim -> row 0
    w2t = w2t.at[1:7, hidden:].set(reg_head["w2"].T)   # reg -> rows 1..6
    b2 = jnp.zeros((8, 1), jnp.float32)
    b2 = b2.at[0, 0].set(sim_head["b2"][0, 0])
    b2 = b2.at[1:7, 0].set(reg_head["b2"][0])
    return {
        "w1pd": w1pd.astype(jnp.bfloat16),
        "w1p": w1p.astype(jnp.bfloat16),
        "w1b": w1b.astype(jnp.bfloat16),
        "b1": b1, "w2t": w2t, "b2": b2,
    }


# ----------------------------- model glue ------------------------------------
def lanref_forward(phrase_embed, box_features, target_ids, fused_params, topN):
    """Reproduces the per-batch prediction / topN-prediction path of lanref."""
    B, P, D = phrase_embed.shape

    # ---- `prediction`: every phrase paired with every box -------------------
    pred_sim, reg_offset = pair_prediction_all(
        phrase_embed, box_features, fused_params["main"])   # (B,P,Nb), (B,P,Nb,6)

    # ---- topN selection (torch.sort descending + slice) ---------------------
    topN_scores, topN_ids = jax.lax.top_k(pred_sim, topN)   # (B,P,topN)

    # gather topN box features per phrase
    # TODO(synk): could be an in-kernel gather via scalar prefetch (pl.Element).
    feats_topN = jax.vmap(lambda f, idx: f[idx])(box_features, topN_ids)  # (B,P,topN,D)

    # ---- `prediction_topN` ---------------------------------------------------
    pred_sim_topN, reg_offset_topN = pair_prediction_topn(
        phrase_embed, feats_topN, fused_params["topn"])      # (B,P,topN), (B,P,topN,6)

    # ---- select the target phrase per batch element --------------------------
    bidx = jnp.arange(B)
    out = {
        "batch_pred_similarity":      pred_sim[bidx, target_ids],        # (B, Nb)
        "batch_reg_offset":           reg_offset[bidx, target_ids],      # (B, Nb, 6)
        "batch_pred_similarity_topN": pred_sim_topN[bidx, target_ids],   # (B, topN)
        "batch_reg_offset_topN":      reg_offset_topN[bidx, target_ids], # (B, topN, 6)
        "batch_topN_target_ids":      topN_ids[bidx, target_ids],        # (B, topN)
        "batch_target_embed":         phrase_embed[bidx, target_ids],    # (B, D)
    }
    return out, (pred_sim, reg_offset, pred_sim_topN, reg_offset_topN, topN_ids)


# ----------------------------- main ------------------------------------------
if __name__ == "__main__":
    # small, module-consistent shapes
    BATCH = 2          # batch_size
    P = 4              # num phrases (<= MAX_NUM_P)
    NB = 32            # num_proposal boxes
    D = 128            # phrase_embed_dim == recognition_dim (hardcoded 128 slicing)
    HIDDEN = 256
    TOPN = 8           # CONF.MODEL.TOPN (synthetic)
    IN_DIM = 4 * D     # similarity_input_dim = recognition_dim + 3*phrase_embed_dim

    key = jax.random.PRNGKey(0)
    k_phr, k_box, k_s, k_r, k_st, k_rt = jax.random.split(key, 6)

    phrase_embed = jax.random.normal(k_phr, (BATCH, P, D), jnp.float32)
    box_features = jax.random.normal(k_box, (BATCH, NB, D), jnp.float32)
    target_ids = jnp.array([0, 1], dtype=jnp.int32)

    sim_p = init_head_params(k_s, IN_DIM, HIDDEN, 1)
    reg_p = init_head_params(k_r, IN_DIM, HIDDEN, 6)
    sim_tp = init_head_params(k_st, IN_DIM, HIDDEN, 1)
    reg_tp = init_head_params(k_rt, IN_DIM, HIDDEN, 6)

    raw_params = {
        "main": {"w1s": sim_p["w1"], "b1s": sim_p["b1"],
                 "w2s": sim_p["w2"], "b2s": sim_p["b2"],
                 "w1r": reg_p["w1"], "b1r": reg_p["b1"],
                 "w2r": reg_p["w2"], "b2r": reg_p["b2"]},
        "topn": {"w1s": sim_tp["w1"], "b1s": sim_tp["b1"],
                 "w2s": sim_tp["w2"], "b2s": sim_tp["b2"],
                 "w1r": reg_tp["w1"], "b1r": reg_tp["b1"],
                 "w2r": reg_tp["w2"], "b2r": reg_tp["b2"]},
    }
    fused_params = {
        "main": fuse_head_params(sim_p, reg_p),
        "topn": fuse_head_params(sim_tp, reg_tp),
    }

    fwd = jax.jit(functools.partial(lanref_forward, topN=TOPN))
    out, raw = fwd(phrase_embed, box_features, target_ids, fused_params)
    out = jax.tree_util.tree_map(jax.block_until_ready, out)
    pred_sim, reg_offset, pred_sim_topN, reg_offset_topN, topN_ids = raw

    # correctness check of the Pallas hot path vs plain-JAX f32 reference
    box_all = jnp.broadcast_to(box_features[:, None, :, :], (BATCH, P, NB, D))
    sim_ref, reg_ref = pair_prediction_ref(phrase_embed, box_all, raw_params["main"])
    assert jnp.allclose(pred_sim, sim_ref, atol=2e-2, rtol=2e-2), "similarity mismatch"
    assert jnp.allclose(reg_offset, reg_ref, atol=2e-2, rtol=2e-2), "reg offset mismatch"

    # topN path check — use the kernel's own topN ids so ordering ties cannot
    # change the gather and the comparison tests only the MLP math.
    feats_topN_chk = jax.vmap(lambda f, idx: f[idx])(box_features, topN_ids)
    sim_t_ref, reg_t_ref = pair_prediction_ref(
        phrase_embed, feats_topN_chk, raw_params["topn"])
    assert jnp.allclose(pred_sim_topN, sim_t_ref, atol=2e-2, rtol=2e-2), "topN sim mismatch"
    assert jnp.allclose(reg_offset_topN, reg_t_ref, atol=2e-2, rtol=2e-2), "topN reg mismatch"

    assert out["batch_pred_similarity"].shape == (BATCH, NB)
    assert out["batch_reg_offset"].shape == (BATCH, NB, 6)
    assert out["batch_pred_similarity_topN"].shape == (BATCH, TOPN)
    assert out["batch_reg_offset_topN"].shape == (BATCH, TOPN, 6)
    assert out["batch_topN_target_ids"].shape == (BATCH, TOPN)
    assert out["batch_target_embed"].shape == (BATCH, D)

    print("KERNEL_OK")
</pallas_src>

<mosaic_0001>
module attributes {stable_mosaic.version = 11 : i64} {
  func.func @_pairs_all_kernel(%arg0: i32, %arg1: i32, %arg2: memref<1x4x128xf32, #tpu.memory_space<vmem>>, %arg3: memref<1x32x128xf32, #tpu.memory_space<vmem>>, %arg4: memref<256x512xbf16, #tpu.memory_space<vmem>>, %arg5: memref<128x512xbf16, #tpu.memory_space<vmem>>, %arg6: memref<128x512xbf16, #tpu.memory_space<vmem>>, %arg7: memref<1x512xf32, #tpu.memory_space<vmem>>, %arg8: memref<8x512xf32, #tpu.memory_space<vmem>>, %arg9: memref<8x1xf32, #tpu.memory_space<vmem>>, %arg10: memref<1x1x8x128xf32, #tpu.memory_space<vmem>>) attributes {dimension_semantics = [#tpu.dimension_semantics<parallel>, #tpu.dimension_semantics<parallel>], iteration_bounds = array<i64: 2, 1>, scalar_prefetch = 0 : i64, scratch_operands = 0 : i64, tpu.core_type = #tpu.core_type<tc>, window_params = [{transform_indices = @transform_0, window_bounds = array<i64: 1, 4, 128>}, {transform_indices = @transform_1, window_bounds = array<i64: 1, 32, 128>}, {pipeline_mode = #tpu.pipeline_mode<synchronous>, transform_indices = @transform_2, window_bounds = array<i64: 256, 512>}, {pipeline_mode = #tpu.pipeline_mode<synchronous>, transform_indices = @transform_3, window_bounds = array<i64: 128, 512>}, {pipeline_mode = #tpu.pipeline_mode<synchronous>, transform_indices = @transform_4, window_bounds = array<i64: 128, 512>}, {pipeline_mode = #tpu.pipeline_mode<synchronous>, transform_indices = @transform_5, window_bounds = array<i64: 1, 512>}, {pipeline_mode = #tpu.pipeline_mode<synchronous>, transform_indices = @transform_6, window_bounds = array<i64: 8, 512>}, {pipeline_mode = #tpu.pipeline_mode<synchronous>, transform_indices = @transform_7, window_bounds = array<i64: 8, 1>}, {transform_indices = @transform_8, window_bounds = array<i64: 1, 1, 8, 128>}]} {
    %c0 = arith.constant 0 : index
    %c0_0 = arith.constant 0 : index
    %c0_1 = arith.constant 0 : index
    %0 = vector.load %arg2[%c0, %c0_0, %c0_1] : memref<1x4x128xf32, #tpu.memory_space<vmem>>, vector<1x4x128xf32>
    %1 = vector.shape_cast %0 : vector<1x4x128xf32> to vector<4x128xf32>
    %c0_2 = arith.constant 0 : index
    %c0_3 = arith.constant 0 : index
    %c0_4 = arith.constant 0 : index
    %2 = vector.load %arg3[%c0_2, %c0_3, %c0_4] : memref<1x32x128xf32, #tpu.memory_space<vmem>>, vector<1x32x128xf32>
    %3 = vector.shape_cast %2 : vector<1x32x128xf32> to vector<32x128xf32>
    %4 = arith.truncf %1 : vector<4x128xf32> to vector<4x128xbf16>
    %c0_5 = arith.constant 0 : index
    %c0_6 = arith.constant 0 : index
    %5 = vector.load %arg5[%c0_5, %c0_6] : memref<128x512xbf16, #tpu.memory_space<vmem>>, vector<128x512xbf16>
    %cst = arith.constant dense<0.000000e+00> : vector<4x512xf32>
    %6 = tpu.matmul %4, %5, %cst {dimension_numbers = #tpu.dot_dimension_numbers<[1], [0], [0], [1], [0, 0, 1, 1], [], []>} : vector<4x128xbf16>, vector<128x512xbf16>, vector<4x512xf32> -> vector<4x512xf32>
    %7 = arith.truncf %3 : vector<32x128xf32> to vector<32x128xbf16>
    %c0_7 = arith.constant 0 : index
    %c0_8 = arith.constant 0 : index
    %8 = vector.load %arg6[%c0_7, %c0_8] : memref<128x512xbf16, #tpu.memory_space<vmem>>, vector<128x512xbf16>
    %cst_9 = arith.constant dense<0.000000e+00> : vector<32x512xf32>
    %9 = tpu.matmul %7, %8, %cst_9 {dimension_numbers = #tpu.dot_dimension_numbers<[1], [0], [0], [1], [0, 0, 1, 1], [], []>} : vector<32x128xbf16>, vector<128x512xbf16>, vector<32x512xf32> -> vector<32x512xf32>
    %10 = vector.shape_cast %1 : vector<4x128xf32> to vector<4x1x128xf32>
    %11 = vector.shape_cast %3 : vector<32x128xf32> to vector<1x32x128xf32>
    %12 = vector.broadcast %10 : vector<4x1x128xf32> to vector<4x32x128xf32>
    %13 = vector.broadcast %11 : vector<1x32x128xf32> to vector<4x32x128xf32>
    %14 = arith.mulf %12, %13 : vector<4x32x128xf32>
    %15 = arith.truncf %14 : vector<4x32x128xf32> to vector<4x32x128xbf16>
    %16 = vector.shape_cast %1 : vector<4x128xf32> to vector<4x1x128xf32>
    %17 = vector.shape_cast %3 : vector<32x128xf32> to vector<1x32x128xf32>
    %18 = vector.broadcast %16 : vector<4x1x128xf32> to vector<4x32x128xf32>
    %19 = vector.broadcast %17 : vector<1x32x128xf32> to vector<4x32x128xf32>
    %20 = arith.subf %18, %19 : vector<4x32x128xf32>
    %21 = arith.truncf %20 : vector<4x32x128xf32> to vector<4x32x128xbf16>
    %22 = tpu.concatenate %15, %21 in 2 : vector<4x32x128xbf16>, vector<4x32x128xbf16> -> vector<4x32x256xbf16>
    %23 = vector.shape_cast %22 : vector<4x32x256xbf16> to vector<128x256xbf16>
    %c0_10 = arith.constant 0 : index
    %c0_11 = arith.constant 0 : index
    %24 = vector.load %arg4[%c0_10, %c0_11] : memref<256x512xbf16, #tpu.memory_space<vmem>>, vector<256x512xbf16>
    %cst_12 = arith.constant dense<0.000000e+00> : vector<128x512xf32>
    %25 = tpu.matmul %23, %24, %cst_12 {dimension_numbers = #tpu.dot_dimension_numbers<[1], [0], [0], [1], [0, 0, 1, 1], [], []>} : vector<128x256xbf16>, vector<256x512xbf16>, vector<128x512xf32> -> vector<128x512xf32>
    %26 = vector.shape_cast %25 : vector<128x512xf32> to vector<4x32x512xf32>
    %27 = vector.shape_cast %6 : vector<4x512xf32> to vector<4x1x512xf32>
    %28 = vector.broadcast %27 : vector<4x1x512xf32> to vector<4x32x512xf32>
    %29 = arith.addf %26, %28 : vector<4x32x512xf32>
    %30 = vector.shape_cast %9 : vector<32x512xf32> to vector<1x32x512xf32>
    %31 = vector.broadcast %30 : vector<1x32x512xf32> to vector<4x32x512xf32>
    %32 = arith.addf %29, %31 : vector<4x32x512xf32>
    %c0_13 = arith.constant 0 : index
    %c0_14 = arith.constant 0 : index
    %33 = vector.load %arg7[%c0_13, %c0_14] : memref<1x512xf32, #tpu.memory_space<vmem>>, vector<1x512xf32>
    %34 = vector.shape_cast %33 : vector<1x512xf32> to vector<1x1x512xf32>
    %35 = vector.broadcast %34 : vector<1x1x512xf32> to vector<4x32x512xf32>
    %36 = arith.addf %32, %35 : vector<4x32x512xf32>
    %cst_15 = arith.constant 0.00999999977 : f32
    %37 = vector.broadcast %cst_15 : f32 to vector<4x32x512xf32>
    %38 = arith.mulf %37, %36 : vector<4x32x512xf32>
    %39 = arith.maximumf %36, %38 : vector<4x32x512xf32>
    %c0_16 = arith.constant 0 : index
    %c0_17 = arith.constant 0 : index
    %40 = vector.load %arg8[%c0_16, %c0_17] : memref<8x512xf32, #tpu.memory_space<vmem>>, vector<8x512xf32>
    %41 = vector.shape_cast %39 : vector<4x32x512xf32> to vector<128x512xf32>
    "tpu.trace_start"() <{level = 10 : i32, message = "ok,rk->or"}> : () -> ()
    %cst_18 = arith.constant dense<0.000000e+00> : vector<8x128xf32>
    %42 = tpu.matmul %40, %41, %cst_18 {dimension_numbers = #tpu.dot_dimension_numbers<[1], [1], [0], [0], [0, 0, 1, 0], [], []>} : vector<8x512xf32>, vector<128x512xf32>, vector<8x128xf32> -> vector<8x128xf32>
    "tpu.trace_stop"() : () -> ()
    %c0_19 = arith.constant 0 : index
    %c0_20 = arith.constant 0 : index
    %43 = vector.load %arg9[%c0_19, %c0_20] : memref<8x1xf32, #tpu.memory_space<vmem>>, vector<8x1xf32>
    %44 = vector.broadcast %43 : vector<8x1xf32> to vector<8x128xf32>
    %45 = arith.addf %42, %44 : vector<8x128xf32>
    %46 = vector.shape_cast %45 : vector<8x128xf32> to vector<1x1x8x128xf32>
    %c0_21 = arith.constant 0 : index
    %c0_22 = arith.constant 0 : index
    %c0_23 = arith.constant 0 : index
    %c0_24 = arith.constant 0 : index
    %47 = vector.load %arg10[%c0_21, %c0_22, %c0_23, %c0_24] : memref<1x1x8x128xf32, #tpu.memory_space<vmem>>, vector<1x1x8x128xf32>
    tpu.vector_store %arg10[%c0_21, %c0_22, %c0_23, %c0_24], %46 {strides = array<i32>} : memref<1x1x8x128xf32, #tpu.memory_space<vmem>>, vector<1x1x8x128xf32>,
    return
  }
  func.func @transform_0(%arg0: i32, %arg1: i32) -> (i32, i32, i32) {
    %c0_i32 = arith.constant 0 : i32
    %c0_i32_0 = arith.constant 0 : i32
    %c0_i32_1 = arith.constant 0 : i32
    return %arg0, %c0_i32, %c0_i32_0 : i32, i32, i32
  }
  func.func @transform_1(%arg0: i32, %arg1: i32) -> (i32, i32, i32) {
    %c0_i32 = arith.constant 0 : i32
    %c0_i32_0 = arith.constant 0 : i32
    return %arg0, %arg1, %c0_i32 : i32, i32, i32
  }
  func.func @transform_2(%arg0: i32, %arg1: i32) -> (i32, i32) {
    %c0_i32 = arith.constant 0 : i32
    %c0_i32_0 = arith.constant 0 : i32
    %c0_i32_1 = arith.constant 0 : i32
    return %c0_i32, %c0_i32_0 : i32, i32
  }
  func.func @transform_3(%arg0: i32, %arg1: i32) -> (i32, i32) {
    %c0_i32 = arith.constant 0 : i32
    %c0_i32_0 = arith.constant 0 : i32
    %c0_i32_1 = arith.constant 0 : i32
    return %c0_i32, %c0_i32_0 : i32, i32
  }
  func.func @transform_4(%arg0: i32, %arg1: i32) -> (i32, i32) {
    %c0_i32 = arith.constant 0 : i32
    %c0_i32_0 = arith.constant 0 : i32
    %c0_i32_1 = arith.constant 0 : i32
    return %c0_i32, %c0_i32_0 : i32, i32
  }
  func.func @transform_5(%arg0: i32, %arg1: i32) -> (i32, i32) {
    %c0_i32 = arith.constant 0 : i32
    %c0_i32_0 = arith.constant 0 : i32
    %c0_i32_1 = arith.constant 0 : i32
    return %c0_i32, %c0_i32_0 : i32, i32
  }
  func.func @transform_6(%arg0: i32, %arg1: i32) -> (i32, i32) {
    %c0_i32 = arith.constant 0 : i32
    %c0_i32_0 = arith.constant 0 : i32
    %c0_i32_1 = arith.constant 0 : i32
    return %c0_i32, %c0_i32_0 : i32, i32
  }
  func.func @transform_7(%arg0: i32, %arg1: i32) -> (i32, i32) {
    %c0_i32 = arith.constant 0 : i32
    %c0_i32_0 = arith.constant 0 : i32
    %c0_i32_1 = arith.constant 0 : i32
    return %c0_i32, %c0_i32_0 : i32, i32
  }
  func.func @transform_8(%arg0: i32, %arg1: i32) -> (i32, i32, i32, i32) {
    %c0_i32 = arith.constant 0 : i32
    %c0_i32_0 = arith.constant 0 : i32
    %c0_i32_1 = arith.constant 0 : i32
    return %arg0, %arg1, %c0_i32, %c0_i32_0 : i32, i32, i32, i32
  }
}

module attributes {stable_mosaic.version = 11 : i64} {
  func.func @_pairs_topn_kernel(%arg0: i32, %arg1: memref<16x128xf32, #tpu.memory_space<vmem>>, %arg2: memref<16x8x128xf32, #tpu.memory_space<vmem>>, %arg3: memref<256x512xbf16, #tpu.memory_space<vmem>>, %arg4: memref<128x512xbf16, #tpu.memory_space<vmem>>, %arg5: memref<128x512xbf16, #tpu.memory_space<vmem>>, %arg6: memref<1x512xf32, #tpu.memory_space<vmem>>, %arg7: memref<8x512xf32, #tpu.memory_space<vmem>>, %arg8: memref<8x1xf32, #tpu.memory_space<vmem>>, %arg9: memref<8x128xf32, #tpu.memory_space<vmem>>) attributes {dimension_semantics = [#tpu.dimension_semantics<arbitrary>], iteration_bounds = array<i64: 1>, scalar_prefetch = 0 : i64, scratch_operands = 0 : i64, tpu.core_type = #tpu.core_type<tc>, window_params = [{pipeline_mode = #tpu.pipeline_mode<synchronous>, transform_indices = @transform_0, window_bounds = array<i64: 16, 128>}, {pipeline_mode = #tpu.pipeline_mode<synchronous>, transform_indices = @transform_1, window_bounds = array<i64: 16, 8, 128>}, {pipeline_mode = #tpu.pipeline_mode<synchronous>, transform_indices = @transform_2, window_bounds = array<i64: 256, 512>}, {pipeline_mode = #tpu.pipeline_mode<synchronous>, transform_indices = @transform_3, window_bounds = array<i64: 128, 512>}, {pipeline_mode = #tpu.pipeline_mode<synchronous>, transform_indices = @transform_4, window_bounds = array<i64: 128, 512>}, {pipeline_mode = #tpu.pipeline_mode<synchronous>, transform_indices = @transform_5, window_bounds = array<i64: 1, 512>}, {pipeline_mode = #tpu.pipeline_mode<synchronous>, transform_indices = @transform_6, window_bounds = array<i64: 8, 512>}, {pipeline_mode = #tpu.pipeline_mode<synchronous>, transform_indices = @transform_7, window_bounds = array<i64: 8, 1>}, {pipeline_mode = #tpu.pipeline_mode<synchronous>, transform_indices = @transform_8, window_bounds = array<i64: 8, 128>}]} {
    %c0 = arith.constant 0 : index
    %c0_0 = arith.constant 0 : index
    %0 = vector.load %arg1[%c0, %c0_0] : memref<16x128xf32, #tpu.memory_space<vmem>>, vector<16x128xf32>
    %c0_1 = arith.constant 0 : index
    %c0_2 = arith.constant 0 : index
    %c0_3 = arith.constant 0 : index
    %1 = vector.load %arg2[%c0_1, %c0_2, %c0_3] : memref<16x8x128xf32, #tpu.memory_space<vmem>>, vector<16x8x128xf32>
    %2 = arith.truncf %0 : vector<16x128xf32> to vector<16x128xbf16>
    %c0_4 = arith.constant 0 : index
    %c0_5 = arith.constant 0 : index
    %3 = vector.load %arg4[%c0_4, %c0_5] : memref<128x512xbf16, #tpu.memory_space<vmem>>, vector<128x512xbf16>
    %cst = arith.constant dense<0.000000e+00> : vector<16x512xf32>
    %4 = tpu.matmul %2, %3, %cst {dimension_numbers = #tpu.dot_dimension_numbers<[1], [0], [0], [1], [0, 0, 1, 1], [], []>} : vector<16x128xbf16>, vector<128x512xbf16>, vector<16x512xf32> -> vector<16x512xf32>
    %5 = vector.shape_cast %1 : vector<16x8x128xf32> to vector<128x128xf32>
    %6 = arith.truncf %5 : vector<128x128xf32> to vector<128x128xbf16>
    %c0_6 = arith.constant 0 : index
    %c0_7 = arith.constant 0 : index
    %7 = vector.load %arg5[%c0_6, %c0_7] : memref<128x512xbf16, #tpu.memory_space<vmem>>, vector<128x512xbf16>
    %cst_8 = arith.constant dense<0.000000e+00> : vector<128x512xf32>
    %8 = tpu.matmul %6, %7, %cst_8 {dimension_numbers = #tpu.dot_dimension_numbers<[1], [0], [0], [1], [0, 0, 1, 1], [], []>} : vector<128x128xbf16>, vector<128x512xbf16>, vector<128x512xf32> -> vector<128x512xf32>
    %9 = vector.shape_cast %0 : vector<16x128xf32> to vector<16x1x128xf32>
    %10 = vector.broadcast %9 : vector<16x1x128xf32> to vector<16x8x128xf32>
    %11 = arith.mulf %10, %1 : vector<16x8x128xf32>
    %12 = arith.truncf %11 : vector<16x8x128xf32> to vector<16x8x128xbf16>
    %13 = vector.shape_cast %0 : vector<16x128xf32> to vector<16x1x128xf32>
    %14 = vector.broadcast %13 : vector<16x1x128xf32> to vector<16x8x128xf32>
    %15 = arith.subf %14, %1 : vector<16x8x128xf32>
    %16 = arith.truncf %15 : vector<16x8x128xf32> to vector<16x8x128xbf16>
    %17 = tpu.concatenate %12, %16 in 2 : vector<16x8x128xbf16>, vector<16x8x128xbf16> -> vector<16x8x256xbf16>
    %18 = vector.shape_cast %17 : vector<16x8x256xbf16> to vector<128x256xbf16>
    %c0_9 = arith.constant 0 : index
    %c0_10 = arith.constant 0 : index
    %19 = vector.load %arg3[%c0_9, %c0_10] : memref<256x512xbf16, #tpu.memory_space<vmem>>, vector<256x512xbf16>
    %cst_11 = arith.constant dense<0.000000e+00> : vector<128x512xf32>
    %20 = tpu.matmul %18, %19, %cst_11 {dimension_numbers = #tpu.dot_dimension_numbers<[1], [0], [0], [1], [0, 0, 1, 1], [], []>} : vector<128x256xbf16>, vector<256x512xbf16>, vector<128x512xf32> -> vector<128x512xf32>
    %21 = arith.addf %20, %8 : vector<128x512xf32>
    %c0_12 = arith.constant 0 : index
    %c0_13 = arith.constant 0 : index
    %22 = vector.load %arg6[%c0_12, %c0_13] : memref<1x512xf32, #tpu.memory_space<vmem>>, vector<1x512xf32>
    %23 = vector.broadcast %22 : vector<1x512xf32> to vector<128x512xf32>
    %24 = arith.addf %21, %23 : vector<128x512xf32>
    %25 = vector.shape_cast %24 : vector<128x512xf32> to vector<16x8x512xf32>
    %26 = vector.shape_cast %4 : vector<16x512xf32> to vector<16x1x512xf32>
    %27 = vector.broadcast %26 : vector<16x1x512xf32> to vector<16x8x512xf32>
    %28 = arith.addf %25, %27 : vector<16x8x512xf32>
    %cst_14 = arith.constant 0.00999999977 : f32
    %29 = vector.broadcast %cst_14 : f32 to vector<16x8x512xf32>
    %30 = arith.mulf %29, %28 : vector<16x8x512xf32>
    %31 = arith.maximumf %28, %30 : vector<16x8x512xf32>
    %32 = vector.shape_cast %31 : vector<16x8x512xf32> to vector<128x512xf32>
    %c0_15 = arith.constant 0 : index
    %c0_16 = arith.constant 0 : index
    %33 = vector.load %arg7[%c0_15, %c0_16] : memref<8x512xf32, #tpu.memory_space<vmem>>, vector<8x512xf32>
    "tpu.trace_start"() <{level = 10 : i32, message = "ok,rk->or"}> : () -> ()
    %cst_17 = arith.constant dense<0.000000e+00> : vector<8x128xf32>
    %34 = tpu.matmul %33, %32, %cst_17 {dimension_numbers = #tpu.dot_dimension_numbers<[1], [1], [0], [0], [0, 0, 1, 0], [], []>} : vector<8x512xf32>, vector<128x512xf32>, vector<8x128xf32> -> vector<8x128xf32>
    "tpu.trace_stop"() : () -> ()
    %c0_18 = arith.constant 0 : index
    %c0_19 = arith.constant 0 : index
    %35 = vector.load %arg8[%c0_18, %c0_19] : memref<8x1xf32, #tpu.memory_space<vmem>>, vector<8x1xf32>
    %36 = vector.broadcast %35 : vector<8x1xf32> to vector<8x128xf32>
    %37 = arith.addf %34, %36 : vector<8x128xf32>
    %c0_20 = arith.constant 0 : index
    %c0_21 = arith.constant 0 : index
    %38 = vector.load %arg9[%c0_20, %c0_21] : memref<8x128xf32, #tpu.memory_space<vmem>>, vector<8x128xf32>
    tpu.vector_store %arg9[%c0_20, %c0_21], %37 {strides = array<i32>} : memref<8x128xf32, #tpu.memory_space<vmem>>, vector<8x128xf32>,
    return
  }
  func.func @transform_0(%arg0: i32) -> (i32, i32) {
    %c0_i32 = arith.constant 0 : i32
    %c0_i32_0 = arith.constant 0 : i32
    %c0_i32_1 = arith.constant 0 : i32
    return %c0_i32, %c0_i32_0 : i32, i32
  }
  func.func @transform_1(%arg0: i32) -> (i32, i32, i32) {
    %c0_i32 = arith.constant 0 : i32
    %c0_i32_0 = arith.constant 0 : i32
    %c0_i32_1 = arith.constant 0 : i32
    %c0_i32_2 = arith.constant 0 : i32
    return %c0_i32, %c0_i32_0, %c0_i32_1 : i32, i32, i32
  }
  func.func @transform_2(%arg0: i32) -> (i32, i32) {
    %c0_i32 = arith.constant 0 : i32
    %c0_i32_0 = arith.constant 0 : i32
    %c0_i32_1 = arith.constant 0 : i32
    return %c0_i32, %c0_i32_0 : i32, i32
  }
  func.func @transform_3(%arg0: i32) -> (i32, i32) {
    %c0_i32 = arith.constant 0 : i32
    %c0_i32_0 = arith.constant 0 : i32
    %c0_i32_1 = arith.constant 0 : i32
    return %c0_i32, %c0_i32_0 : i32, i32
  }
  func.func @transform_4(%arg0: i32) -> (i32, i32) {
    %c0_i32 = arith.constant 0 : i32
    %c0_i32_0 = arith.constant 0 : i32
    %c0_i32_1 = arith.constant 0 : i32
    return %c0_i32, %c0_i32_0 : i32, i32
  }
  func.func @transform_5(%arg0: i32) -> (i32, i32) {
    %c0_i32 = arith.constant 0 : i32
    %c0_i32_0 = arith.constant 0 : i32
    %c0_i32_1 = arith.constant 0 : i32
    return %c0_i32, %c0_i32_0 : i32, i32
  }
  func.func @transform_6(%arg0: i32) -> (i32, i32) {
    %c0_i32 = arith.constant 0 : i32
    %c0_i32_0 = arith.constant 0 : i32
    %c0_i32_1 = arith.constant 0 : i32
    return %c0_i32, %c0_i32_0 : i32, i32
  }
  func.func @transform_7(%arg0: i32) -> (i32, i32) {
    %c0_i32 = arith.constant 0 : i32
    %c0_i32_0 = arith.constant 0 : i32
    %c0_i32_1 = arith.constant 0 : i32
    return %c0_i32, %c0_i32_0 : i32, i32
  }
  func.func @transform_8(%arg0: i32) -> (i32, i32) {
    %c0_i32 = arith.constant 0 : i32
    %c0_i32_0 = arith.constant 0 : i32
    %c0_i32_1 = arith.constant 0 : i32
    return %c0_i32, %c0_i32_0 : i32, i32
  }
}

</mosaic_0001>

<bundles_post_ra>
// kernel: squeeze.3
= control target key start
LH: loop header
LB: loop body
LE: loop exit
PB: predicated region body
PF: predicated region fallthrough
CT: control target
= control target key end

     0   :  { %s71_s8 = smov 104   ;;  %vm7_vm0 = vcmask 64512   ;;  %s72_s9 = smov 112   ;;  %s104_s0 = inlined_call_operand.vmem [shape: f32[64], index: 0, kind: input, shape index: {}]   ;;  %s105_s1 = inlined_call_operand.vmem [shape: f32[2,4,8], index: 1, kind: output, shape index: {}]  }
   0x1   :  { %v4_v0 = vld [vmem:[%s104_s0] sm:$0x1]  ;;  %s70_s0 = smov 120   ;;  %s73_s10 = smov 96  }
   0x2   :  { %5 = vst [vmem:[#allocation1] sm:$0x1] %v4_v0  ;;  %s74_s11 = smov 88   ;;  %s75_s12 = smov 80  }
   0x3   :  { %s76_s13 = smov 72  }
   0x9   :  { %v9_v1 = vld [vmem:[#allocation1] sm:$0x1]  }
   0xa   :  { %v21_v2 = vld [vmem:[#allocation1] sm:$0x1]   ;;  %10 = vrot.lane.b32.xlu0 %v9_v1, %s70_s0 }
   0xb   :  { %22 = vrot.lane.b32.xlu1 %v21_v2, %s71_s8  ;;  %v15_v3 = vld [vmem:[#allocation1] sm:$0x1]  }
   0xc   :  { %v27_v4 = vld [vmem:[#allocation1] sm:$0x1]  }
   0xd   :  { %v6_v5 = vld [vmem:[#allocation1] sm:$0x1]  }
   0xe   :  { %8 = vst.msk [vmem:[#allocation0] sm:$0x1] %vm7_vm0, %v6_v5   ;;  %16 = vrot.lane.b32.xlu0 %v15_v3, %s72_s9  ;;  %v33_v6 = vld [vmem:[#allocation1] sm:$0x1]  }
   0xf   :  { %28 = vrot.lane.b32.xlu1 %v27_v4, %s73_s10  ;;  %v39_v7 = vld [vmem:[#allocation1] sm:$0x1]  }
  0x10   :  { %v45_v8 = vld [vmem:[#allocation1] sm:$0x1]  }
  0x12   :  { %34 = vrot.lane.b32.xlu0 %v33_v6, %s74_s11 }
  0x13   :  { %40 = vrot.lane.b32.xlu1 %v39_v7, %s75_s12 }
  0x16   :  { %46 = vrot.lane.b32.xlu0 %v45_v8, %s76_s13 }
  0x7c   :  { %v11_v9 = vpop.permute.xlu0 %10  }
  0x7d   :  { %v23_v10 = vpop.permute.xlu1 %22   ;;  %14 = vst.msk [vmem:[#allocation0 + $0x1] sm:$0x1] %vm7_vm0, %v11_v9  }
  0x7e   :  { %26 = vst.msk [vmem:[#allocation0 + $0x3] sm:$0x1] %vm7_vm0, %v23_v10  }
  0x80   :  { %v17_v11 = vpop.permute.xlu0 %16  }
  0x81   :  { %v29_v12 = vpop.permute.xlu1 %28   ;;  %20 = vst.msk [vmem:[#allocation0 + $0x2] sm:$0x1] %vm7_vm0, %v17_v11  }
  0x82   :  { %32 = vst.msk [vmem:[#allocation0 + $0x8] sm:$0x1] %vm7_vm0, %v29_v12  }
  0x84   :  { %v35_v13 = vpop.permute.xlu0 %34  }
  0x85   :  { %v41_v14 = vpop.permute.xlu1 %40   ;;  %38 = vst.msk [vmem:[#allocation0 + $0x9] sm:$0x1] %vm7_vm0, %v35_v13  }
  0x86   :  { %44 = vst.msk [vmem:[#allocation0 + $0xa] sm:$0x1] %vm7_vm0, %v41_v14  }
  0x88   :  { %v54_v15 = vld [vmem:[#allocation0] sm:$0xf]  ;;  %v47_v16 = vpop.permute.xlu0 %46  }
  0x89   :  { %56 = vst [vmem:[%s105_s1] sm:$0xf] %v54_v15  ;;  %50 = vst.msk [vmem:[#allocation0 + $0xb] sm:$0x1] %vm7_vm0, %v47_v16  }
  0x90   :  { %v58_v17 = vld [vmem:[#allocation0 + $0x8] sm:$0xf] }
  0x91   :  { %62 = vst [vmem:[%s105_s1 + $0x4] sm:$0xf] %v58_v17 }

// kernel: lanref_forward.2
= control target key start
LH: loop header
LB: loop body
LE: loop exit
PB: predicated region body
PF: predicated region fallthrough
CT: control target
= control target key end

     0   :  { %s4401_s0 = inlined_call_operand.vmem [shape: f32[2,4,128], index: 0, kind: input, shape index: {}]   ;;  %s4402_s1 = inlined_call_operand.hbm [shape: f32[2,32,128], index: 1, kind: input, shape index: {}]   ;;  %s4403_s2 = inlined_call_operand.hbm [shape: bf16[256,512], index: 2, kind: input, shape index: {}]   ;;  %s4404_s3 = inlined_call_operand.hbm [shape: bf16[128,512], index: 3, kind: input, shape index: {}]   ;;  %s4405_s4 = inlined_call_operand.hbm [shape: bf16[128,512], index: 4, kind: input, shape index: {}]   ;;  %s4406_s5 = inlined_call_operand.vmem [shape: f32[1,512], index: 5, kind: input, shape index: {}]   ;;  %s4407_s6 = inlined_call_operand.hbm [shape: f32[8,512], index: 6, kind: input, shape index: {}]   ;;  %s4408_s7 = inlined_call_operand.vmem [shape: f32[8,1], index: 7, kind: input, shape index: {}]   ;;  %s4409_s8 = inlined_call_operand.vmem [shape: f32[2,1,8,128], index: 8, kind: output, shape index: {}]  }
   0x1   :  { %4444 = sst [smem:[#allocation35_spill]] %s4406_s5 }
   0x2   :  { %4445 = sst [smem:[#allocation36_spill]] %s4409_s8 }
   0x3   :  { %13 = vsyncpa [#allocation3], 0 }
   0x4   :  { %15 = vsyncpa [#allocation3 + $0x1], 0 }
   0x5   :  { %16 = vsyncpa [#allocation5], 0 }
   0x6   :  { %17 = vsyncpa [#allocation8], 0  ;;  %s3222_s27 = smov 0   ;;  %s3224_s28 = smov 0  }
   0x7   :  { %s3226_s29 = smov 0   ;;  %s3228_s30 = smov 0  }
   0x8   :  { %s3230_s9 = smov 0   ;;  %s3232_s10 = smov 0  }
   0x9 LB: > { %s2453_s11 = sadd.s32 4294967295, %s3164_s10   ;;  %p83_p0 = scmp.ne.s32.totalorder %s3148_s28, %s3144_s27  ;;  %s3164_s10 = sphi %s3232_s10, %s23_s10   ;;  %s3160_s9 = sphi %s3230_s9, %s4541_s9   ;;  %s3156_s30 = sphi %s3228_s30, %s4540_s30   ;;  %s3152_s29 = sphi %s3226_s29, %s4539_s29   ;;  %s3148_s28 = sphi %s3224_s28, %s4538_s28   ;;  %s3144_s27 = sphi %s3222_s27, %s4537_s27  }
   0xa   : > { %p3252_p1 = scmp.eq.s32.totalorder %s2453_s11, 0  ;;  %p2455_p2 = scmp.ge.s32.totalorder %s3164_s10, 1 }
   0xb   : > { %p248_p3 = scmp.lt.s32.totalorder %s3164_s10, 3  ;;  %s3166_s15 = smov [#allocation4]  }
   0xc   : > { %s4446_s12 = scalar_select %p3252_p1, 1, 0 }
   0xd   : > { %p3260_p4 = por %p3252_p1, %p83_p0  ;;  %p3264_p5 = pnand %p2455_p2, %p248_p3 }
   0xe   : > { %s260_s16 = sshll.u32 %s3166_s15, 4  ;;  %s3167_s18 = smov [#allocation7]   ;;  %s3268_s16 = int_to_ptr.vmem [resolvable:$true] %s260_s16 }
   0xf   : > { %s4447_s13 = scalar_select %p3260_p4, 1, 0 }
  0x10   : > { %s4448_s14 = scalar_select %p3264_p5, 1, 0 }
  0x11   : > { %p2687_p6 = pneg %p3264_p5  ;;  %s286_s19 = sshll.u32 %s3167_s18, 4  ;;  %s3278_s19 = int_to_ptr.vmem [resolvable:$true] %s286_s19 }
  0x12   : > { %s3168_s20 = smov [#allocation6]   ;;  %s2964_s24 = scalar_lea.hbm %s4403_s2, 8192 }
  0x13   : > { %p3274_p7 = pnand %p2687_p6, %p3252_p1  ;;  %s3280_s21 = sshll.u32 %s3168_s20, 4  ;;  %s274_s21 = int_to_ptr.vmem [resolvable:$true] %s3280_s21 }
  0x14   : > { %p2965_p8 = scmp.ne.s32.totalorder %s4403_s2, %s2964_s24  ;;  %p2971_p12 = scmp.lt.u32.totalorder %s2964_s24, %s4403_s2 }
  0x15   : > { %p3290_p9 = pneg %p3274_p7 }
  0x17   : > { %p2967_p10 = pnand %p3290_p9, %p2965_p8 }
  0x19   : > { %p2968_p11 = pneg %p2967_p10 }
  0x1b   : > { %p2973_p13 = pnand %p2971_p12, %p2968_p11 }
  0x1d   : > { %2976 = shalt.err (!%p2973_p13)
}
  0x1e   : > { %s2977_s18 = scalar_lea.vmem %s3268_s16, 8192  ;;  %p2985_p6 = scmp.lt.s32.totalorder %s3268_s16, %s3268_s16 }
  0x1f   : > { %p2978_p0 = scmp.ne.s32.totalorder %s3268_s16, %s2977_s18  ;;  %p2986_p1 = scmp.lt.s32.totalorder %s2977_s18, %s2977_s18 }
  0x21   : > { %p2980_p2 = pnand %p2978_p0, %p3290_p9  ;;  %p2987_p8 = por %p2986_p1, %p2985_p6 }
  0x23   : > { %p2981_p3 = pneg %p2980_p2 }
  0x25   : > { %p2988_p10 = pnand %p2987_p8, %p2981_p3 }
  0x27   : > { %2991 = shalt.err (!%p2988_p10)
}
  0x28   : > { %s3169_s20 = smov 256   ;;  %s3170_s22 = smov 16  }
  0x29   : > { %2690 = dma.hbm_to_vmem [thread:$0]  (!%p3274_p7), %s4403_s2, 8192, %s3268_s16, [#allocation5], %s3169_s20, %s3169_s20, %s3170_s22  }
  0x2a   : > { %s2992_s11 = scalar_lea.hbm %s4405_s4, 4096 }
  0x2b   : > { %p2993_p1 = scmp.ne.s32.totalorder %s4405_s4, %s2992_s11  ;;  %p2999_p13 = scmp.lt.u32.totalorder %s2992_s11, %s4405_s4 }
  0x2d   : > { %p2995_p11 = pnand %p2993_p1, %p3290_p9 }
  0x2f   : > { %p2996_p12 = pneg %p2995_p11 }
  0x31   : > { %p3001_p0 = pnand %p2999_p13, %p2996_p12 }
  0x33   : > { %3004 = shalt.err (!%p3001_p0)
}
  0x34   : > { %s3005_s16 = scalar_lea.vmem %s3278_s19, 4096  ;;  %p3013_p8 = scmp.lt.s32.totalorder %s3278_s19, %s3278_s19 }
  0x35   : > { %p3006_p2 = scmp.ne.s32.totalorder %s3278_s19, %s3005_s16  ;;  %p3014_p10 = scmp.lt.s32.totalorder %s3005_s16, %s3005_s16 }
  0x37   : > { %p3008_p3 = pnand %p3006_p2, %p3290_p9  ;;  %p3015_p1 = por %p3014_p10, %p3013_p8 }
  0x39   : > { %p3009_p6 = pneg %p3008_p3 }
  0x3b   : > { %p3016_p11 = pnand %p3015_p1, %p3009_p6 }
  0x3d   : > { %3019 = shalt.err (!%p3016_p11)
}
  0x3e   : > { %2696 = dma.hbm_to_vmem [thread:$0]  (!%p3274_p7), %s4405_s4, 4096, %s3278_s19, [#allocation8], %s3169_s20, %s3169_s20, %s3170_s22  }
  0x3f   : > { %s3020_s25 = scalar_lea.hbm %s4404_s3, 4096 }
  0x40   : > { %p3021_p12 = scmp.ne.s32.totalorder %s4404_s3, %s3020_s25  ;;  %p3027_p2 = scmp.lt.u32.totalorder %s3020_s25, %s4404_s3 }
  0x42   : > { %p3023_p13 = pnand %p3021_p12, %p3290_p9 }
  0x44   : > { %p3024_p0 = pneg %p3023_p13 }
  0x46   : > { %p3029_p3 = pnand %p3027_p2, %p3024_p0 }
  0x48   : > { %3032 = shalt.err (!%p3029_p3)
}
  0x49   : > { %s3033_s16 = scalar_lea.vmem %s274_s21, 4096  ;;  %p3041_p1 = scmp.lt.s32.totalorder %s274_s21, %s274_s21 }
  0x4a   : > { %p3034_p6 = scmp.ne.s32.totalorder %s274_s21, %s3033_s16  ;;  %p3042_p11 = scmp.lt.s32.totalorder %s3033_s16, %s3033_s16 }
  0x4c   : > { %p3036_p8 = pnand %p3034_p6, %p3290_p9  ;;  %p3043_p4 = por %p3042_p11, %p3041_p1 }
  0x4e   : > { %p3037_p10 = pneg %p3036_p8 }
  0x50   : > { %p3044_p5 = pnand %p3043_p4, %p3037_p10 }
  0x52   : > { %3047 = shalt.err (!%p3044_p5)
}
  0x53   : > { %2693 = dma.hbm_to_vmem [thread:$0]  (!%p3274_p7), %s4404_s3, 4096, %s274_s21, [#allocation5], %s3169_s20, %s3169_s20, %s3170_s22  }
  0x54   : > { %s3171_s8 = smov [#allocation9]   ;;  %s3048_s26 = scalar_lea.hbm %s4407_s6, 512 }
  0x55   : > { %s303_s23 = sshll.u32 %s3171_s8, 4  ;;  %p3049_p4 = scmp.ne.s32.totalorder %s4407_s6, %s3048_s26  ;;  %s304_s23 = int_to_ptr.vmem [resolvable:$true] %s303_s23 }
  0x56   : > { %p3055_p13 = scmp.lt.u32.totalorder %s3048_s26, %s4407_s6 }
  0x57   : > { %p3051_p5 = pnand %p3049_p4, %p3290_p9 }
  0x59   : > { %p3052_p12 = pneg %p3051_p5 }
  0x5b   : > { %p3057_p0 = pnand %p3055_p13, %p3052_p12 }
  0x5d   : > { %3060 = shalt.err (!%p3057_p0)
}
  0x5e   : > { %s3061_s21 = scalar_lea.vmem %s304_s23, 512  ;;  %p3069_p8 = scmp.lt.s32.totalorder %s304_s23, %s304_s23 }
  0x5f   : > { %p3062_p2 = scmp.ne.s32.totalorder %s304_s23, %s3061_s21  ;;  %p3070_p10 = scmp.lt.s32.totalorder %s3061_s21, %s3061_s21 }
  0x61   : > { %p3064_p3 = pnand %p3062_p2, %p3290_p9  ;;  %p3071_p1 = por %p3070_p10, %p3069_p8 }
  0x63   : > { %p3065_p6 = pneg %p3064_p3 }
  0x65   : > { %p3072_p11 = pnand %p3071_p1, %p3065_p6 }
  0x67   : > { %3075 = shalt.err (!%p3072_p11)
}
  0x68   : > { %2699 = dma.hbm_to_vmem [thread:$0]  (!%p3274_p7), %s4407_s6, 512, %s304_s23, [#allocation8]  }
  0x69   : > { %s35_s27 = sadd.s32 1, %s3160_s9  ;;  %s70_s19 = sadd.s32 1, %s3152_s29 }
  0x6a   : > { %p37_p9 = scmp.ge.s32.totalorder %s35_s27, 2  ;;  %p77_p4 = scmp.ne.s32.totalorder %s3152_s29, %s3148_s28 }
  0x6b   : > { %p78_p5 = scmp.eq.s32.totalorder %s3164_s10, 0  ;;  %p2708_p12 = scmp.lt.s32.totalorder %s3164_s10, 2 }
  0x6c   : > { %s4543_s27 = smov (%p37_p9, %s35_s27), 0  ;;  %s324_s17 = sand.u32 1, %s3152_s29  }
  0x6d   : > { %p79_p13 = por %p78_p5, %p77_p4  ;;  %s65_s5 = ssub.s32 %s3160_s9, %s4543_s27 }
  0x6e   : > { %p68_p0 = scmp.eq.s32.totalorder %s65_s5, 0  ;;  %s2461_s8 = sshll.u32 %s324_s17, 5 }
  0x6f   : > { %s2602_s24 = sshll.u32 %s3160_s9, 9  ;;  %s328_s15 = scalar_lea.vmem [#allocation2], %s2461_s8 }
  0x70   : > { %s3393_s25 = scalar_select %p68_p0, %s3152_s29, %s70_s19  }
  0x71   : > { %s3398_s11 = scalar_lea.hbm %s4402_s1, %s2602_s24  ;;  %s337_s18 = sshll.u32 %s328_s15, 4  ;;  %s3400_s18 = int_to_ptr.vmem [resolvable:$true] %s337_s18 }
  0x72   : > { %p3404_p7 = pnand %p2708_p12, %p79_p13  ;;  %s3408_s21 = scalar_lea.sflag [#allocation3], %s324_s17 }
  0x73   : > { %s3076_s20 = scalar_lea.hbm %s3398_s11, 512  ;;  %s3081_s5 = scalar_lea.hbm %s4402_s1, 1024 }
  0x74   : > { %p3077_p2 = scmp.ne.s32.totalorder %s3398_s11, %s3076_s20  ;;  %p3078_p3 = pneg %p3404_p7 }
  0x75   : > { %p3082_p10 = scmp.lt.u32.totalorder %s3398_s11, %s4402_s1  ;;  %p3083_p1 = scmp.lt.u32.totalorder %s3081_s5, %s3076_s20 }
  0x76   : > { %p3079_p6 = pnand %p3078_p3, %p3077_p2  ;;  %p3085_p9 = scmp.lt.u32.totalorder %s3076_s20, %s3398_s11 }
  0x77   : > { %p3084_p11 = por %p3083_p1, %p3082_p10 }
  0x78   : > { %p3080_p8 = pneg %p3079_p6 }
  0x79   : > { %p3086_p4 = por %p3085_p9, %p3084_p11 }
  0x7b   : > { %p3087_p5 = pnand %p3086_p4, %p3080_p8 }
  0x7d   : > { %3090 = shalt.err (!%p3087_p5)
}
  0x7e   : > { %s3091_s17 = scalar_lea.vmem %s3400_s18, 512  ;;  %s3172_s26 = smov [#allocation2]  }
  0x7f   : > { %p3092_p12 = scmp.ne.s32.totalorder %s3400_s18, %s3091_s17  ;;  %s3096_s23 = sshll.u32 %s3172_s26, 4  ;;  %s3097_s23 = int_to_ptr.vmem [resolvable:$false] %s3096_s23 }
  0x80   : > { %s3098_s15 = scalar_lea.vmem %s3097_s23, 1024  ;;  %p3099_p2 = scmp.lt.s32.totalorder %s3400_s18, %s3097_s23 }
  0x81   : > { %p3094_p13 = pnand %p3092_p12, %p3078_p3  ;;  %p3100_p6 = scmp.lt.s32.totalorder %s3098_s15, %s3091_s17 }
  0x83   : > { %p3095_p0 = pneg %p3094_p13  ;;  %p3101_p10 = por %p3100_p6, %p3099_p2 }
  0x85   : > { %p3102_p1 = pnand %p3101_p10, %p3095_p0 }
  0x87   : > { %3105 = shalt.err (!%p3102_p1)
}
  0x88   : > { %s3173_s20 = smov 128   ;;  %s3174_s22 = smov 8  }
  0x89   : > { %2703 = dma.hbm_to_vmem [thread:$0]  (!%p3404_p7), %s3398_s11, 512, %s3400_s18, %s3408_s21, %s3173_s20, %s3173_s20, %s3174_s22  }
  0x8a   : > { %p4452_p3 = scmp.ne.s32.totalorder %s4448_s14, 0 }
  0x8c   : > { %349 = sbr.rel (%p4452_p3) target bundleno = 821 (0x335), region = 52 }
  0x93   : > { %s351_s19 = sand.u32 1, %s3148_s28   ;;  %p4453_p8 = scmp.ne.s32.totalorder %s4447_s13, 0 }
  0x94   : > { %s2465_s5 = sshll.u32 %s351_s19, 5  ;;  %s352_s8 = scalar_lea.sflag [#allocation3], %s351_s19 }
  0x95   : > { %s3439_s24 = scalar_lea.vmem [#allocation2], %s2465_s5 }
  0x96   : > { %3131 = dma.done.wait (%p4453_p8), %s352_s8, 512  }
  0x97   : > { %3133 = vsyncadd (%p4453_p8), %s352_s8, 4294966784  ;;  %p4454_p11 = scmp.ne.s32.totalorder %s4446_s12, 0 }
  0x99   : > { %3135 = dma.done.wait (%p4454_p11), [#allocation5], 12288  }
  0x9a   : > { %3137 = vsyncadd (%p4454_p11), [#allocation5], 4294955008 }
  0x9b   : > { %3139 = dma.done.wait (%p4454_p11), [#allocation8], 4608  }
  0x9c   : > { %3141 = vsyncadd (%p4454_p11), [#allocation8], 4294962688  ;;  %v3175_v0 = vmov 0   ;;  %v2772_v1 = vld [vmem:[#allocation6 + $0x4] ss:$16 sps:$4 sm:$0xff]   ;;  %p410_p7 = scmp.lt.s32.totalorder %s3156_s30, 1  ;;  %v1007_v25 = vlaneseq }
  0x9d   : > { %653 = vmatprep.mubr.bf16.mxu0 %v3175_v0  ;;  %694 = vmatprep.mubr.bf16.mxu1 %v3175_v0  ;;  %v2774_v2 = vld [vmem:[#allocation6 + $0xc] ss:$16 sps:$4 sm:$0xff]   ;;  %v2776_v3 = vld [vmem:[#allocation6] ss:$16 sps:$4 sm:$0xff]   ;;  %v2777_v4 = vld [vmem:[#allocation6 + $0x8] ss:$16 sps:$4 sm:$0xff]  }
  0x9e   : > { %2771 = vset.pattern.permute.xlu0 %v3175_v0  ;;  %621 = vmatprep.subr.bf16.mxu0 %v2772_v1  ;;  %v2778_v5 = vld [vmem:[#allocation6 + $0x24] ss:$16 sps:$4 sm:$0xff]   ;;  %v2780_v6 = vld [vmem:[#allocation6 + $0x2c] ss:$16 sps:$4 sm:$0xff]   ;;  %v2782_v7 = vld [vmem:[#allocation6 + $0x20] ss:$16 sps:$4 sm:$0xff]  }
  0x9f   : > { %662 = vmatprep.subr.bf16.mxu1 %v2774_v2  ;;  %622 = vmatpush1.bf16.msra.mxu0 %v2776_v3  ;;  %v2783_v8 = vld [vmem:[#allocation6 + $0x28] ss:$16 sps:$4 sm:$0xff]   ;;  %v2784_v9 = vld [vmem:[#allocation6 + $0x44] ss:$16 sps:$4 sm:$0xff]   ;;  %v2786_v10 = vld [vmem:[#allocation6 + $0x4c] ss:$16 sps:$4 sm:$0xff]  }
  0xa0   : > { %663 = vmatpush1.bf16.msra.mxu1 %v2777_v4  ;;  %623 = vmatprep.subr.bf16.mxu0 %v2778_v5  ;;  %v2788_v11 = vld [vmem:[#allocation6 + $0x40] ss:$16 sps:$4 sm:$0xff]   ;;  %v2789_v12 = vld [vmem:[#allocation6 + $0x48] ss:$16 sps:$4 sm:$0xff]   ;;  %v2790_v13 = vld [vmem:[#allocation6 + $0x64] ss:$16 sps:$4 sm:$0xff]  }
  0xa1   : > { %664 = vmatprep.subr.bf16.mxu1 %v2780_v6  ;;  %v2792_v14 = vld [vmem:[#allocation6 + $0x6c] ss:$16 sps:$4 sm:$0xff]   ;;  %v2794_v15 = vld [vmem:[#allocation6 + $0x60] ss:$16 sps:$4 sm:$0xff]   ;;  %v2795_v16 = vld [vmem:[#allocation6 + $0x68] ss:$16 sps:$4 sm:$0xff]  }
  0xa2   : > { %v2796_v17 = vld [vmem:[#allocation6 + $0x84] ss:$16 sps:$4 sm:$0xff]   ;;  %v2798_v18 = vld [vmem:[#allocation6 + $0x8c] ss:$16 sps:$4 sm:$0xff]   ;;  %v2800_v19 = vld [vmem:[#allocation6 + $0x80] ss:$16 sps:$4 sm:$0xff]  }
  0xa3   : > { %624 = vmatpush1.bf16.msra.mxu0 %v2782_v7  ;;  %v2801_v20 = vld [vmem:[#allocation6 + $0x88] ss:$16 sps:$4 sm:$0xff]   ;;  %v2802_v21 = vld [vmem:[#allocation6 + $0xa4] ss:$16 sps:$4 sm:$0xff]   ;;  %v2804_v22 = vld [vmem:[#allocation6 + $0xac] ss:$16 sps:$4 sm:$0xff]  }
  0xa4   : > { %665 = vmatpush1.bf16.msra.mxu1 %v2783_v8  ;;  %625 = vmatprep.subr.bf16.mxu0 %v2784_v9  ;;  %s4545_s30 = smov (!%p410_p7, %s3156_s30), 1  ;;  %v3176_v23 = vmov 1966171168   ;;  %v2806_v26 = vld [vmem:[#allocation6 + $0xa0] ss:$16 sps:$4 sm:$0xff]   ;;  %v3461_v32 = vshrl.u32 %v1007_v25, 7 }
  0xa5   : > { %666 = vmatprep.subr.bf16.mxu1 %v2786_v10  ;;  %v1005_v24 = vunpack.c.l.s4 %v3176_v23  ;;  %v2807_v27 = vld [vmem:[#allocation6 + $0xa8] ss:$16 sps:$4 sm:$0xff]   ;;  %v2808_v28 = vld [vmem:[#allocation6 + $0xc4] ss:$16 sps:$4 sm:$0xff]   ;;  %v2810_v29 = vld [vmem:[#allocation6 + $0xcc] ss:$16 sps:$4 sm:$0xff]  }
  0xa6   : > { %s2470_s12 = sshll.u32 %s4545_s30, 2  ;;  %v2812_v30 = vld [vmem:[#allocation6 + $0xc0] ss:$16 sps:$4 sm:$0xff]   ;;  %v2813_v33 = vld [vmem:[#allocation6 + $0xc8] ss:$16 sps:$4 sm:$0xff]   ;;  %v3479_v56 = vsub.s32 0, %v3461_v32 }
  0xa7   : > { %626 = vmatpush1.bf16.msra.mxu0 %v2788_v11  ;;  %v1006_v31 = vunpack.c.0.s8 %v1005_v24  ;;  %v2814_v34 = vld [vmem:[#allocation6 + $0xe4] ss:$16 sps:$4 sm:$0xff]   ;;  %v2816_v35 = vld [vmem:[#allocation6 + $0xec] ss:$16 sps:$4 sm:$0xff]   ;;  %s413_s11 = scalar_lea.vmem %s4401_s0, %s2470_s12  ;;  %v2818_v36 = vld [vmem:[#allocation6 + $0xe0] ss:$16 sps:$4 sm:$0xff]  }
  0xa8   : > { %667 = vmatpush1.bf16.msra.mxu1 %v2789_v12  ;;  %627 = vmatprep.subr.bf16.mxu0 %v2790_v13  ;;  %v2819_v37 = vld [vmem:[#allocation6 + $0xe8] ss:$16 sps:$4 sm:$0xff]   ;;  %v423_v39 = vld [vmem:[%s413_s11] sm:$0xf]  ;;  %v2822_v40 = vld [vmem:[#allocation7 + $0x4] ss:$16 sps:$4 sm:$0xff]  }
  0xa9   : > { %668 = vmatprep.subr.bf16.mxu1 %v2792_v14  ;;  %v3467_v38 = vsub.s32 %v1006_v31, %v3461_v32  ;;  %v2825_v41 = vld [vmem:[#allocation7 + $0xc] ss:$16 sps:$4 sm:$0xff]   ;;  %v428_v42 = vpack.c.bf16 %v423_v39, %v423_v39  ;;  %v2820_v44 = vld [vmem:[#allocation7] ss:$16 sps:$4 sm:$0xff]   ;;  %v2823_v45 = vld [vmem:[#allocation7 + $0x8] ss:$16 sps:$4 sm:$0xff]  }
  0xaa   : > { %v2828_v47 = vld [vmem:[#allocation7 + $0x24] ss:$16 sps:$4 sm:$0xff]   ;;  %v2831_v48 = vld [vmem:[#allocation7 + $0x2c] ss:$16 sps:$4 sm:$0xff]   ;;  %v2826_v49 = vld [vmem:[#allocation7 + $0x20] ss:$16 sps:$4 sm:$0xff]  }
  0xab   : > { %628 = vmatpush1.bf16.msra.mxu0 %v2794_v15  ;;  %v1010_v43 = vrot.slane %v423_v39, %v3467_v38  ;;  %v2829_v50 = vld [vmem:[#allocation7 + $0x28] ss:$16 sps:$4 sm:$0xff]   ;;  %v2834_v53 = vld [vmem:[#allocation7 + $0x44] ss:$16 sps:$4 sm:$0xff]   ;;  %v2837_v54 = vld [vmem:[#allocation7 + $0x4c] ss:$16 sps:$4 sm:$0xff]  }
  0xac   : > { %669 = vmatpush1.bf16.msra.mxu1 %v2795_v16  ;;  %629 = vmatprep.subr.bf16.mxu0 %v2796_v17  ;;  %v2832_v57 = vld [vmem:[#allocation7 + $0x40] ss:$16 sps:$4 sm:$0xff]   ;;  %v2835_v58 = vld [vmem:[#allocation7 + $0x48] ss:$16 sps:$4 sm:$0xff]   ;;  %v2840_v61 = vld [vmem:[#allocation7 + $0x64] ss:$16 sps:$4 sm:$0xff]  }
  0xad   : > { %670 = vmatprep.subr.bf16.mxu1 %v2798_v18  ;;  %v1011_v46 = vcombine.high %v1010_v43, %v1010_v43  ;;  %v3471_v51 = vrot.slane %v1010_v43, %v3467_v38  ;;  %v2843_v62 = vld [vmem:[#allocation7 + $0x6c] ss:$16 sps:$4 sm:$0xff]   ;;  %v2838_v63 = vld [vmem:[#allocation7 + $0x60] ss:$16 sps:$4 sm:$0xff]   ;;  %v2841_v2 = vld [vmem:[#allocation7 + $0x68] ss:$16 sps:$4 sm:$0xff]  }
  0xae   : > { %v2846_v3 = vld [vmem:[#allocation7 + $0x84] ss:$16 sps:$4 sm:$0xff]   ;;  %v2849_v4 = vld [vmem:[#allocation7 + $0x8c] ss:$16 sps:$4 sm:$0xff]   ;;  %v2844_v12 = vld [vmem:[#allocation7 + $0x80] ss:$16 sps:$4 sm:$0xff]  }
  0xaf   : > { %630 = vmatpush1.bf16.msra.mxu0 %v2800_v19  ;;  %v1025_v52 = vrot.slane %v1011_v46, %v3467_v38  ;;  %v1026_v55 = vcombine.high %v3471_v51, %v3471_v51  ;;  %v3488_v5 = vld [vmem:[%s3439_s24] sm:$0xff]  ;;  %v3494_v7 = vld [vmem:[%s3439_s24 + $0x8] sm:$0xff]  ;;  %s4469_s26 = sld [smem:[#allocation35_spill]]  ;;  %s2471_s23 = sshll.u32 %s4545_s30, 3 }
  0xb0   : > { %671 = vmatpush1.bf16.msra.mxu1 %v2801_v20  ;;  %631 = vmatprep.subr.bf16.mxu0 %v2802_v21  ;;  %v2847_v16 = vld [vmem:[#allocation7 + $0x88] ss:$16 sps:$4 sm:$0xff]   ;;  %v2852_v17 = vld [vmem:[#allocation7 + $0xa4] ss:$16 sps:$4 sm:$0xff]   ;;  %v2855_v21 = vld [vmem:[#allocation7 + $0xac] ss:$16 sps:$4 sm:$0xff]  }
  0xb1   : > { %672 = vmatprep.subr.bf16.mxu1 %v2804_v22  ;;  %v1027_v59 = vcombine.high %v1025_v52, %v1025_v52  ;;  %v3482_v60 = vrot.slane %v1025_v52, %v3479_v56  ;;  %v3485_v1 = vrot.slane %v1026_v55, %v3479_v56  ;;  %v2858_v31 = vld [vmem:[#allocation7 + $0xc4] ss:$16 sps:$4 sm:$0xff]   ;;  %v2867_v39 = vld [vmem:[#allocation7 + $0xec] ss:$16 sps:$4 sm:$0xff]   ;;  %v2871_v46 = vld [vmem:[#allocation4 + $0x8] ss:$16 sps:$4 sm:$0xff]  }
  0xb2   : > { %v2873_v43 = vld [vmem:[#allocation4 + $0xc] ss:$16 sps:$4 sm:$0xff]   ;;  %v2882_v52 = vld [vmem:[#allocation4 + $0x44] ss:$16 sps:$4 sm:$0xff]   ;;  %v2883_v55 = vld [vmem:[#allocation4 + $0x48] ss:$16 sps:$4 sm:$0xff]  }
  0xb3   : > { %632 = vmatpush1.bf16.msra.mxu0 %v2806_v26  ;;  %v3491_v6 = vrot.slane %v1027_v59, %v3479_v56  ;;  %v1076_v8 = vsub.f32 %v3482_v60, %v3488_v5  ;;  %v1077_v9 = vsub.f32 %v3482_v60, %v3494_v7  ;;  %v1052_v10 = vmul.f32 %v3482_v60, %v3488_v5  ;;  %s4535_s22 = sld [smem:[#allocation36_spill]] }
  0xb4   : > { %673 = vmatpush1.bf16.msra.mxu1 %v2807_v27  ;;  %633 = vmatprep.subr.bf16.mxu0 %v2808_v28  ;;  %v1053_v11 = vmul.f32 %v3482_v60, %v3494_v7  ;;  %v1080_v13 = vsub.f32 %v3485_v1, %v3488_v5  ;;  %v1081_v14 = vsub.f32 %v3485_v1, %v3494_v7  ;;  %v2850_v28 = vld [vmem:[#allocation7 + $0xa0] ss:$16 sps:$4 sm:$0xff]  }
  0xb5   : > { %674 = vmatprep.subr.bf16.mxu1 %v2810_v29  ;;  %v1056_v15 = vmul.f32 %v3485_v1, %v3488_v5  ;;  %v3510_v18 = vpack.c.bf16 %v1077_v9, %v1076_v8  ;;  %v1057_v20 = vmul.f32 %v3485_v1, %v3494_v7  ;;  %v1084_v23 = vsub.f32 %v3491_v6, %v3488_v5  ;;  %v2903_v9 = vld [vmem:[#allocation4 + $0xac] ss:$16 sps:$4 sm:$0xff]  }
  0xb6   : > { %v3512_v19 = vpack.c.bf16 %v1053_v11, %v1052_v10  ;;  %v3516_v22 = vpack.c.bf16 %v1081_v14, %v1080_v13  ;;  %v1085_v24 = vsub.f32 %v3491_v6, %v3494_v7  ;;  %v1060_v26 = vmul.f32 %v3491_v6, %v3488_v5  ;;  %v3545_v10 = vld [vmem:[%s3439_s24 + $0x10] sm:$0xff]  ;;  %v3548_v11 = vld [vmem:[%s3439_s24 + $0x18] sm:$0xff] }
  0xb7   : > { %634 = vmatpush1.bf16.msra.mxu0 %v2812_v30  ;;  %v3522_v25 = vpack.c.bf16 %v1057_v20, %v1056_v15  ;;  %v1061_v27 = vmul.f32 %v3491_v6, %v3494_v7  ;;  %v2853_v30 = vld [vmem:[#allocation7 + $0xa8] ss:$16 sps:$4 sm:$0xff]   ;;  %v3538_v59 = vrot.slane %v3471_v51, %v3479_v56  ;;  %v2900_v51 = vld [vmem:[#allocation4 + $0xa4] ss:$16 sps:$4 sm:$0xff]   ;;  %v2898_v13 = vld [vmem:[#allocation4 + $0xa0] ss:$16 sps:$4 sm:$0xff]   ;;  %v1054_v15 = vmul.f32 %v3482_v60, %v3545_v10 }
  0xb8   : > { %675 = vmatpush1.bf16.msra.mxu1 %v2813_v33  ;;  %635 = vmatprep.subr.bf16.mxu0 %v2814_v34  ;;  %v3528_v29 = vpack.c.bf16 %v1085_v24, %v1084_v23  ;;  %v2861_v34 = vld [vmem:[#allocation7 + $0xcc] ss:$16 sps:$4 sm:$0xff]   ;;  %v1082_v20 = vsub.f32 %v3485_v1, %v3545_v10  ;;  %v1083_v24 = vsub.f32 %v3485_v1, %v3548_v11 }
  0xb9   : > { %676 = vmatprep.subr.bf16.mxu1 %v2816_v35  ;;  %v3530_v33 = vpack.c.bf16 %v1061_v27, %v1060_v26  ;;  %v2856_v35 = vld [vmem:[#allocation7 + $0xc0] ss:$16 sps:$4 sm:$0xff]   ;;  %v1073_v8 = vsub.f32 %v3538_v59, %v3494_v7  ;;  %v2909_v23 = vld [vmem:[#allocation4 + $0xcc] ss:$16 sps:$4 sm:$0xff]   ;;  %v1058_v27 = vmul.f32 %v3485_v1, %v3545_v10  ;;  %s421_s19 = scalar_lea.vmem %s4535_s22, %s2471_s23 }
  0xbb   : > { %636 = vmatpush1.bf16.msra.mxu0 %v2818_v36  ;;  %v2859_v36 = vld [vmem:[#allocation7 + $0xc8] ss:$16 sps:$4 sm:$0xff]  }
  0xbc   : > { %677 = vmatpush1.bf16.msra.mxu1 %v2819_v37  ;;  %897 = vmatprep.subr.bf16.mxu0 %v2822_v40  ;;  %v2864_v37 = vld [vmem:[#allocation7 + $0xe4] ss:$16 sps:$4 sm:$0xff]   ;;  %v2862_v40 = vld [vmem:[#allocation7 + $0xe0] ss:$16 sps:$4 sm:$0xff]  }
  0xbd   : > { %950 = vmatprep.subr.bf16.mxu1 %v2825_v41  ;;  %v2865_v41 = vld [vmem:[#allocation7 + $0xe8] ss:$16 sps:$4 sm:$0xff]  }
  0xbe   : > { %654 = vmatmul.mubr.bf16.vlgmr.msra.gmra.mrb[0].mxu0 %v428_v42 }
  0xbf   : > { %695 = vmatmul.mubr.bf16.vlgmr.msra.gmra.mrb[0].mxu1 %v428_v42  ;;  %898 = vmatpush1.bf16.msra.mxu0 %v2820_v44  ;;  %v2870_v42 = vld [vmem:[#allocation4 + $0x4] ss:$16 sps:$4 sm:$0xff]   ;;  %v703_v44 = vpack.c.bf16 %v3494_v7, %v3488_v5 }
  0xc0   : > { %951 = vmatpush1.bf16.msra.mxu1 %v2823_v45  ;;  %899 = vmatprep.subr.bf16.mxu0 %v2828_v47  ;;  %v2868_v45 = vld [vmem:[#allocation4] ss:$16 sps:$4 sm:$0xff]   ;;  %v2876_v47 = vld [vmem:[#allocation4 + $0x24] ss:$16 sps:$4 sm:$0xff]  }
  0xc1   : > { %952 = vmatprep.subr.bf16.mxu1 %v2831_v48  ;;  %929 = vmatprep.mubr.bf16.mxu0 %v3175_v0  ;;  %v2879_v48 = vld [vmem:[#allocation4 + $0x2c] ss:$16 sps:$4 sm:$0xff]  }
  0xc2   : > { %982 = vmatprep.mubr.bf16.mxu1 %v3175_v0 }
  0xc3   : > { %900 = vmatpush1.bf16.msra.mxu0 %v2826_v49  ;;  %v2874_v49 = vld [vmem:[#allocation4 + $0x20] ss:$16 sps:$4 sm:$0xff]  }
  0xc4   : > { %953 = vmatpush1.bf16.msra.mxu1 %v2829_v50  ;;  %901 = vmatprep.subr.bf16.mxu0 %v2834_v53  ;;  %v2877_v50 = vld [vmem:[#allocation4 + $0x28] ss:$16 sps:$4 sm:$0xff]   ;;  %v2885_v53 = vld [vmem:[#allocation4 + $0x4c] ss:$16 sps:$4 sm:$0xff]  }
  0xc5   : > { %954 = vmatprep.subr.bf16.mxu1 %v2837_v54  ;;  %v2880_v54 = vld [vmem:[#allocation4 + $0x40] ss:$16 sps:$4 sm:$0xff]  }
  0xc7   : > { %902 = vmatpush1.bf16.msra.mxu0 %v2832_v57  ;;  %v2888_v57 = vld [vmem:[#allocation4 + $0x64] ss:$16 sps:$4 sm:$0xff]  }
  0xc8   : > { %955 = vmatpush1.bf16.msra.mxu1 %v2835_v58  ;;  %903 = vmatprep.subr.bf16.mxu0 %v2840_v61  ;;  %v2891_v58 = vld [vmem:[#allocation4 + $0x6c] ss:$16 sps:$4 sm:$0xff]   ;;  %v2886_v61 = vld [vmem:[#allocation4 + $0x60] ss:$16 sps:$4 sm:$0xff]  }
  0xc9   : > { %956 = vmatprep.subr.bf16.mxu1 %v2843_v62  ;;  %v2889_v62 = vld [vmem:[#allocation4 + $0x68] ss:$16 sps:$4 sm:$0xff]  }
  0xcb   : > { %904 = vmatpush1.bf16.msra.mxu0 %v2838_v63  ;;  %v2894_v63 = vld [vmem:[#allocation4 + $0x84] ss:$16 sps:$4 sm:$0xff]  }
  0xcc   : > { %957 = vmatpush1.bf16.msra.mxu1 %v2841_v2  ;;  %905 = vmatprep.subr.bf16.mxu0 %v2846_v3  ;;  %v2892_v2 = vld [vmem:[#allocation4 + $0x80] ss:$16 sps:$4 sm:$0xff]   ;;  %v2895_v3 = vld [vmem:[#allocation4 + $0x88] ss:$16 sps:$4 sm:$0xff]  }
  0xcd   : > { %958 = vmatprep.subr.bf16.mxu1 %v2849_v4  ;;  %v1072_v4 = vsub.f32 %v3538_v59, %v3488_v5 }
  0xcf   : > { %906 = vmatpush1.bf16.msra.mxu0 %v2844_v12  ;;  %v704_v12 = vpack.c.bf16 %v3548_v11, %v3545_v10  ;;  %v1088_v14 = vpack.c.bf16 %v1073_v8, %v1072_v4  ;;  %v2940_v4 = vld [vmem:[#allocation4 + $0x180] ss:$16 sps:$4 sm:$0xff]   ;;  %v2943_v8 = vld [vmem:[#allocation4 + $0x188] ss:$16 sps:$4 sm:$0xff]  }
  0xd0   : > { %959 = vmatpush1.bf16.msra.mxu1 %v2847_v16  ;;  %907 = vmatprep.subr.bf16.mxu0 %v2852_v17  ;;  %v2901_v16 = vld [vmem:[#allocation4 + $0xa8] ss:$16 sps:$4 sm:$0xff]   ;;  %v1055_v17 = vmul.f32 %v3482_v60, %v3548_v11 }
  0xd1   : > { %960 = vmatprep.subr.bf16.mxu1 %v2855_v21  ;;  %v2906_v21 = vld [vmem:[#allocation4 + $0xc4] ss:$16 sps:$4 sm:$0xff]  }
  0xd2   : > { %v3560_v26 = vpack.c.bf16 %v1055_v17, %v1054_v15  ;;  %v2957_v15 = vld [vmem:[#allocation4 + $0x1cc] ss:$16 sps:$4 sm:$0xff]   ;;  %v2955_v17 = vld [vmem:[#allocation4 + $0x1c8] ss:$16 sps:$4 sm:$0xff]  }
  0xd3   : > { %908 = vmatpush1.bf16.msra.mxu0 %v2850_v28  ;;  %v1059_v28 = vmul.f32 %v3485_v1, %v3548_v11  ;;  %v1063_v1 = vmul.f32 %v3491_v6, %v3548_v11 }
  0xd4   : > { %961 = vmatpush1.bf16.msra.mxu1 %v2853_v30  ;;  %909 = vmatprep.subr.bf16.mxu0 %v2858_v31  ;;  %v3566_v30 = vpack.c.bf16 %v1083_v24, %v1082_v20  ;;  %v1086_v31 = vsub.f32 %v3491_v6, %v3545_v10  ;;  %v2960_v20 = vld [vmem:[#allocation4 + $0x1e4] ss:$16 sps:$4 sm:$0xff]   ;;  %v1049_v24 = vmul.f32 %v3538_v59, %v3494_v7 }
  0xd5   : > { %962 = vmatprep.subr.bf16.mxu1 %v2861_v34  ;;  %v1087_v34 = vsub.f32 %v3491_v6, %v3548_v11  ;;  %v1051_v7 = vmul.f32 %v3538_v59, %v3548_v11 }
  0xd7   : > { %910 = vmatpush1.bf16.msra.mxu0 %v2856_v35  ;;  %v2904_v35 = vld [vmem:[#allocation4 + $0xc0] ss:$16 sps:$4 sm:$0xff]  }
  0xd8   : > { %963 = vmatpush1.bf16.msra.mxu1 %v2859_v36  ;;  %911 = vmatprep.subr.bf16.mxu0 %v2864_v37  ;;  %v2907_v36 = vld [vmem:[#allocation4 + $0xc8] ss:$16 sps:$4 sm:$0xff]   ;;  %v3572_v37 = vpack.c.bf16 %v1059_v28, %v1058_v27  ;;  %v2958_v27 = vld [vmem:[#allocation4 + $0x1e0] ss:$16 sps:$4 sm:$0xff]  }
  0xd9   : > { %964 = vmatprep.subr.bf16.mxu1 %v2867_v39  ;;  %v1062_v39 = vmul.f32 %v3491_v6, %v3545_v10  ;;  %v2919_v6 = vld [vmem:[#allocation4 + $0x108] ss:$16 sps:$4 sm:$0xff]  }
  0xda   : > { %v2961_v28 = vld [vmem:[#allocation4 + $0x1e8] ss:$16 sps:$4 sm:$0xff]  }
  0xdb   : > { %912 = vmatpush1.bf16.msra.mxu0 %v2862_v40  ;;  %v2912_v40 = vld [vmem:[#allocation4 + $0xe4] ss:$16 sps:$4 sm:$0xff]  }
  0xdc   : > { %965 = vmatpush1.bf16.msra.mxu1 %v2865_v41  ;;  %1480 = vmatprep.subr.bf16.mxu0 %v2870_v42  ;;  %v2915_v41 = vld [vmem:[#allocation4 + $0xec] ss:$16 sps:$4 sm:$0xff]   ;;  %v3578_v42 = vpack.c.bf16 %v1087_v34, %v1086_v31  ;;  %v1074_v31 = vsub.f32 %v3538_v59, %v3545_v10  ;;  %v1075_v34 = vsub.f32 %v3538_v59, %v3548_v11 }
  0xdd   : > { %1593 = vmatprep.subr.bf16.mxu1 %v2873_v43  ;;  %v3580_v43 = vpack.c.bf16 %v1063_v1, %v1062_v39  ;;  %v1078_v1 = vsub.f32 %v3482_v60, %v3545_v10 }
  0xde   : > { %930 = vmatmul.mubr.bf16.vlgmr.msra.gmra.mrb[4].mxu0 %v703_v44 }
  0xdf   : > { %983 = vmatmul.mubr.bf16.vlgmr.msra.gmra.mrb[4].mxu1 %v703_v44  ;;  %1481 = vmatpush1.bf16.msra.mxu0 %v2868_v45  ;;  %v2910_v44 = vld [vmem:[#allocation4 + $0xe0] ss:$16 sps:$4 sm:$0xff]   ;;  %v2913_v45 = vld [vmem:[#allocation4 + $0xe8] ss:$16 sps:$4 sm:$0xff]  }
  0xe0   : > { %1594 = vmatpush1.bf16.msra.mxu1 %v2871_v46  ;;  %1482 = vmatprep.subr.bf16.mxu0 %v2876_v47  ;;  %v2918_v46 = vld [vmem:[#allocation4 + $0x104] ss:$16 sps:$4 sm:$0xff]   ;;  %v2921_v47 = vld [vmem:[#allocation4 + $0x10c] ss:$16 sps:$4 sm:$0xff]  }
  0xe1   : > { %1595 = vmatprep.subr.bf16.mxu1 %v2879_v48  ;;  %939 = vmatprep.mubr.bf16.mxu0 %v3175_v0  ;;  %v2916_v48 = vld [vmem:[#allocation4 + $0x100] ss:$16 sps:$4 sm:$0xff]  }
  0xe2   : > { %992 = vmatprep.mubr.bf16.mxu1 %v3175_v0  ;;  %v2897_v0 = vld [vmem:[#allocation4 + $0x8c] ss:$16 sps:$4 sm:$0xff]  }
  0xe3   : > { %1483 = vmatpush1.bf16.msra.mxu0 %v2874_v49  ;;  %v2924_v49 = vld [vmem:[#allocation4 + $0x124] ss:$16 sps:$4 sm:$0xff]  }
  0xe4   : > { %1596 = vmatpush1.bf16.msra.mxu1 %v2877_v50  ;;  %1484 = vmatprep.subr.bf16.mxu0 %v2882_v52  ;;  %v2927_v50 = vld [vmem:[#allocation4 + $0x12c] ss:$16 sps:$4 sm:$0xff]   ;;  %v2922_v52 = vld [vmem:[#allocation4 + $0x120] ss:$16 sps:$4 sm:$0xff]  }
  0xe5   : > { %1597 = vmatprep.subr.bf16.mxu1 %v2885_v53  ;;  %v2925_v53 = vld [vmem:[#allocation4 + $0x128] ss:$16 sps:$4 sm:$0xff]  }
  0xe6   : > { %940 = vmatmul.mubr.bf16.gmra.mrb[8].mxu0 %v704_v12 }
  0xe7   : > { %1485 = vmatpush1.bf16.msra.mxu0 %v2880_v54  ;;  %993 = vmatmul.mubr.bf16.gmra.mrb[8].mxu1 %v704_v12  ;;  %v2930_v54 = vld [vmem:[#allocation4 + $0x144] ss:$16 sps:$4 sm:$0xff]   ;;  %v2946_v12 = vld [vmem:[#allocation4 + $0x1a0] ss:$16 sps:$4 sm:$0xff]  }
  0xe8   : > { %1598 = vmatpush1.bf16.msra.mxu1 %v2883_v55  ;;  %1486 = vmatprep.subr.bf16.mxu0 %v2888_v57  ;;  %v2933_v55 = vld [vmem:[#allocation4 + $0x14c] ss:$16 sps:$4 sm:$0xff]   ;;  %v2928_v57 = vld [vmem:[#allocation4 + $0x140] ss:$16 sps:$4 sm:$0xff]  }
  0xe9   : > { %1599 = vmatprep.subr.bf16.mxu1 %v2891_v58  ;;  %1512 = vmatprep.mubr.bf16.mxu0 %v1088_v14  ;;  %v2931_v58 = vld [vmem:[#allocation4 + $0x148] ss:$16 sps:$4 sm:$0xff]  }
  0xea   : > { %1625 = vmatprep.mubr.bf16.mxu1 %v1088_v14  ;;  %v2954_v14 = vld [vmem:[#allocation4 + $0x1c4] ss:$16 sps:$4 sm:$0xff]  }
  0xeb   : > { %1487 = vmatpush1.bf16.msra.mxu0 %v2886_v61  ;;  %v2936_v61 = vld [vmem:[#allocation4 + $0x164] ss:$16 sps:$4 sm:$0xff]  }
  0xec   : > { %1600 = vmatpush1.bf16.msra.mxu1 %v2889_v62  ;;  %1488 = vmatprep.subr.bf16.mxu0 %v2894_v63  ;;  %v2939_v62 = vld [vmem:[#allocation4 + $0x16c] ss:$16 sps:$4 sm:$0xff]   ;;  %v2934_v63 = vld [vmem:[#allocation4 + $0x160] ss:$16 sps:$4 sm:$0xff]  }
  0xed   : > { %1601 = vmatprep.subr.bf16.mxu1 %v2897_v0  ;;  %v2937_v0 = vld [vmem:[#allocation4 + $0x168] ss:$16 sps:$4 sm:$0xff]  }
  0xef   : > { %1489 = vmatpush1.bf16.msra.mxu0 %v2892_v2  ;;  %v2942_v2 = vld [vmem:[#allocation4 + $0x184] ss:$16 sps:$4 sm:$0xff]  }
  0xf0   : > { %1602 = vmatpush1.bf16.msra.mxu1 %v2895_v3  ;;  %1490 = vmatprep.subr.bf16.mxu0 %v2900_v51  ;;  %v2945_v3 = vld [vmem:[#allocation4 + $0x18c] ss:$16 sps:$4 sm:$0xff]   ;;  %v2948_v51 = vld [vmem:[#allocation4 + $0x1a4] ss:$16 sps:$4 sm:$0xff]  }
  0xf1   : > { %1603 = vmatprep.subr.bf16.mxu1 %v2903_v9  ;;  %v2951_v9 = vld [vmem:[#allocation4 + $0x1ac] ss:$16 sps:$4 sm:$0xff]  }
  0xf3   : > { %1491 = vmatpush1.bf16.msra.mxu0 %v2898_v13  ;;  %v2949_v13 = vld [vmem:[#allocation4 + $0x1a8] ss:$16 sps:$4 sm:$0xff]  }
  0xf4   : > { %1604 = vmatpush1.bf16.msra.mxu1 %v2901_v16  ;;  %1492 = vmatprep.subr.bf16.mxu0 %v2906_v21  ;;  %v2952_v16 = vld [vmem:[#allocation4 + $0x1c0] ss:$16 sps:$4 sm:$0xff]   ;;  %v2963_v21 = vld [vmem:[#allocation4 + $0x1ec] ss:$16 sps:$4 sm:$0xff]  }
  0xf5   : > { %1605 = vmatprep.subr.bf16.mxu1 %v2909_v23  ;;  %v1048_v23 = vmul.f32 %v3538_v59, %v3488_v5  ;;  %v1050_v5 = vmul.f32 %v3538_v59, %v3545_v10 }
  0xf7   : > { %1493 = vmatpush1.bf16.msra.mxu0 %v2904_v35  ;;  %v1064_v35 = vpack.c.bf16 %v1049_v24, %v1048_v23  ;;  %v1065_v39 = vpack.c.bf16 %v1051_v7, %v1050_v5 }
  0xf8   : > { %1606 = vmatpush1.bf16.msra.mxu1 %v2907_v36  ;;  %1494 = vmatprep.subr.bf16.mxu0 %v2912_v40  ;;  %v1089_v36 = vpack.c.bf16 %v1075_v34, %v1074_v31  ;;  %v1079_v40 = vsub.f32 %v3482_v60, %v3548_v11 }
  0xf9   : > { %1607 = vmatprep.subr.bf16.mxu1 %v2915_v41 }
  0xfa   : > { %v1091_v41 = vpack.c.bf16 %v1079_v40, %v1078_v1 }
  0xfb   : > { %1495 = vmatpush1.bf16.msra.mxu0 %v2910_v44 }
  0xfc   : > { %1608 = vmatpush1.bf16.msra.mxu1 %v2913_v45  ;;  %1496 = vmatprep.subr.bf16.mxu0 %v2918_v46  ;;  %v1758_v46 = vsub.s32 3, %v3461_v32 }
  0xfd   : > { %1609 = vmatprep.subr.bf16.mxu1 %v2921_v47 }
  0xff   : > { %1497 = vmatpush1.bf16.msra.mxu0 %v2916_v48 }
 0x100   : > { %1610 = vmatpush1.bf16.msra.mxu1 %v2919_v6  ;;  %1498 = vmatprep.subr.bf16.mxu0 %v2924_v49 }
 0x101   : > { %1611 = vmatprep.subr.bf16.mxu1 %v2927_v50 }
 0x103   : > { %1499 = vmatpush1.bf16.msra.mxu0 %v2922_v52 }
 0x104   : > { %1612 = vmatpush1.bf16.msra.mxu1 %v2925_v53  ;;  %1500 = vmatprep.subr.bf16.mxu0 %v2930_v54 }
 0x105   : > { %1613 = vmatprep.subr.bf16.mxu1 %v2933_v55 }
 0x107   : > { %1501 = vmatpush1.bf16.msra.mxu0 %v2928_v57 }
 0x108   : > { %1614 = vmatpush1.bf16.msra.mxu1 %v2931_v58  ;;  %1502 = vmatprep.subr.bf16.mxu0 %v2936_v61 }
 0x109   : > { %1615 = vmatprep.subr.bf16.mxu1 %v2939_v62 }
 0x10b   : > { %1503 = vmatpush1.bf16.msra.mxu0 %v2934_v63 }
 0x10c   : > { %1616 = vmatpush1.bf16.msra.mxu1 %v2937_v0  ;;  %1504 = vmatprep.subr.bf16.mxu0 %v2942_v2 }
 0x10d   : > { %1617 = vmatprep.subr.bf16.mxu1 %v2945_v3 }
 0x10f   : > { %1505 = vmatpush1.bf16.msra.mxu0 %v2940_v4 }
 0x110   : > { %1618 = vmatpush1.bf16.msra.mxu1 %v2943_v8  ;;  %1506 = vmatprep.subr.bf16.mxu0 %v2948_v51  ;;  %v2167_v8 = vld [vmem:[#allocation9 + $0x8] sm:$0xff]  ;;  %v2169_v51 = vld [vmem:[#allocation9 + $0x18] sm:$0xff] }
 0x111   : > { %1619 = vmatprep.subr.bf16.mxu1 %v2951_v9  ;;  %v2170_v9 = vld [vmem:[%s4408_s7] sm:$0xff] }
 0x112   : > { %2173 = vperm.xlu0 %2771, %v2170_v9  }
 0x113   : > { %1507 = vmatpush1.bf16.msra.mxu0 %v2946_v12 }
 0x114   : > { %1620 = vmatpush1.bf16.msra.mxu1 %v2949_v13  ;;  %1508 = vmatprep.subr.bf16.mxu0 %v2954_v14  ;;  %v1952_v13 = vld [vmem:[%s4469_s26] sm:$0xf]  ;;  %v1750_v14 = vsub.s32 1, %v3461_v32 }
 0x115   : > { %1621 = vmatprep.subr.bf16.mxu1 %v2957_v15 }
 0x117   : > { %1509 = vmatpush1.bf16.msra.mxu0 %v2952_v16  ;;  %v3674_v16 = vrot.slane %v1952_v13, %v3479_v56 }
 0x118   : > { %1622 = vmatpush1.bf16.msra.mxu1 %v2955_v17  ;;  %1510 = vmatprep.subr.bf16.mxu0 %v2960_v20  ;;  %v3678_v20 = vrot.slane %v1952_v13, %v1750_v14 }
 0x119   : > { %1623 = vmatprep.subr.bf16.mxu1 %v2963_v21  ;;  %v3680_v21 = vrot.slane %v1952_v13, %v1758_v46 }
 0x11b   : > { %1511 = vmatpush1.bf16.msra.mxu0 %v2958_v27 }
 0x11c   : > { %1624 = vmatpush1.bf16.msra.mxu1 %v2961_v28 }
 0x11e   : > { %1513 = vmatmul.mubr.bf16.vlgmr.msra.gmra.mrb[12].mxu0 %v1064_v35 }
 0x11f   : > { %1626 = vmatmul.mubr.bf16.vlgmr.msra.gmra.mrb[12].mxu1 %v1064_v35  ;;  %1522 = vmatprep.mubr.bf16.mxu0 %v1089_v36 }
 0x120   : > { %1635 = vmatprep.mubr.bf16.mxu1 %v1089_v36 }
 0x126   : > { %1523 = vmatmul.mubr.bf16.gmra.mrb[16].mxu0 %v1065_v39 }
 0x127   : > { %1636 = vmatmul.mubr.bf16.gmra.mrb[16].mxu1 %v1065_v39  ;;  %1532 = vmatprep.mubr.bf16.mxu0 %v3510_v18 }
 0x128   : > { %1645 = vmatprep.mubr.bf16.mxu1 %v3510_v18 }
 0x12e   : > { %1533 = vmatmul.mubr.bf16.gmra.mrb[20].mxu0 %v3512_v19 }
 0x12f   : > { %1646 = vmatmul.mubr.bf16.gmra.mrb[20].mxu1 %v3512_v19  ;;  %1542 = vmatprep.mubr.bf16.mxu0 %v1091_v41 }
 0x130   : > { %1655 = vmatprep.mubr.bf16.mxu1 %v1091_v41 }
 0x136   : > { %1543 = vmatmul.mubr.bf16.gmra.mrb[24].mxu0 %v3560_v26 }
 0x137   : > { %1656 = vmatmul.mubr.bf16.gmra.mrb[24].mxu1 %v3560_v26  ;;  %1552 = vmatprep.mubr.bf16.mxu0 %v3516_v22 }
 0x138   : > { %1665 = vmatprep.mubr.bf16.mxu1 %v3516_v22 }
 0x13e   : > { %1553 = vmatmul.mubr.bf16.gmra.mrb[28].mxu0 %v3522_v25 }
 0x13f   : > { %1666 = vmatmul.mubr.bf16.gmra.mrb[28].mxu1 %v3522_v25  ;;  %1562 = vmatprep.mubr.bf16.mxu0 %v3566_v30 }
 0x140   : > { %1675 = vmatprep.mubr.bf16.mxu1 %v3566_v30 }
 0x146   : > { %1563 = vmatmul.mubr.bf16.gmra.mrb[32].mxu0 %v3572_v37 }
 0x147   : > { %1676 = vmatmul.mubr.bf16.gmra.mrb[32].mxu1 %v3572_v37  ;;  %1572 = vmatprep.mubr.bf16.mxu0 %v3528_v29 }
 0x148   : > { %1685 = vmatprep.mubr.bf16.mxu1 %v3528_v29 }
 0x14e   : > { %1573 = vmatmul.mubr.bf16.gmra.mrb[36].mxu0 %v3530_v33 }
 0x14f   : > { %1686 = vmatmul.mubr.bf16.gmra.mrb[36].mxu1 %v3530_v33  ;;  %1582 = vmatprep.mubr.bf16.mxu0 %v3578_v42 }
 0x150   : > { %1695 = vmatprep.mubr.bf16.mxu1 %v3578_v42 }
 0x156   : > { %1583 = vmatmul.mubr.bf16.gmra.mrb[40].mxu0 %v3580_v43 }
 0x157   : > { %1696 = vmatmul.mubr.bf16.gmra.mrb[40].mxu1 %v3580_v43  ;;  %v1754_v43 = vsub.s32 2, %v3461_v32  ;;  %2310 = vmatprep.mubr.f32.mxu0 %v2169_v51 }
 0x158   : > { %2240 = vmatprep.mubr.f32.mxu1 %v2167_v8 }
 0x159   : > { %v3676_v17 = vrot.slane %v1952_v13, %v1754_v43 }
 0x191   : > { %v655_v60 = vpop.f32.mrb[0].mxu0 }
 0x192   : > { %v696_v18 = vpop.f32.mrb[0].mxu1  ;;  %v657_v19 = vpop.f32.mrb[1].mxu0 }
 0x193   : > { %v698_v22 = vpop.f32.mrb[1].mxu1  ;;  %v1710_v25 = vcombine.low %v655_v60, %v657_v19  ;;  %v659_v10 = vpop.f32.mrb[2].mxu0 }
 0x194   : > { %v1711_v59 = vcombine.low %v696_v18, %v698_v22  ;;  %v700_v29 = vpop.f32.mrb[2].mxu1  ;;  %v660_v11 = vpop.f32.mrb[3].mxu0 }
 0x195   : > { %v701_v26 = vpop.f32.mrb[3].mxu1  ;;  %v1718_v33 = vrot.slane %v1710_v25, %v3467_v38 }
 0x196   : > { %v1725_v30 = vrot.slane %v1711_v59, %v3467_v38 }
 0x198   : > { %v1726_v37 = vcombine.low %v1718_v33, %v1725_v30  ;;  %v1727_v42 = vcombine.high %v1718_v33, %v1725_v30 }
 0x19a   : > { %v1741_v44 = vrot.slane %v1727_v42, %v3467_v38  ;;  %v1734_v12 = vrot.slane %v1726_v37, %v3467_v38 }
 0x19c   : > { %v3623_v45 = vcombine.high %v1741_v44, %v1741_v44  ;;  %v1742_v15 = vcombine.high %v1734_v12, %v1734_v12  ;;  %v3683_v23 = vrot.slane %v1734_v12, %v3479_v56  ;;  %v3685_v38 = vrot.slane %v1734_v12, %v1754_v43 }
 0x19d   : > { %v3687_v24 = vrot.slane %v1734_v12, %v1750_v14  ;;  %v3689_v27 = vrot.slane %v1734_v12, %v1758_v46  ;;  %v3692_v31 = vrot.slane %v1741_v44, %v3479_v56  ;;  %v3694_v34 = vrot.slane %v1741_v44, %v1754_v43 }
 0x19e   : > { %v3628_v47 = vrot.slane %v3623_v45, %v1754_v43  ;;  %v3631_v48 = vrot.slane %v3623_v45, %v1758_v46  ;;  %v3696_v35 = vrot.slane %v1741_v44, %v1750_v14  ;;  %v3698_v36 = vrot.slane %v1741_v44, %v1758_v46 }
 0x19f   : > { %v3703_v40 = vrot.slane %v1742_v15, %v3479_v56  ;;  %v3705_v41 = vrot.slane %v1742_v15, %v1754_v43  ;;  %v3709_v25 = vrot.slane %v1742_v15, %v1750_v14  ;;  %v3711_v59 = vrot.slane %v1742_v15, %v1758_v46 }
 0x1a0   : > { %4455 = vst [vmem:[#allocation13_spill] sm:$0xff] %v3628_v47  ;;  %4456 = vst [vmem:[#allocation14_spill] sm:$0xff] %v3631_v48 }
 0x1a1   : > { %4470 = vst [vmem:[#allocation27_spill] sm:$0xff] %v3703_v40  ;;  %4471 = vst [vmem:[#allocation28_spill] sm:$0xff] %v3705_v41 }
 0x1a2   : > { %4472 = vst [vmem:[#allocation29_spill] sm:$0xff] %v3709_v25  ;;  %4473 = vst [vmem:[#allocation30_spill] sm:$0xff] %v3711_v59 }
 0x1b1   : > { %v3633_v6 = vpop.f32.mrb[4].mxu0 }
 0x1b2   : > { %4457 = vst [vmem:[#allocation15_spill] sm:$0xff] %v3633_v6  ;;  %v3635_v49 = vpop.f32.mrb[4].mxu1  ;;  %v3637_v50 = vpop.f32.mrb[5].mxu0 }
 0x1b3   : > { %4458 = vst [vmem:[#allocation16_spill] sm:$0xff] %v3635_v49  ;;  %v3639_v52 = vpop.f32.mrb[5].mxu1  ;;  %v3641_v53 = vpop.f32.mrb[6].mxu0 }
 0x1b4   : > { %v3643_v54 = vpop.f32.mrb[6].mxu1  ;;  %v3645_v55 = vpop.f32.mrb[7].mxu0 }
 0x1b5   : > { %4459 = vst [vmem:[#allocation17_spill] sm:$0xff] %v3645_v55  ;;  %v3647_v57 = vpop.f32.mrb[7].mxu1 }
 0x1b6   : > { %4460 = vst [vmem:[#allocation18_spill] sm:$0xff] %v3647_v57 }
 0x1b9   : > { %v3649_v58 = vpop.f32.mrb[8].mxu0 }
 0x1ba   : > { %4461 = vst [vmem:[#allocation19_spill] sm:$0xff] %v3649_v58  ;;  %v3651_v61 = vpop.f32.mrb[8].mxu1  ;;  %v3653_v62 = vpop.f32.mrb[9].mxu0 }
 0x1bb   : > { %4462 = vst [vmem:[#allocation20_spill] sm:$0xff] %v3651_v61  ;;  %4463 = vst [vmem:[#allocation21_spill] sm:$0xff] %v3653_v62  ;;  %v3655_v63 = vpop.f32.mrb[9].mxu1  ;;  %v3657_v0 = vpop.f32.mrb[10].mxu0 }
 0x1bc   : > { %4464 = vst [vmem:[#allocation22_spill] sm:$0xff] %v3655_v63  ;;  %4465 = vst [vmem:[#allocation23_spill] sm:$0xff] %v3657_v0  ;;  %v3659_v2 = vpop.f32.mrb[10].mxu1  ;;  %v3661_v3 = vpop.f32.mrb[11].mxu0 }
 0x1bd   : > { %4466 = vst [vmem:[#allocation24_spill] sm:$0xff] %v3659_v2  ;;  %4467 = vst [vmem:[#allocation25_spill] sm:$0xff] %v3661_v3  ;;  %v3663_v4 = vpop.f32.mrb[11].mxu1 }
 0x1be   : > { %4468 = vst [vmem:[#allocation26_spill] sm:$0xff] %v3663_v4 }
 0x1f1   : > { %v1514_v32 = vpop.f32.mrb[12].mxu0 }
 0x1f2   : > { %v1627_v28 = vpop.f32.mrb[12].mxu1  ;;  %v1824_v5 = vadd.f32 %v3683_v23, %v1514_v32  ;;  %v1516_v39 = vpop.f32.mrb[13].mxu0 }
 0x1f3   : > { %v1826_v7 = vadd.f32 %v3685_v38, %v1627_v28  ;;  %v1629_v1 = vpop.f32.mrb[13].mxu1  ;;  %v1825_v60 = vadd.f32 %v3687_v24, %v1516_v39  ;;  %v1518_v19 = vpop.f32.mrb[14].mxu0 }
 0x1f4   : > { %v1827_v18 = vadd.f32 %v3689_v27, %v1629_v1  ;;  %v1631_v22 = vpop.f32.mrb[14].mxu1  ;;  %v1888_v10 = vadd.f32 %v1824_v5, %v3633_v6  ;;  %v1828_v11 = vadd.f32 %v3683_v23, %v1518_v19  ;;  %v1520_v33 = vpop.f32.mrb[15].mxu0 }
 0x1f5   : > { %v1890_v29 = vadd.f32 %v1826_v7, %v3635_v49  ;;  %v1830_v26 = vadd.f32 %v3685_v38, %v1631_v22  ;;  %v1633_v30 = vpop.f32.mrb[15].mxu1  ;;  %v1889_v37 = vadd.f32 %v1825_v60, %v3637_v50  ;;  %v1829_v44 = vadd.f32 %v3687_v24, %v1520_v33 }
 0x1f6   : > { %v1891_v42 = vadd.f32 %v1827_v18, %v3639_v52  ;;  %v1831_v43 = vadd.f32 %v3689_v27, %v1633_v30  ;;  %v3722_v46 = vadd.f32 %v3674_v16, %v1888_v10  ;;  %v1892_v51 = vadd.f32 %v1828_v11, %v3641_v53 }
 0x1f7   : > { %v3725_v8 = vadd.f32 %v3676_v17, %v1890_v29  ;;  %v1894_v9 = vadd.f32 %v1830_v26, %v3643_v54  ;;  %v3730_v12 = vadd.f32 %v3678_v20, %v1889_v37  ;;  %v1893_v15 = vadd.f32 %v1829_v44, %v3645_v55 }
 0x1f8   : > { %v3733_v13 = vadd.f32 %v3680_v21, %v1891_v42  ;;  %v1895_v32 = vadd.f32 %v1831_v43, %v3647_v57  ;;  %v3738_v28 = vmul.f32 0.01, %v3722_v46  ;;  %v3744_v7 = vadd.f32 %v3674_v16, %v1892_v51 }
 0x1f9   : > { %v3741_v5 = vmul.f32 0.01, %v3725_v8  ;;  %v3747_v39 = vadd.f32 %v3676_v17, %v1894_v9  ;;  %v3750_v1 = vadd.f32 %v3678_v20, %v1893_v15  ;;  %v1524_v18 = vpop.f32.mrb[16].mxu0  ;;  %v3757_v22 = vrot.slane %v3623_v45, %v3479_v56 }
 0x1fa   : > { %v3753_v60 = vadd.f32 %v3680_v21, %v1895_v32  ;;  %v1637_v19 = vpop.f32.mrb[16].mxu1  ;;  %v3760_v10 = vrot.slane %v3623_v45, %v1750_v14  ;;  %v3767_v26 = vmul.f32 0.01, %v3730_v12  ;;  %v3770_v33 = vmul.f32 0.01, %v3733_v13  ;;  %v1526_v30 = vpop.f32.mrb[17].mxu0 }
 0x1fb   : > { %4474 = vst [vmem:[#allocation31_spill] sm:$0xff] %v3757_v22  ;;  %v1639_v37 = vpop.f32.mrb[17].mxu1  ;;  %v3773_v56 = vmul.f32 0.01, %v3744_v7  ;;  %v3776_v45 = vmul.f32 0.01, %v3747_v39  ;;  %v1832_v14 = vadd.f32 %v3683_v23, %v1524_v18  ;;  %v1834_v42 = vadd.f32 %v3685_v38, %v1637_v19 }
 0x1fc   : > { %4475 = vst [vmem:[#allocation32_spill] sm:$0xff] %v3760_v10  ;;  %v1528_v44 = vpop.f32.mrb[18].mxu0  ;;  %v1641_v43 = vpop.f32.mrb[18].mxu1  ;;  %v2043_v51 = vmul.f32 0.01, %v3750_v1  ;;  %v1833_v15 = vadd.f32 %v3687_v24, %v1526_v30  ;;  %v1835_v32 = vadd.f32 %v3689_v27, %v1639_v37 }
 0x1fd   : > { %v2045_v9 = vmul.f32 0.01, %v3753_v60  ;;  %v1530_v11 = vpop.f32.mrb[19].mxu0  ;;  %v1643_v29 = vpop.f32.mrb[19].mxu1  ;;  %v1896_v48 = vadd.f32 %v1832_v14, %v3649_v58  ;;  %v1898_v10 = vadd.f32 %v1834_v42, %v3651_v61  ;;  %v1836_v18 = vadd.f32 %v3683_v23, %v1528_v44 }
 0x1fe   : > { %v1838_v19 = vadd.f32 %v3685_v38, %v1641_v43  ;;  %v1897_v47 = vadd.f32 %v1833_v15, %v3653_v62  ;;  %v1899_v22 = vadd.f32 %v1835_v32, %v3655_v63  ;;  %v1837_v59 = vadd.f32 %v3687_v24, %v1530_v11 }
 0x1ff   : > { %v1839_v30 = vadd.f32 %v3689_v27, %v1643_v29  ;;  %v3793_v37 = vadd.f32 %v3674_v16, %v1896_v48  ;;  %v3796_v25 = vadd.f32 %v3676_v17, %v1898_v10  ;;  %v1900_v14 = vadd.f32 %v1836_v18, %v3657_v0 }
 0x200   : > { %v1902_v23 = vadd.f32 %v1838_v19, %v3659_v2  ;;  %v3801_v38 = vadd.f32 %v3678_v20, %v1897_v47  ;;  %v3804_v42 = vadd.f32 %v3680_v21, %v1899_v22  ;;  %v1901_v24 = vadd.f32 %v1837_v59, %v3661_v3 }
 0x201   : > { %4476 = vst [vmem:[#allocation33_spill] sm:$0xff] %v3796_v25  ;;  %v1903_v27 = vadd.f32 %v1839_v30, %v3663_v4  ;;  %v3809_v48 = vmul.f32 0.01, %v3793_v37  ;;  %v3812_v10 = vmul.f32 0.01, %v3796_v25  ;;  %v3815_v29 = vadd.f32 %v3674_v16, %v1900_v14  ;;  %v1534_v47 = vpop.f32.mrb[20].mxu0 }
 0x202   : > { %v3818_v11 = vadd.f32 %v3676_v17, %v1902_v23  ;;  %v1647_v44 = vpop.f32.mrb[20].mxu1  ;;  %v2106_v22 = vmax.f32 %v3744_v7, %v3773_v56  ;;  %v2108_v59 = vmax.f32 %v3747_v39, %v3776_v45  ;;  %v3825_v43 = vadd.f32 %v3678_v20, %v1901_v24  ;;  %v1536_v32 = vpop.f32.mrb[21].mxu0 }
 0x203   : > { %4477 = vst [vmem:[#allocation34_spill] sm:$0xff] %v3812_v10  ;;  %v3828_v15 = vadd.f32 %v3680_v21, %v1903_v27  ;;  %v1649_v18 = vpop.f32.mrb[21].mxu1  ;;  %v3835_v14 = vmul.f32 0.01, %v3801_v38  ;;  %v3838_v7 = vmul.f32 0.01, %v3804_v42  ;;  %v1840_v24 = vadd.f32 %v3692_v31, %v1534_v47 }
 0x204   : > { %v1538_v39 = vpop.f32.mrb[22].mxu0  ;;  %v1651_v56 = vpop.f32.mrb[22].mxu1  ;;  %v3841_v45 = vmul.f32 0.01, %v3815_v29  ;;  %v3844_v23 = vmul.f32 0.01, %v3818_v11  ;;  %v1842_v27 = vadd.f32 %v3694_v34, %v1647_v44  ;;  %v2103_v4 = vmax.f32 %v3730_v12, %v3767_v26 }
 0x205   : > { %v1540_v19 = vpop.f32.mrb[23].mxu0  ;;  %v1653_v30 = vpop.f32.mrb[23].mxu1  ;;  %v3849_v41 = vmul.f32 0.01, %v3825_v43  ;;  %v3852_v40 = vmul.f32 0.01, %v3828_v15  ;;  %v2107_v3 = vmax.f32 %v3750_v1, %v2043_v51  ;;  %v1904_v2 = vadd.f32 %v1840_v24, %v3633_v6 }
 0x206   : > { %v1906_v0 = vadd.f32 %v1842_v27, %v3635_v49  ;;  %v2105_v47 = vmax.f32 %v3733_v13, %v3770_v33  ;;  %v2109_v44 = vmax.f32 %v3753_v60, %v2045_v9  ;;  %v1841_v62 = vadd.f32 %v3696_v35, %v1536_v32 }
 0x207   : > { %v2603_v63 = vpack.c.bf16 %v2107_v3, %v2103_v4  ;;  %v1843_v10 = vadd.f32 %v3698_v36, %v1649_v18  ;;  %v4478_v25 = vmax.f32 %v3722_v46, %v3738_v28  ;;  %v3868_v1 = vadd.f32 %v3674_v16, %v1904_v2 }
 0x208   : > { %v3871_v26 = vadd.f32 %v3676_v17, %v1906_v0  ;;  %v2635_v51 = vpack.c.bf16 %v2109_v44, %v2105_v47  ;;  %v4479_v13 = vmax.f32 %v3725_v8, %v3741_v5  ;;  %v1905_v3 = vadd.f32 %v1841_v62, %v3637_v50 }
 0x209   : > { %v2605_v12 = vpack.c.bf16 %v2106_v22, %v4478_v25  ;;  %2604 = vmatprep.subr.bf16.mxu1 %v2603_v63  ;;  %v1907_v4 = vadd.f32 %v1843_v10, %v3639_v52  ;;  %v1844_v33 = vadd.f32 %v3692_v31, %v1538_v39  ;;  %v1846_v25 = vadd.f32 %v3694_v34, %v1651_v56  ;;  %v1544_v46 = vpop.f32.mrb[24].mxu0 }
 0x20a   : > { %v2637_v60 = vpack.c.bf16 %v2108_v59, %v4479_v13  ;;  %v1657_v2 = vpop.f32.mrb[24].mxu1  ;;  %v3881_v28 = vmul.f32 0.01, %v3868_v1  ;;  %v3884_v0 = vmul.f32 0.01, %v3871_v26  ;;  %2636 = vmatprep.subr.bf16.mxu0 %v2635_v51  ;;  %v1845_v63 = vadd.f32 %v3696_v35, %v1540_v19  ;;  %v1546_v8 = vpop.f32.mrb[25].mxu0 }
 0x20b   : > { %2606 = vmatpush1.bf16.xpose.msra.mxu1 %v2605_v12  ;;  %v1847_v62 = vadd.f32 %v3698_v36, %v1653_v30  ;;  %v1659_v5 = vpop.f32.mrb[25].mxu1  ;;  %v3889_v9 = vadd.f32 %v3678_v20, %v1905_v3  ;;  %v3892_v10 = vadd.f32 %v3680_v21, %v1907_v4  ;;  %v1908_v22 = vadd.f32 %v1844_v33, %v3641_v53  ;;  %v1548_v32 = vpop.f32.mrb[26].mxu0 }
 0x20c   : > { %2638 = vmatpush1.bf16.xpose.msra.mxu0 %v2637_v60  ;;  %v1910_v59 = vadd.f32 %v1846_v25, %v3643_v54  ;;  %v1661_v18 = vpop.f32.mrb[26].mxu1  ;;  %v2114_v19 = vmax.f32 %v3815_v29, %v3841_v45  ;;  %v2116_v30 = vmax.f32 %v3818_v11, %v3844_v23  ;;  %v1909_v39 = vadd.f32 %v1845_v63, %v3645_v55  ;;  %v1550_v24 = vpop.f32.mrb[27].mxu0 }
 0x20d   : > { %v1911_v56 = vadd.f32 %v1847_v62, %v3647_v57  ;;  %v1663_v27 = vpop.f32.mrb[27].mxu1  ;;  %v3907_v12 = vadd.f32 %v3674_v16, %v1908_v22  ;;  %v1848_v23 = vadd.f32 %v3692_v31, %v1544_v46  ;;  %v1850_v51 = vadd.f32 %v3694_v34, %v1657_v2 }
 0x20e   : > { %v3910_v29 = vadd.f32 %v3676_v17, %v1910_v59  ;;  %v3913_v11 = vadd.f32 %v3678_v20, %v1909_v39  ;;  %v3921_v13 = vmul.f32 0.01, %v3889_v9  ;;  %v3924_v60 = vmul.f32 0.01, %v3892_v10 }
 0x20f   : > { %v3916_v45 = vadd.f32 %v3680_v21, %v1911_v56  ;;  %v2111_v3 = vmax.f32 %v3801_v38, %v3835_v14  ;;  %v2115_v4 = vmax.f32 %v3825_v43, %v3849_v41  ;;  %v3931_v33 = vmul.f32 0.01, %v3907_v12 }
 0x210   : > { %v3934_v25 = vmul.f32 0.01, %v3910_v29  ;;  %v1912_v46 = vadd.f32 %v1848_v23, %v3649_v58  ;;  %v1914_v2 = vadd.f32 %v1850_v51, %v3651_v61  ;;  %v3939_v63 = vmul.f32 0.01, %v3913_v11 }
 0x211   : > { %v3942_v62 = vmul.f32 0.01, %v3916_v45  ;;  %v2607_v38 = vpack.c.bf16 %v2115_v4, %v2111_v3  ;;  %v2113_v41 = vmax.f32 %v3804_v42, %v3838_v7  ;;  %v1554_v43 = vpop.f32.mrb[28].mxu0  ;;  %v2117_v39 = vmax.f32 %v3828_v15, %v3852_v40  ;;  %v4481_v4 = vld [vmem:[#allocation33_spill] sm:$0xff] }
 0x212   : > { %v1667_v14 = vpop.f32.mrb[28].mxu1  ;;  %v3947_v22 = vadd.f32 %v3674_v16, %v1912_v46  ;;  %v3950_v59 = vadd.f32 %v3676_v17, %v1914_v2  ;;  %v1849_v56 = vadd.f32 %v3696_v35, %v1546_v8  ;;  %v1556_v23 = vpop.f32.mrb[29].mxu0  ;;  %v1851_v3 = vadd.f32 %v3698_v36, %v1659_v5  ;;  %v4482_v46 = vld [vmem:[#allocation34_spill] sm:$0xff] }
 0x213   : > { %v3955_v51 = vpop.f32.mrb[29].mxu1  ;;  %2608 = vmatprep.subr.bf16.mxu1 %v2607_v38  ;;  %v4480_v42 = vmax.f32 %v3793_v37, %v3809_v48  ;;  %v4483_v44 = vmax.f32 %v4481_v4, %v4482_v46  ;;  %v1852_v47 = vadd.f32 %v3692_v31, %v1548_v32  ;;  %v3965_v61 = vpop.f32.mrb[30].mxu0  ;;  %v2639_v5 = vpack.c.bf16 %v2117_v39, %v2113_v41  ;;  %v4484_v38 = vld [vmem:[#allocation21_spill] sm:$0xff]  ;;  %v4486_v31 = vld [vmem:[#allocation23_spill] sm:$0xff] }
 0x214   : > { %v3967_v40 = vpop.f32.mrb[30].mxu1  ;;  %v3970_v15 = vmul.f32 0.01, %v3947_v22  ;;  %v3973_v8 = vmul.f32 0.01, %v3950_v59  ;;  %v1913_v37 = vadd.f32 %v1849_v56, %v4484_v38  ;;  %v3976_v48 = vpop.f32.mrb[31].mxu0  ;;  %v1853_v4 = vadd.f32 %v3696_v35, %v1550_v24 }
 0x215   : > { %v2609_v7 = vpack.c.bf16 %v2114_v19, %v4480_v42  ;;  %v2641_v2 = vpack.c.bf16 %v2116_v30, %v4483_v44  ;;  %v3978_v19 = vpop.f32.mrb[31].mxu1  ;;  %v4485_v30 = vld [vmem:[#allocation22_spill] sm:$0xff]  ;;  %v1916_v32 = vadd.f32 %v1852_v47, %v4486_v31  ;;  %v1854_v42 = vadd.f32 %v3694_v34, %v1661_v18  ;;  %2640 = vmatprep.subr.bf16.mxu0 %v2639_v5  ;;  %v4487_v35 = vld [vmem:[#allocation24_spill] sm:$0xff]  ;;  %v4488_v24 = vld [vmem:[#allocation25_spill] sm:$0xff] }
 0x216   : > { %v1915_v44 = vadd.f32 %v1851_v3, %v4485_v30  ;;  %v2122_v46 = vmax.f32 %v3907_v12, %v3931_v33  ;;  %v2124_v41 = vmax.f32 %v3910_v29, %v3934_v25  ;;  %v3989_v39 = vadd.f32 %v3678_v20, %v1913_v37  ;;  %v4489_v29 = vld [vmem:[#allocation26_spill] sm:$0xff]  ;;  %v4490_v25 = vld [vmem:[#allocation27_spill] sm:$0xff]  ;;  %v4491_v5 = vld [vmem:[#allocation28_spill] sm:$0xff] }
 0x217   : > { %2610 = vmatpush1.bf16.xpose.msra.mxu1 %v2609_v7  ;;  %v1855_v56 = vadd.f32 %v3698_v36, %v1663_v27  ;;  %2642 = vmatpush1.bf16.xpose.msra.mxu0 %v2641_v2  ;;  %v3996_v34 = vadd.f32 %v3674_v16, %v1916_v32  ;;  %v1918_v18 = vadd.f32 %v1854_v42, %v4487_v35  ;;  %v4495_v31 = vld [vmem:[#allocation29_spill] sm:$0xff] }
 0x218   : > { %v3993_v3 = vadd.f32 %v3680_v21, %v1915_v44  ;;  %v1917_v47 = vadd.f32 %v1853_v4, %v4488_v24  ;;  %v1856_v7 = vadd.f32 %v4490_v25, %v1554_v43  ;;  %v1858_v36 = vadd.f32 %v4491_v5, %v1667_v14 }
 0x219   : > { %v1919_v33 = vadd.f32 %v1855_v56, %v4489_v29  ;;  %v4008_v2 = vmul.f32 0.01, %v3996_v34  ;;  %v4011_v37 = vadd.f32 %v3676_v17, %v1918_v18  ;;  %v1564_v32 = vpop.f32.mrb[32].mxu0  ;;  %v4017_v4 = vmul.f32 0.01, %v3989_v39 }
 0x21a   : > { %v4014_v44 = vadd.f32 %v3678_v20, %v1917_v47  ;;  %v1677_v42 = vpop.f32.mrb[32].mxu1  ;;  %v1920_v14 = vadd.f32 %v1856_v7, %v3633_v6  ;;  %v1922_v56 = vadd.f32 %v1858_v36, %v3635_v49  ;;  %v4024_v27 = vpop.f32.mrb[33].mxu0  ;;  %v4029_v18 = vmul.f32 0.01, %v3993_v3 }
 0x21b   : > { %v4020_v43 = vadd.f32 %v3680_v21, %v1919_v33  ;;  %v4026_v12 = vpop.f32.mrb[33].mxu1  ;;  %v2119_v29 = vmax.f32 %v3889_v9, %v3921_v13  ;;  %v2123_v33 = vmax.f32 %v3913_v11, %v3939_v63  ;;  %v4037_v24 = vpop.f32.mrb[34].mxu0  ;;  %v4042_v36 = vmul.f32 0.01, %v4011_v37 }
 0x21c   : > { %v4039_v7 = vpop.f32.mrb[34].mxu1  ;;  %v4045_v49 = vmul.f32 0.01, %v4014_v44  ;;  %v4048_v6 = vadd.f32 %v3674_v16, %v1920_v14  ;;  %v4051_v47 = vadd.f32 %v3676_v17, %v1922_v56  ;;  %v4053_v9 = vpop.f32.mrb[35].mxu0  ;;  %v2121_v63 = vmax.f32 %v3892_v10, %v3924_v60  ;;  %v4496_v56 = vld [vmem:[#allocation30_spill] sm:$0xff] }
 0x21d   : > { %4492 = vst [vmem:[#allocation33_spill] sm:$0xff] %v4039_v7  ;;  %4493 = vst [vmem:[#allocation34_spill] sm:$0xff] %v4053_v9  ;;  %v4055_v13 = vpop.f32.mrb[35].mxu1  ;;  %v2611_v11 = vpack.c.bf16 %v2123_v33, %v2119_v29  ;;  %v2125_v35 = vmax.f32 %v3916_v45, %v3942_v62  ;;  %v1857_v7 = vadd.f32 %v4495_v31, %v1556_v23  ;;  %v4063_v30 = vmul.f32 0.01, %v4020_v43 }
 0x21e   : > { %4494 = vst [vmem:[#allocation27_spill] sm:$0xff] %v4055_v13  ;;  %v4066_v14 = vmul.f32 0.01, %v4048_v6  ;;  %v1859_v9 = vadd.f32 %v4496_v56, %v3955_v51  ;;  %v4497_v29 = vmax.f32 %v3868_v1, %v3881_v28  ;;  %v4498_v45 = vmax.f32 %v3871_v26, %v3884_v0 }
 0x21f   : > { %2612 = vmatprep.subr.bf16.mxu1 %v2611_v11  ;;  %v2643_v10 = vpack.c.bf16 %v2125_v35, %v2121_v63  ;;  %v1921_v60 = vadd.f32 %v1857_v7, %v3637_v50  ;;  %v1860_v23 = vadd.f32 %v4490_v25, %v3965_v61  ;;  %v2132_v13 = vmax.f32 %v4011_v37, %v4042_v36 }
 0x220   : > { %v2613_v33 = vpack.c.bf16 %v2122_v46, %v4497_v29  ;;  %v2645_v62 = vpack.c.bf16 %v2124_v41, %v4498_v45  ;;  %v4082_v51 = vmul.f32 0.01, %v4051_v47  ;;  %v1923_v1 = vadd.f32 %v1859_v9, %v3639_v52  ;;  %v4499_v45 = vld [vmem:[#allocation20_spill] sm:$0xff] }
 0x221   : > { %v1862_v28 = vadd.f32 %v4491_v5, %v3967_v40  ;;  %2644 = vmatprep.subr.bf16.mxu0 %v2643_v10  ;;  %v1924_v26 = vadd.f32 %v1860_v23, %v3641_v53  ;;  %v1861_v61 = vadd.f32 %v4495_v31, %v3976_v48  ;;  %v1863_v0 = vadd.f32 %v4496_v56, %v3978_v19  ;;  %v1574_v41 = vpop.f32.mrb[36].mxu0 }
 0x222   : > { %2614 = vmatpush1.bf16.xpose.msra.mxu1 %v2613_v33  ;;  %v4094_v35 = vpop.f32.mrb[36].mxu1  ;;  %v4097_v37 = vadd.f32 %v3678_v20, %v1921_v60  ;;  %2646 = vmatpush1.bf16.xpose.msra.mxu0 %v2645_v62  ;;  %v1864_v7 = vadd.f32 %v4490_v25, %v1564_v32  ;;  %v1866_v36 = vadd.f32 %v4491_v5, %v1677_v42  ;;  %v4102_v9 = vpop.f32.mrb[37].mxu0 }
 0x223   : > { %v1926_v40 = vadd.f32 %v1862_v28, %v3643_v54  ;;  %v4104_v11 = vpop.f32.mrb[37].mxu1  ;;  %v4107_v48 = vadd.f32 %v3680_v21, %v1923_v1  ;;  %v4110_v19 = vadd.f32 %v3674_v16, %v1924_v26  ;;  %v1925_v63 = vadd.f32 %v1861_v61, %v3645_v55  ;;  %v4114_v33 = vpop.f32.mrb[38].mxu0 }
 0x224   : > { %v1927_v29 = vadd.f32 %v1863_v0, %v3647_v57  ;;  %v4116_v10 = vpop.f32.mrb[38].mxu1  ;;  %v1928_v60 = vadd.f32 %v1864_v7, %v3649_v58  ;;  %v1930_v62 = vadd.f32 %v1866_v36, %v4499_v45  ;;  %v4125_v23 = vpop.f32.mrb[39].mxu0  ;;  %v2127_v0 = vmax.f32 %v3989_v39, %v4017_v4 }
 0x225   : > { %v4121_v42 = vadd.f32 %v3676_v17, %v1926_v40  ;;  %v4127_v1 = vpop.f32.mrb[39].mxu1  ;;  %v4130_v28 = vmul.f32 0.01, %v4110_v19  ;;  %v4133_v26 = vadd.f32 %v3678_v20, %v1925_v63  ;;  %v2131_v32 = vmax.f32 %v4014_v44, %v4045_v49 }
 0x226   : > { %v4136_v61 = vadd.f32 %v3680_v21, %v1927_v29  ;;  %v4144_v7 = vadd.f32 %v3674_v16, %v1928_v60  ;;  %v4147_v36 = vadd.f32 %v3676_v17, %v1930_v62  ;;  %v4152_v63 = vmul.f32 0.01, %v4097_v37 }
 0x227   : > { %v4141_v40 = vmul.f32 0.01, %v4121_v42  ;;  %v4155_v29 = vmul.f32 0.01, %v4107_v48  ;;  %v2075_v4 = vmul.f32 0.01, %v4133_v26  ;;  %v2615_v46 = vpack.c.bf16 %v2131_v32, %v2127_v0 }
 0x228   : > { %v4163_v62 = vmul.f32 0.01, %v4136_v61  ;;  %v2129_v49 = vmax.f32 %v3993_v3, %v4029_v18  ;;  %v2133_v44 = vmax.f32 %v4020_v43, %v4063_v30  ;;  %v1865_v45 = vadd.f32 %v4495_v31, %v4024_v27  ;;  %v4503_v43 = vld [vmem:[#allocation22_spill] sm:$0xff] }
 0x229   : > { %v1867_v39 = vadd.f32 %v4496_v56, %v4026_v12  ;;  %v4500_v58 = vmax.f32 %v3947_v22, %v3970_v15  ;;  %v4501_v60 = vmax.f32 %v3996_v34, %v4008_v2  ;;  %v4179_v32 = vpop.f32.mrb[40].mxu0  ;;  %v4184_v3 = vmul.f32 0.01, %v4144_v7  ;;  %2616 = vmatprep.subr.bf16.mxu1 %v2615_v46 }
 0x22a   : > { %v4181_v0 = vpop.f32.mrb[40].mxu1  ;;  %v4187_v30 = vmul.f32 0.01, %v4147_v36  ;;  %v4502_v12 = vmax.f32 %v3950_v59, %v3973_v8  ;;  %v1868_v22 = vadd.f32 %v4490_v25, %v4037_v24  ;;  %v4194_v15 = vpop.f32.mrb[41].mxu0  ;;  %v2647_v34 = vpack.c.bf16 %v2133_v44, %v2129_v49  ;;  %v4505_v8 = vld [vmem:[#allocation23_spill] sm:$0xff]  ;;  %v4506_v24 = vld [vmem:[#allocation34_spill] sm:$0xff] }
 0x22b   : > { %v2617_v57 = vpack.c.bf16 %v4501_v60, %v4500_v58  ;;  %v4196_v58 = vpop.f32.mrb[41].mxu1  ;;  %v1929_v2 = vadd.f32 %v1865_v45, %v4484_v38  ;;  %v1931_v18 = vadd.f32 %v1867_v39, %v4503_v43  ;;  %v4504_v60 = vld [vmem:[#allocation33_spill] sm:$0xff]  ;;  %v4202_v55 = vpop.f32.mrb[42].mxu0  ;;  %v1869_v25 = vadd.f32 %v4495_v31, %v4506_v24  ;;  %v4508_v44 = vld [vmem:[#allocation31_spill] sm:$0xff] }
 0x22c   : > { %v2649_v27 = vpack.c.bf16 %v2132_v13, %v4502_v12  ;;  %v1870_v46 = vadd.f32 %v4491_v5, %v4504_v60  ;;  %v4204_v59 = vpop.f32.mrb[42].mxu1  ;;  %v1932_v13 = vadd.f32 %v1868_v22, %v4505_v8  ;;  %v4507_v12 = vld [vmem:[#allocation27_spill] sm:$0xff]  ;;  %v1872_v45 = vadd.f32 %v4508_v44, %v1574_v41  ;;  %v4212_v38 = vpop.f32.mrb[43].mxu0  ;;  %2648 = vmatprep.subr.bf16.mxu0 %v2647_v34  ;;  %v4511_v22 = vld [vmem:[#allocation24_spill] sm:$0xff]  ;;  %v4512_v31 = vld [vmem:[#allocation13_spill] sm:$0xff] }
 0x22d   : > { %2618 = vmatpush1.bf16.xpose.msra.mxu1 %v2617_v57  ;;  %v1871_v49 = vadd.f32 %v4496_v56, %v4507_v12  ;;  %4509 = vst [vmem:[#allocation28_spill] sm:$0xff] %v4212_v38  ;;  %v4214_v57 = vpop.f32.mrb[43].mxu1  ;;  %v4217_v5 = vadd.f32 %v3678_v20, %v1929_v2  ;;  %v4220_v39 = vadd.f32 %v3680_v21, %v1931_v18  ;;  %v4513_v41 = vld [vmem:[#allocation25_spill] sm:$0xff]  ;;  %v4514_v38 = vld [vmem:[#allocation26_spill] sm:$0xff]  ;;  %v4515_v34 = vld [vmem:[#allocation15_spill] sm:$0xff] }
 0x22e   : > { %4510 = vst [vmem:[#allocation29_spill] sm:$0xff] %v4214_v57  ;;  %v1934_v60 = vadd.f32 %v1870_v46, %v4511_v22  ;;  %v1874_v24 = vadd.f32 %v4512_v31, %v4094_v35  ;;  %2650 = vmatpush1.bf16.xpose.msra.mxu0 %v2649_v27  ;;  %v4226_v56 = vadd.f32 %v3674_v16, %v1932_v13  ;;  %v4516_v35 = vld [vmem:[#allocation16_spill] sm:$0xff] }
 0x22f   : > { %v1933_v12 = vadd.f32 %v1869_v25, %v4513_v41  ;;  %v1935_v57 = vadd.f32 %v1871_v49, %v4514_v38  ;;  %v1936_v8 = vadd.f32 %v1872_v45, %v4515_v34  ;;  %v4262_v18 = vmul.f32 0.01, %v4220_v39 }
 0x230   : > { %v4236_v46 = vadd.f32 %v3676_v17, %v1934_v60  ;;  %v1938_v27 = vadd.f32 %v1874_v24, %v4516_v35  ;;  %v4240_v13 = vmul.f32 0.01, %v4226_v56  ;;  %v2135_v24 = vmax.f32 %v4097_v37, %v4152_v63 }
 0x231   : > { %v4243_v25 = vadd.f32 %v3678_v20, %v1933_v12  ;;  %v4246_v49 = vadd.f32 %v3680_v21, %v1935_v57  ;;  %v4249_v45 = vadd.f32 %v3674_v16, %v1936_v8  ;;  %v2139_v35 = vmax.f32 %v4133_v26, %v2075_v4  ;;  %v4517_v4 = vld [vmem:[#allocation32_spill] sm:$0xff] }
 0x232   : > { %v4252_v34 = vmul.f32 0.01, %v4236_v46  ;;  %v4255_v60 = vadd.f32 %v3676_v17, %v1938_v27  ;;  %v2079_v12 = vmul.f32 0.01, %v4217_v5  ;;  %v2146_v8 = vmax.f32 %v4226_v56, %v4240_v13  ;;  %v4518_v13 = vld [vmem:[#allocation14_spill] sm:$0xff] }
 0x233   : > { %v2083_v57 = vmul.f32 0.01, %v4243_v25  ;;  %v2085_v27 = vmul.f32 0.01, %v4246_v49  ;;  %v4271_v38 = vmul.f32 0.01, %v4249_v45  ;;  %v2619_v37 = vpack.c.bf16 %v2139_v35, %v2135_v24 }
 0x234   : > { %v2148_v2 = vmax.f32 %v4236_v46, %v4252_v34  ;;  %v2137_v26 = vmax.f32 %v4107_v48, %v4155_v29  ;;  %v2141_v63 = vmax.f32 %v4136_v61, %v4163_v62  ;;  %v1873_v56 = vadd.f32 %v4517_v4, %v4102_v9 }
 0x235   : > { %v1875_v41 = vadd.f32 %v4518_v13, %v4104_v11  ;;  %v4282_v46 = vmul.f32 0.01, %v4255_v60  ;;  %2620 = vmatprep.subr.bf16.mxu1 %v2619_v37  ;;  %v4519_v34 = vmax.f32 %v4048_v6, %v4066_v14  ;;  %v4520_v24 = vmax.f32 %v4110_v19, %v4130_v28 }
 0x236   : > { %v4521_v61 = vmax.f32 %v4051_v47, %v4082_v51  ;;  %v4522_v9 = vmax.f32 %v4121_v42, %v4141_v40  ;;  %v1876_v11 = vadd.f32 %v4508_v44, %v4114_v33  ;;  %v2651_v62 = vpack.c.bf16 %v2141_v63, %v2137_v26  ;;  %v4523_v42 = vld [vmem:[#allocation17_spill] sm:$0xff]  ;;  %v4525_v40 = vld [vmem:[#allocation19_spill] sm:$0xff]  ;;  %v4526_v63 = vld [vmem:[#allocation20_spill] sm:$0xff] }
 0x237   : > { %v2621_v48 = vpack.c.bf16 %v4520_v24, %v4519_v34  ;;  %v1937_v35 = vadd.f32 %v1873_v56, %v3637_v50  ;;  %v1939_v37 = vadd.f32 %v1875_v41, %v3639_v52  ;;  %v1878_v6 = vadd.f32 %v4512_v31, %v4116_v10 }
 0x238   : > { %v2653_v29 = vpack.c.bf16 %v4522_v9, %v4521_v61  ;;  %v1940_v14 = vadd.f32 %v1876_v11, %v3641_v53  ;;  %v1877_v47 = vadd.f32 %v4517_v4, %v4125_v23  ;;  %v1879_v51 = vadd.f32 %v4518_v13, %v4127_v1  ;;  %2652 = vmatprep.subr.bf16.mxu0 %v2651_v62  ;;  %v4524_v1 = vld [vmem:[#allocation18_spill] sm:$0xff] }
 0x239   : > { %2622 = vmatpush1.bf16.xpose.msra.mxu1 %v2621_v48  ;;  %v1880_v19 = vadd.f32 %v4508_v44, %v4179_v32  ;;  %v2023_v50 = vadd.f32 %v3678_v20, %v1937_v35  ;;  %v4311_v52 = vadd.f32 %v3680_v21, %v1939_v37  ;;  %v1942_v33 = vadd.f32 %v1878_v6, %v3643_v54 }
 0x23a   : > { %v1882_v53 = vadd.f32 %v4512_v31, %v4181_v0  ;;  %2654 = vmatpush1.bf16.xpose.msra.mxu0 %v2653_v29  ;;  %v4317_v10 = vadd.f32 %v3674_v16, %v1940_v14  ;;  %v1941_v23 = vadd.f32 %v1877_v47, %v4523_v42  ;;  %v1943_v28 = vadd.f32 %v1879_v51, %v4524_v1 }
 0x23b   : > { %v1944_v32 = vadd.f32 %v1880_v19, %v4525_v40  ;;  %v2150_v41 = vmax.f32 %v4249_v45, %v4271_v38  ;;  %v2152_v26 = vmax.f32 %v4255_v60, %v4282_v46  ;;  %v2028_v54 = vadd.f32 %v3676_v17, %v1942_v33 }
 0x23c   : > { %v1946_v0 = vadd.f32 %v1882_v53, %v4526_v63  ;;  %v2090_v56 = vmul.f32 0.01, %v4317_v10  ;;  %v2027_v34 = vadd.f32 %v3678_v20, %v1941_v23  ;;  %v2029_v24 = vadd.f32 %v3680_v21, %v1943_v28  ;;  %v4530_v53 = vld [vmem:[#allocation23_spill] sm:$0xff]  ;;  %v4534_v23 = vld [vmem:[#allocation26_spill] sm:$0xff] }
 0x23d   : > { %v4332_v48 = vadd.f32 %v3674_v16, %v1944_v32  ;;  %v2092_v61 = vmul.f32 0.01, %v2028_v54  ;;  %v2143_v38 = vmax.f32 %v4217_v5, %v2079_v12  ;;  %v2147_v45 = vmax.f32 %v4243_v25, %v2083_v57 }
 0x23e   : > { %v4335_v9 = vadd.f32 %v3676_v17, %v1946_v0  ;;  %v2087_v60 = vmul.f32 0.01, %v2023_v50  ;;  %v2089_v46 = vmul.f32 0.01, %v4311_v52  ;;  %v2154_v29 = vmax.f32 %v4317_v10, %v2090_v56 }
 0x23f   : > { %v2091_v11 = vmul.f32 0.01, %v2027_v34  ;;  %v2156_v62 = vmax.f32 %v2028_v54, %v2092_v61  ;;  %v2093_v35 = vmul.f32 0.01, %v2029_v24  ;;  %v2094_v37 = vmul.f32 0.01, %v4332_v48 }
 0x240   : > { %v2623_v6 = vpack.c.bf16 %v2147_v45, %v2143_v38  ;;  %v2145_v14 = vmax.f32 %v4220_v39, %v4262_v18  ;;  %v2149_v47 = vmax.f32 %v4246_v49, %v2085_v27  ;;  %v1881_v5 = vadd.f32 %v4517_v4, %v4194_v15  ;;  %v4529_v49 = vld [vmem:[#allocation21_spill] sm:$0xff] }
 0x241   : > { %v1883_v25 = vadd.f32 %v4518_v13, %v4196_v58  ;;  %v2096_v12 = vmul.f32 0.01, %v4335_v9  ;;  %v4527_v57 = vmax.f32 %v4144_v7, %v4184_v3  ;;  %v4528_v19 = vmax.f32 %v4147_v36, %v4187_v30  ;;  %v4531_v7 = vld [vmem:[#allocation28_spill] sm:$0xff] }
 0x242   : > { %2624 = vmatprep.subr.bf16.mxu1 %v2623_v6  ;;  %v1884_v39 = vadd.f32 %v4508_v44, %v4202_v55  ;;  %v2655_v18 = vpack.c.bf16 %v2149_v47, %v2145_v14  ;;  %v1945_v15 = vadd.f32 %v1881_v5, %v4529_v49  ;;  %v1886_v58 = vadd.f32 %v4512_v31, %v4204_v59  ;;  %v4533_v31 = vld [vmem:[#allocation25_spill] sm:$0xff] }
 0x243   : > { %v2625_v51 = vpack.c.bf16 %v2146_v8, %v4527_v57  ;;  %v2657_v33 = vpack.c.bf16 %v2148_v2, %v4528_v19  ;;  %v1947_v27 = vadd.f32 %v1883_v25, %v4503_v43  ;;  %v1885_v3 = vadd.f32 %v4517_v4, %v4531_v7  ;;  %v4532_v8 = vld [vmem:[#allocation29_spill] sm:$0xff] }
 0x244   : > { %v1948_v10 = vadd.f32 %v1884_v39, %v4530_v53  ;;  %v1887_v36 = vadd.f32 %v4518_v13, %v4532_v8  ;;  %v2151_v30 = vmax.f32 %v2023_v50, %v2087_v60  ;;  %2656 = vmatprep.subr.bf16.mxu0 %v2655_v18  ;;  %v2031_v55 = vadd.f32 %v3678_v20, %v1945_v15 }
 0x245   : > { %2626 = vmatpush1.bf16.xpose.msra.mxu1 %v2625_v51  ;;  %v2033_v44 = vadd.f32 %v3680_v21, %v1947_v27  ;;  %v1950_v43 = vadd.f32 %v1886_v58, %v4511_v22  ;;  %v2155_v2 = vmax.f32 %v2027_v34, %v2091_v11  ;;  %2658 = vmatpush1.bf16.xpose.msra.mxu0 %v2657_v33 }
 0x246   : > { %v2034_v59 = vadd.f32 %v3674_v16, %v1948_v10  ;;  %v1949_v42 = vadd.f32 %v1885_v3, %v4533_v31  ;;  %v1951_v1 = vadd.f32 %v1887_v36, %v4534_v23  ;;  %v2153_v4 = vmax.f32 %v4311_v52, %v2089_v46 }
 0x247   : > { %v2095_v28 = vmul.f32 0.01, %v2031_v55  ;;  %v2097_v13 = vmul.f32 0.01, %v2033_v44  ;;  %v2036_v50 = vadd.f32 %v3676_v17, %v1950_v43  ;;  %v2627_v40 = vpack.c.bf16 %v2155_v2, %v2151_v30 }
 0x248   : > { %v2098_v32 = vmul.f32 0.01, %v2034_v59  ;;  %v2035_v54 = vadd.f32 %v3678_v20, %v1949_v42  ;;  %v2037_v22 = vadd.f32 %v3680_v21, %v1951_v1  ;;  %v2157_v63 = vmax.f32 %v2029_v24, %v2093_v35 }
 0x249   : > { %v2158_v0 = vmax.f32 %v4332_v48, %v2094_v37  ;;  %v2100_v16 = vmul.f32 0.01, %v2036_v50  ;;  %2628 = vmatprep.subr.bf16.mxu1 %v2627_v40  ;;  %v2629_v56 = vpack.c.bf16 %v2154_v29, %v2150_v41  ;;  %v2661_v34 = vpack.c.bf16 %v2156_v62, %v2152_v26  ;;  %v2166_v26 = vld [vmem:[#allocation9] sm:$0xff]  ;;  %v2168_v29 = vld [vmem:[#allocation9 + $0x10] sm:$0xff] }
 0x24a   : > { %v2162_v61 = vmax.f32 %v2034_v59, %v2098_v32  ;;  %v2099_v38 = vmul.f32 0.01, %v2035_v54  ;;  %v2101_v52 = vmul.f32 0.01, %v2037_v22  ;;  %v2659_v45 = vpack.c.bf16 %v2157_v63, %v2153_v4 }
 0x24b   : > { %v2160_v60 = vmax.f32 %v4335_v9, %v2096_v12  ;;  %v2164_v17 = vmax.f32 %v2036_v50, %v2100_v16  ;;  %v2159_v46 = vmax.f32 %v2031_v55, %v2095_v28  ;;  %v2161_v11 = vmax.f32 %v2033_v44, %v2097_v13  ;;  %v2174_v9 = vpop.permute.xlu0 %2173 }
 0x24c   : > { %2660 = vmatprep.subr.bf16.mxu0 %v2659_v45  ;;  %v2163_v20 = vmax.f32 %v2035_v54, %v2099_v38  ;;  %v2165_v21 = vmax.f32 %v2037_v22, %v2101_v52  ;;  %v2633_v24 = vpack.c.bf16 %v2162_v61, %v2158_v0 }
 0x24d   : > { %2630 = vmatpush1.bf16.xpose.msra.mxu1 %v2629_v56  ;;  %v2665_v48 = vpack.c.bf16 %v2164_v17, %v2160_v60  ;;  %2662 = vmatpush1.bf16.xpose.msra.mxu0 %v2661_v34 }
 0x24e   : > { %v2631_v35 = vpack.c.bf16 %v2163_v20, %v2159_v46  ;;  %v2663_v41 = vpack.c.bf16 %v2165_v21, %v2161_v11 }
 0x250   : > { %2632 = vmatprep.subr.bf16.mxu1 %v2631_v35  ;;  %2664 = vmatprep.subr.bf16.mxu0 %v2663_v41 }
 0x255   : > { %2634 = vmatpush1.bf16.xpose.msra.mxu1 %v2633_v24  ;;  %2666 = vmatpush1.bf16.xpose.msra.mxu0 %v2665_v48 }
 0x25c   : > { %2241 = vmatmul.mubr.f32.vlgmr.msra.gmra.mrb[44].mxu1 %v2166_v26  ;;  %2311 = vmatmul.mubr.f32.vlgmr.msra.gmra.mrb[44].mxu0 %v2168_v29 }
 0x32f   : > { %v2242_v62 = vpop.f32.mrb[44].mxu1  ;;  %v2312_v14 = vpop.f32.mrb[44].mxu0 }
 0x330   : > { %v2243_v37 = vadd.f32 %v2242_v62, %v2174_v9  ;;  %v2244_v6 = vpop.f32.mrb[45].mxu1  ;;  %v2314_v5 = vpop.f32.mrb[45].mxu0 }
 0x332   : > { %v2313_v47 = vadd.f32 %v2312_v14, %v2243_v37 }
 0x334   : > { %2316 = vst [vmem:[%s421_s19] sm:$0xff] %v2313_v47 }
 0x335 PF: > { %s23_s10 = sadd.s32 1, %s3164_s10   ;;  %s4536_s5 = smov %s4543_s27 }
 0x336   : > { %p20_p9 = scmp.ge.s32.totalorder %s23_s10, 4   ;;  %s4537_s27 = smov %s3148_s28 }
 0x337   : > { %s4538_s28 = smov %s3152_s29  ;;  %s4539_s29 = smov %s3393_s25 }
 0x338   : > { %s4540_s30 = smov %s3160_s9  ;;  %s4541_s9 = smov %s4536_s5 }
 0x339   :  { %22 = sbr.rel (!%p20_p9) target bundleno = 9 (0x9), region = 111 }
 0x340   :  { %2342 = vsyncpa [#allocation3], 1 }
 0x341   :  { %2344 = vsyncpa [#allocation3 + $0x1], 1 }
 0x342   :  { %2345 = vsyncpa [#allocation5], 1 }
 0x343   :  { %2346 = vsyncpa [#allocation8], 1 }

// kernel: lanref_forward.3
= control target key start
LH: loop header
LB: loop body
LE: loop exit
PB: predicated region body
PF: predicated region fallthrough
CT: control target
= control target key end

     0   :  { %v3087_v1 = vmov 0   ;;  %s4282_s3 = inlined_call_operand.vmem [shape: bf16[128,512], index: 3, kind: input, shape index: {}]   ;;  %s4283_s4 = inlined_call_operand.vmem [shape: bf16[128,512], index: 4, kind: input, shape index: {}]   ;;  %s4284_s0 = inlined_call_operand.vmem [shape: f32[16,128], index: 0, kind: input, shape index: {}]   ;;  %s4285_s2 = inlined_call_operand.vmem [shape: bf16[256,512], index: 2, kind: input, shape index: {}]   ;;  %s4286_s1 = inlined_call_operand.vmem [shape: f32[16,8,128], index: 1, kind: input, shape index: {}]   ;;  %s4287_s6 = inlined_call_operand.vmem [shape: f32[8,512], index: 6, kind: input, shape index: {}]   ;;  %s4288_s7 = inlined_call_operand.vmem [shape: f32[8,1], index: 7, kind: input, shape index: {}]   ;;  %s4289_s5 = inlined_call_operand.vmem [shape: f32[1,512], index: 5, kind: input, shape index: {}]   ;;  %s4290_s8 = inlined_call_operand.vmem [shape: f32[8,128], index: 8, kind: output, shape index: {}]  }
   0x1   :  { %v2893_v0 = vld [vmem:[%s4282_s3 + $0x4] ss:$16 sps:$4 sm:$0xff]   ;;  %273 = vmatprep.mubr.bf16.mxu0 %v3087_v1  ;;  %316 = vmatprep.mubr.bf16.mxu1 %v3087_v1  ;;  %v2895_v2 = vld [vmem:[%s4282_s3 + $0xc] ss:$16 sps:$4 sm:$0xff]   ;;  %v2897_v3 = vld [vmem:[%s4282_s3] ss:$16 sps:$4 sm:$0xff]  }
   0x2   :  { %2892 = vset.pattern.permute.xlu0 %v3087_v1  ;;  %241 = vmatprep.subr.bf16.mxu0 %v2893_v0  ;;  %v2898_v4 = vld [vmem:[%s4282_s3 + $0x8] ss:$16 sps:$4 sm:$0xff]   ;;  %v2899_v5 = vld [vmem:[%s4282_s3 + $0x24] ss:$16 sps:$4 sm:$0xff]   ;;  %v2901_v6 = vld [vmem:[%s4282_s3 + $0x2c] ss:$16 sps:$4 sm:$0xff]  }
   0x3   :  { %284 = vmatprep.subr.bf16.mxu1 %v2895_v2  ;;  %242 = vmatpush1.bf16.msra.mxu0 %v2897_v3  ;;  %v2903_v7 = vld [vmem:[%s4282_s3 + $0x20] ss:$16 sps:$4 sm:$0xff]   ;;  %v2904_v8 = vld [vmem:[%s4282_s3 + $0x28] ss:$16 sps:$4 sm:$0xff]   ;;  %v2905_v9 = vld [vmem:[%s4282_s3 + $0x44] ss:$16 sps:$4 sm:$0xff]  }
   0x4   :  { %285 = vmatpush1.bf16.msra.mxu1 %v2898_v4  ;;  %243 = vmatprep.subr.bf16.mxu0 %v2899_v5  ;;  %v2907_v10 = vld [vmem:[%s4282_s3 + $0x4c] ss:$16 sps:$4 sm:$0xff]   ;;  %v2909_v11 = vld [vmem:[%s4282_s3 + $0x40] ss:$16 sps:$4 sm:$0xff]   ;;  %v2910_v12 = vld [vmem:[%s4282_s3 + $0x48] ss:$16 sps:$4 sm:$0xff]  }
   0x5   :  { %286 = vmatprep.subr.bf16.mxu1 %v2901_v6  ;;  %v2911_v13 = vld [vmem:[%s4282_s3 + $0x64] ss:$16 sps:$4 sm:$0xff]   ;;  %v2913_v14 = vld [vmem:[%s4282_s3 + $0x6c] ss:$16 sps:$4 sm:$0xff]   ;;  %v2915_v15 = vld [vmem:[%s4282_s3 + $0x60] ss:$16 sps:$4 sm:$0xff]  }
   0x6   :  { %v2916_v16 = vld [vmem:[%s4282_s3 + $0x68] ss:$16 sps:$4 sm:$0xff]   ;;  %v2917_v17 = vld [vmem:[%s4282_s3 + $0x84] ss:$16 sps:$4 sm:$0xff]   ;;  %v2919_v18 = vld [vmem:[%s4282_s3 + $0x8c] ss:$16 sps:$4 sm:$0xff]  }
   0x7   :  { %244 = vmatpush1.bf16.msra.mxu0 %v2903_v7  ;;  %v2921_v19 = vld [vmem:[%s4282_s3 + $0x80] ss:$16 sps:$4 sm:$0xff]   ;;  %v2922_v20 = vld [vmem:[%s4282_s3 + $0x88] ss:$16 sps:$4 sm:$0xff]   ;;  %v2923_v21 = vld [vmem:[%s4282_s3 + $0xa4] ss:$16 sps:$4 sm:$0xff]  }
   0x8   :  { %287 = vmatpush1.bf16.msra.mxu1 %v2904_v8  ;;  %245 = vmatprep.subr.bf16.mxu0 %v2905_v9  ;;  %v2925_v22 = vld [vmem:[%s4282_s3 + $0xac] ss:$16 sps:$4 sm:$0xff]   ;;  %v2927_v23 = vld [vmem:[%s4282_s3 + $0xa0] ss:$16 sps:$4 sm:$0xff]   ;;  %v2928_v24 = vld [vmem:[%s4282_s3 + $0xa8] ss:$16 sps:$4 sm:$0xff]  }
   0x9   :  { %288 = vmatprep.subr.bf16.mxu1 %v2907_v10  ;;  %v2929_v25 = vld [vmem:[%s4282_s3 + $0xc4] ss:$16 sps:$4 sm:$0xff]   ;;  %v2931_v26 = vld [vmem:[%s4282_s3 + $0xcc] ss:$16 sps:$4 sm:$0xff]   ;;  %v2933_v27 = vld [vmem:[%s4282_s3 + $0xc0] ss:$16 sps:$4 sm:$0xff]  }
   0xa   :  { %v2934_v28 = vld [vmem:[%s4282_s3 + $0xc8] ss:$16 sps:$4 sm:$0xff]   ;;  %v2935_v29 = vld [vmem:[%s4282_s3 + $0xe4] ss:$16 sps:$4 sm:$0xff]   ;;  %v2937_v30 = vld [vmem:[%s4282_s3 + $0xec] ss:$16 sps:$4 sm:$0xff]  }
   0xb   :  { %246 = vmatpush1.bf16.msra.mxu0 %v2909_v11  ;;  %v2939_v31 = vld [vmem:[%s4282_s3 + $0xe0] ss:$16 sps:$4 sm:$0xff]   ;;  %v2940_v32 = vld [vmem:[%s4282_s3 + $0xe8] ss:$16 sps:$4 sm:$0xff]   ;;  %v2945_v35 = vld [vmem:[%s4283_s4 + $0x4] ss:$16 sps:$4 sm:$0xff]  }
   0xc   :  { %289 = vmatpush1.bf16.msra.mxu1 %v2910_v12  ;;  %247 = vmatprep.subr.bf16.mxu0 %v2911_v13  ;;  %v3236_v33 = vld [vmem:[%s4284_s0] sm:$0xff]  ;;  %v3241_v34 = vld [vmem:[%s4284_s0 + $0x8] sm:$0xff] }
   0xd   :  { %290 = vmatprep.subr.bf16.mxu1 %v2913_v14  ;;  %v2948_v36 = vld [vmem:[%s4283_s4 + $0xc] ss:$16 sps:$4 sm:$0xff]   ;;  %v48_v37 = vpack.c.bf16 %v3241_v34, %v3236_v33  ;;  %v2943_v38 = vld [vmem:[%s4283_s4] ss:$16 sps:$4 sm:$0xff]   ;;  %v2946_v39 = vld [vmem:[%s4283_s4 + $0x8] ss:$16 sps:$4 sm:$0xff]  }
   0xe   :  { %v2951_v40 = vld [vmem:[%s4283_s4 + $0x24] ss:$16 sps:$4 sm:$0xff]   ;;  %v2954_v41 = vld [vmem:[%s4283_s4 + $0x2c] ss:$16 sps:$4 sm:$0xff]   ;;  %v2949_v42 = vld [vmem:[%s4283_s4 + $0x20] ss:$16 sps:$4 sm:$0xff]  }
   0xf   :  { %248 = vmatpush1.bf16.msra.mxu0 %v2915_v15  ;;  %v2952_v43 = vld [vmem:[%s4283_s4 + $0x28] ss:$16 sps:$4 sm:$0xff]   ;;  %v2957_v44 = vld [vmem:[%s4283_s4 + $0x44] ss:$16 sps:$4 sm:$0xff]   ;;  %v2960_v45 = vld [vmem:[%s4283_s4 + $0x4c] ss:$16 sps:$4 sm:$0xff]  }
  0x10   :  { %291 = vmatpush1.bf16.msra.mxu1 %v2916_v16  ;;  %249 = vmatprep.subr.bf16.mxu0 %v2917_v17  ;;  %v2955_v46 = vld [vmem:[%s4283_s4 + $0x40] ss:$16 sps:$4 sm:$0xff]   ;;  %v2958_v47 = vld [vmem:[%s4283_s4 + $0x48] ss:$16 sps:$4 sm:$0xff]   ;;  %v2963_v48 = vld [vmem:[%s4283_s4 + $0x64] ss:$16 sps:$4 sm:$0xff]  }
  0x11   :  { %292 = vmatprep.subr.bf16.mxu1 %v2919_v18  ;;  %v2966_v49 = vld [vmem:[%s4283_s4 + $0x6c] ss:$16 sps:$4 sm:$0xff]   ;;  %v2961_v50 = vld [vmem:[%s4283_s4 + $0x60] ss:$16 sps:$4 sm:$0xff]   ;;  %v2964_v51 = vld [vmem:[%s4283_s4 + $0x68] ss:$16 sps:$4 sm:$0xff]  }
  0x12   :  { %v2969_v52 = vld [vmem:[%s4283_s4 + $0x84] ss:$16 sps:$4 sm:$0xff]   ;;  %v2972_v53 = vld [vmem:[%s4283_s4 + $0x8c] ss:$16 sps:$4 sm:$0xff]   ;;  %v2967_v54 = vld [vmem:[%s4283_s4 + $0x80] ss:$16 sps:$4 sm:$0xff]  }
  0x13   :  { %250 = vmatpush1.bf16.msra.mxu0 %v2921_v19  ;;  %v2970_v55 = vld [vmem:[%s4283_s4 + $0x88] ss:$16 sps:$4 sm:$0xff]   ;;  %v2975_v56 = vld [vmem:[%s4283_s4 + $0xa4] ss:$16 sps:$4 sm:$0xff]   ;;  %v2978_v57 = vld [vmem:[%s4283_s4 + $0xac] ss:$16 sps:$4 sm:$0xff]  }
  0x14   :  { %293 = vmatpush1.bf16.msra.mxu1 %v2922_v20  ;;  %251 = vmatprep.subr.bf16.mxu0 %v2923_v21  ;;  %v2973_v58 = vld [vmem:[%s4283_s4 + $0xa0] ss:$16 sps:$4 sm:$0xff]   ;;  %v2976_v59 = vld [vmem:[%s4283_s4 + $0xa8] ss:$16 sps:$4 sm:$0xff]   ;;  %v2981_v60 = vld [vmem:[%s4283_s4 + $0xc4] ss:$16 sps:$4 sm:$0xff]  }
  0x15   :  { %294 = vmatprep.subr.bf16.mxu1 %v2925_v22  ;;  %v2984_v61 = vld [vmem:[%s4283_s4 + $0xcc] ss:$16 sps:$4 sm:$0xff]   ;;  %v2979_v62 = vld [vmem:[%s4283_s4 + $0xc0] ss:$16 sps:$4 sm:$0xff]   ;;  %v2982_v63 = vld [vmem:[%s4283_s4 + $0xc8] ss:$16 sps:$4 sm:$0xff]  }
  0x16   :  { %v2987_v0 = vld [vmem:[%s4283_s4 + $0xe4] ss:$16 sps:$4 sm:$0xff]   ;;  %v2990_v2 = vld [vmem:[%s4283_s4 + $0xec] ss:$16 sps:$4 sm:$0xff]   ;;  %v2985_v3 = vld [vmem:[%s4283_s4 + $0xe0] ss:$16 sps:$4 sm:$0xff]  }
  0x17   :  { %252 = vmatpush1.bf16.msra.mxu0 %v2927_v23  ;;  %v2988_v4 = vld [vmem:[%s4283_s4 + $0xe8] ss:$16 sps:$4 sm:$0xff]   ;;  %v3346_v5 = vld [vmem:[%s4286_s1] sm:$0xff]  ;;  %v2996_v8 = vld [vmem:[%s4285_s2 + $0xc] ss:$16 sps:$4 sm:$0xff]  }
  0x18   :  { %295 = vmatpush1.bf16.msra.mxu1 %v2928_v24  ;;  %253 = vmatprep.subr.bf16.mxu0 %v2929_v25  ;;  %v3351_v6 = vld [vmem:[%s4286_s1 + $0x8] sm:$0xff]  ;;  %v2993_v7 = vld [vmem:[%s4285_s2 + $0x4] ss:$16 sps:$4 sm:$0xff]   ;;  %v2991_v10 = vld [vmem:[%s4285_s2] ss:$16 sps:$4 sm:$0xff]  }
  0x19   :  { %296 = vmatprep.subr.bf16.mxu1 %v2931_v26  ;;  %v327_v9 = vpack.c.bf16 %v3351_v6, %v3346_v5  ;;  %v2994_v11 = vld [vmem:[%s4285_s2 + $0x8] ss:$16 sps:$4 sm:$0xff]   ;;  %v2999_v12 = vld [vmem:[%s4285_s2 + $0x24] ss:$16 sps:$4 sm:$0xff]   ;;  %v3002_v13 = vld [vmem:[%s4285_s2 + $0x2c] ss:$16 sps:$4 sm:$0xff]  }
  0x1a   :  { %v2997_v14 = vld [vmem:[%s4285_s2 + $0x20] ss:$16 sps:$4 sm:$0xff]   ;;  %v3000_v15 = vld [vmem:[%s4285_s2 + $0x28] ss:$16 sps:$4 sm:$0xff]   ;;  %v3005_v18 = vld [vmem:[%s4285_s2 + $0x44] ss:$16 sps:$4 sm:$0xff]  }
  0x1b   :  { %254 = vmatpush1.bf16.msra.mxu0 %v2933_v27  ;;  %v3382_v16 = vld [vmem:[%s4286_s1 + $0x10] sm:$0xff]  ;;  %v3387_v17 = vld [vmem:[%s4286_s1 + $0x18] sm:$0xff]  ;;  %v3420_v27 = vld [vmem:[%s4286_s1 + $0x20] sm:$0xff] }
  0x1c   :  { %297 = vmatpush1.bf16.msra.mxu1 %v2934_v28  ;;  %255 = vmatprep.subr.bf16.mxu0 %v2935_v29  ;;  %v3008_v19 = vld [vmem:[%s4285_s2 + $0x4c] ss:$16 sps:$4 sm:$0xff]   ;;  %v328_v20 = vpack.c.bf16 %v3387_v17, %v3382_v16  ;;  %v3003_v21 = vld [vmem:[%s4285_s2 + $0x40] ss:$16 sps:$4 sm:$0xff]   ;;  %v3006_v22 = vld [vmem:[%s4285_s2 + $0x48] ss:$16 sps:$4 sm:$0xff]  }
  0x1d   :  { %298 = vmatprep.subr.bf16.mxu1 %v2937_v30  ;;  %v3011_v23 = vld [vmem:[%s4285_s2 + $0x64] ss:$16 sps:$4 sm:$0xff]   ;;  %v3014_v24 = vld [vmem:[%s4285_s2 + $0x6c] ss:$16 sps:$4 sm:$0xff]   ;;  %v3009_v25 = vld [vmem:[%s4285_s2 + $0x60] ss:$16 sps:$4 sm:$0xff]  }
  0x1e   :  { %v3012_v26 = vld [vmem:[%s4285_s2 + $0x68] ss:$16 sps:$4 sm:$0xff]   ;;  %v3017_v29 = vld [vmem:[%s4285_s2 + $0x84] ss:$16 sps:$4 sm:$0xff]   ;;  %v3020_v30 = vld [vmem:[%s4285_s2 + $0x8c] ss:$16 sps:$4 sm:$0xff]  }
  0x1f   :  { %256 = vmatpush1.bf16.msra.mxu0 %v2939_v31  ;;  %v3425_v28 = vld [vmem:[%s4286_s1 + $0x28] sm:$0xff] }
  0x20   :  { %299 = vmatpush1.bf16.msra.mxu1 %v2940_v32  ;;  %527 = vmatprep.subr.bf16.mxu0 %v2945_v35  ;;  %v329_v31 = vpack.c.bf16 %v3425_v28, %v3420_v27  ;;  %v3015_v32 = vld [vmem:[%s4285_s2 + $0x80] ss:$16 sps:$4 sm:$0xff]   ;;  %v3018_v35 = vld [vmem:[%s4285_s2 + $0x88] ss:$16 sps:$4 sm:$0xff]  }
  0x21   :  { %640 = vmatprep.subr.bf16.mxu1 %v2948_v36  ;;  %v3023_v36 = vld [vmem:[%s4285_s2 + $0xa4] ss:$16 sps:$4 sm:$0xff]  }
  0x22   :  { %274 = vmatmul.mubr.bf16.vlgmr.msra.gmra.mrb[0].mxu0 %v48_v37 }
  0x23   :  { %317 = vmatmul.mubr.bf16.vlgmr.msra.gmra.mrb[0].mxu1 %v48_v37  ;;  %528 = vmatpush1.bf16.msra.mxu0 %v2943_v38  ;;  %v3026_v37 = vld [vmem:[%s4285_s2 + $0xac] ss:$16 sps:$4 sm:$0xff]   ;;  %v3021_v38 = vld [vmem:[%s4285_s2 + $0xa0] ss:$16 sps:$4 sm:$0xff]  }
  0x24   :  { %641 = vmatpush1.bf16.msra.mxu1 %v2946_v39  ;;  %529 = vmatprep.subr.bf16.mxu0 %v2951_v40  ;;  %v3024_v39 = vld [vmem:[%s4285_s2 + $0xa8] ss:$16 sps:$4 sm:$0xff]   ;;  %v3458_v40 = vld [vmem:[%s4286_s1 + $0x30] sm:$0xff] }
  0x25   :  { %642 = vmatprep.subr.bf16.mxu1 %v2954_v41  ;;  %559 = vmatprep.mubr.bf16.mxu0 %v3087_v1  ;;  %v3463_v41 = vld [vmem:[%s4286_s1 + $0x38] sm:$0xff] }
  0x26   :  { %672 = vmatprep.mubr.bf16.mxu1 %v3087_v1 }
  0x27   :  { %530 = vmatpush1.bf16.msra.mxu0 %v2949_v42  ;;  %v3029_v42 = vld [vmem:[%s4285_s2 + $0xc4] ss:$16 sps:$4 sm:$0xff]  }
  0x28   :  { %643 = vmatpush1.bf16.msra.mxu1 %v2952_v43  ;;  %531 = vmatprep.subr.bf16.mxu0 %v2957_v44  ;;  %v3032_v43 = vld [vmem:[%s4285_s2 + $0xcc] ss:$16 sps:$4 sm:$0xff]   ;;  %v330_v44 = vpack.c.bf16 %v3463_v41, %v3458_v40 }
  0x29   :  { %644 = vmatprep.subr.bf16.mxu1 %v2960_v45  ;;  %v3027_v45 = vld [vmem:[%s4285_s2 + $0xc0] ss:$16 sps:$4 sm:$0xff]  }
  0x2b   :  { %532 = vmatpush1.bf16.msra.mxu0 %v2955_v46  ;;  %v3030_v46 = vld [vmem:[%s4285_s2 + $0xc8] ss:$16 sps:$4 sm:$0xff]  }
  0x2c   :  { %645 = vmatpush1.bf16.msra.mxu1 %v2958_v47  ;;  %533 = vmatprep.subr.bf16.mxu0 %v2963_v48  ;;  %v3035_v47 = vld [vmem:[%s4285_s2 + $0xe4] ss:$16 sps:$4 sm:$0xff]   ;;  %v3038_v48 = vld [vmem:[%s4285_s2 + $0xec] ss:$16 sps:$4 sm:$0xff]  }
  0x2d   :  { %646 = vmatprep.subr.bf16.mxu1 %v2966_v49  ;;  %v3088_v49 = vmov 1966171168  }
  0x2f   :  { %534 = vmatpush1.bf16.msra.mxu0 %v2961_v50  ;;  %v757_v50 = vunpack.c.l.s4 %v3088_v49  ;;  %v3077_v49 = vld [vmem:[%s4285_s2 + $0x1c4] ss:$16 sps:$4 sm:$0xff]  }
  0x30   :  { %647 = vmatpush1.bf16.msra.mxu1 %v2964_v51  ;;  %535 = vmatprep.subr.bf16.mxu0 %v2969_v52  ;;  %v759_v51 = vlaneseq  ;;  %v3033_v52 = vld [vmem:[%s4285_s2 + $0xe0] ss:$16 sps:$4 sm:$0xff]  }
  0x31   :  { %648 = vmatprep.subr.bf16.mxu1 %v2972_v53  ;;  %v3036_v53 = vld [vmem:[%s4285_s2 + $0xe8] ss:$16 sps:$4 sm:$0xff]  }
  0x33   :  { %536 = vmatpush1.bf16.msra.mxu0 %v2967_v54  ;;  %v3496_v54 = vld [vmem:[%s4286_s1 + $0x40] sm:$0xff] }
  0x34   :  { %649 = vmatpush1.bf16.msra.mxu1 %v2970_v55  ;;  %537 = vmatprep.subr.bf16.mxu0 %v2975_v56  ;;  %v3501_v55 = vld [vmem:[%s4286_s1 + $0x48] sm:$0xff]  ;;  %v3041_v56 = vld [vmem:[%s4285_s2 + $0x104] ss:$16 sps:$4 sm:$0xff]  }
  0x35   :  { %650 = vmatprep.subr.bf16.mxu1 %v2978_v57  ;;  %v3044_v57 = vld [vmem:[%s4285_s2 + $0x10c] ss:$16 sps:$4 sm:$0xff]  }
  0x37   :  { %538 = vmatpush1.bf16.msra.mxu0 %v2973_v58  ;;  %v758_v58 = vunpack.c.0.s8 %v757_v50  ;;  %v3080_v50 = vld [vmem:[%s4285_s2 + $0x1cc] ss:$16 sps:$4 sm:$0xff]  }
  0x38   :  { %651 = vmatpush1.bf16.msra.mxu1 %v2976_v59  ;;  %539 = vmatprep.subr.bf16.mxu0 %v2981_v60  ;;  %v3509_v59 = vshrl.u32 %v759_v51, 7  ;;  %v331_v60 = vpack.c.bf16 %v3501_v55, %v3496_v54 }
  0x39   :  { %652 = vmatprep.subr.bf16.mxu1 %v2984_v61  ;;  %v3039_v61 = vld [vmem:[%s4285_s2 + $0x100] ss:$16 sps:$4 sm:$0xff]  }
  0x3b   :  { %540 = vmatpush1.bf16.msra.mxu0 %v2979_v62  ;;  %v3042_v62 = vld [vmem:[%s4285_s2 + $0x108] ss:$16 sps:$4 sm:$0xff]  }
  0x3c   :  { %653 = vmatpush1.bf16.msra.mxu1 %v2982_v63  ;;  %541 = vmatprep.subr.bf16.mxu0 %v2987_v0  ;;  %v3047_v63 = vld [vmem:[%s4285_s2 + $0x124] ss:$16 sps:$4 sm:$0xff]   ;;  %v3050_v0 = vld [vmem:[%s4285_s2 + $0x12c] ss:$16 sps:$4 sm:$0xff]  }
  0x3d   :  { %654 = vmatprep.subr.bf16.mxu1 %v2990_v2  ;;  %v3528_v2 = vsub.s32 %v758_v58, %v3509_v59 }
  0x3f   :  { %542 = vmatpush1.bf16.msra.mxu0 %v2985_v3  ;;  %v3045_v3 = vld [vmem:[%s4285_s2 + $0x120] ss:$16 sps:$4 sm:$0xff]  }
  0x40   :  { %655 = vmatpush1.bf16.msra.mxu1 %v2988_v4  ;;  %1477 = vmatprep.subr.bf16.mxu0 %v2993_v7  ;;  %v3048_v4 = vld [vmem:[%s4285_s2 + $0x128] ss:$16 sps:$4 sm:$0xff]   ;;  %v3539_v7 = vld [vmem:[%s4286_s1 + $0x50] sm:$0xff] }
  0x41   :  { %1590 = vmatprep.subr.bf16.mxu1 %v2996_v8  ;;  %v3544_v8 = vld [vmem:[%s4286_s1 + $0x58] sm:$0xff] }
  0x42   :  { %560 = vmatmul.mubr.bf16.vlgmr.msra.gmra.mrb[4].mxu0 %v327_v9 }
  0x43   :  { %673 = vmatmul.mubr.bf16.vlgmr.msra.gmra.mrb[4].mxu1 %v327_v9  ;;  %1478 = vmatpush1.bf16.msra.mxu0 %v2991_v10  ;;  %v3053_v9 = vld [vmem:[%s4285_s2 + $0x144] ss:$16 sps:$4 sm:$0xff]   ;;  %v3056_v10 = vld [vmem:[%s4285_s2 + $0x14c] ss:$16 sps:$4 sm:$0xff]  }
  0x44   :  { %1591 = vmatpush1.bf16.msra.mxu1 %v2994_v11  ;;  %1479 = vmatprep.subr.bf16.mxu0 %v2999_v12  ;;  %v762_v11 = vrot.slane %v3236_v33, %v3528_v2  ;;  %v332_v12 = vpack.c.bf16 %v3544_v8, %v3539_v7 }
  0x45   :  { %1592 = vmatprep.subr.bf16.mxu1 %v3002_v13  ;;  %569 = vmatprep.mubr.bf16.mxu0 %v3087_v1  ;;  %v3051_v13 = vld [vmem:[%s4285_s2 + $0x140] ss:$16 sps:$4 sm:$0xff]  }
  0x46   :  { %682 = vmatprep.mubr.bf16.mxu1 %v3087_v1 }
  0x47   :  { %1480 = vmatpush1.bf16.msra.mxu0 %v2997_v14  ;;  %v3054_v14 = vld [vmem:[%s4285_s2 + $0x148] ss:$16 sps:$4 sm:$0xff]  }
  0x48   :  { %1593 = vmatpush1.bf16.msra.mxu1 %v3000_v15  ;;  %1481 = vmatprep.subr.bf16.mxu0 %v3005_v18  ;;  %v3059_v15 = vld [vmem:[%s4285_s2 + $0x164] ss:$16 sps:$4 sm:$0xff]   ;;  %v3062_v18 = vld [vmem:[%s4285_s2 + $0x16c] ss:$16 sps:$4 sm:$0xff]  }
  0x49   :  { %1594 = vmatprep.subr.bf16.mxu1 %v3008_v19  ;;  %v770_v19 = vcombine.high %v762_v11, %v762_v11 }
  0x4a   :  { %570 = vmatmul.mubr.bf16.gmra.mrb[8].mxu0 %v328_v20 }
  0x4b   :  { %683 = vmatmul.mubr.bf16.gmra.mrb[8].mxu1 %v328_v20  ;;  %1482 = vmatpush1.bf16.msra.mxu0 %v3003_v21  ;;  %v3057_v20 = vld [vmem:[%s4285_s2 + $0x160] ss:$16 sps:$4 sm:$0xff]   ;;  %v3060_v21 = vld [vmem:[%s4285_s2 + $0x168] ss:$16 sps:$4 sm:$0xff]  }
  0x4c   :  { %1595 = vmatpush1.bf16.msra.mxu1 %v3006_v22  ;;  %1483 = vmatprep.subr.bf16.mxu0 %v3011_v23  ;;  %v3579_v22 = vld [vmem:[%s4286_s1 + $0x60] sm:$0xff]  ;;  %v3584_v23 = vld [vmem:[%s4286_s1 + $0x68] sm:$0xff] }
  0x4d   :  { %1596 = vmatprep.subr.bf16.mxu1 %v3014_v24  ;;  %579 = vmatprep.mubr.bf16.mxu0 %v3087_v1  ;;  %v3065_v24 = vld [vmem:[%s4285_s2 + $0x184] ss:$16 sps:$4 sm:$0xff]  }
  0x4e   :  { %692 = vmatprep.mubr.bf16.mxu1 %v3087_v1 }
  0x4f   :  { %1484 = vmatpush1.bf16.msra.mxu0 %v3009_v25  ;;  %v3068_v25 = vld [vmem:[%s4285_s2 + $0x18c] ss:$16 sps:$4 sm:$0xff]  }
  0x50   :  { %1597 = vmatpush1.bf16.msra.mxu1 %v3012_v26  ;;  %1485 = vmatprep.subr.bf16.mxu0 %v3017_v29  ;;  %v778_v26 = vrot.slane %v762_v11, %v3528_v2  ;;  %v792_v29 = vrot.slane %v770_v19, %v3528_v2 }
  0x51   :  { %1598 = vmatprep.subr.bf16.mxu1 %v3020_v30  ;;  %v3597_v30 = vsub.s32 0, %v3509_v59 }
  0x52   :  { %580 = vmatmul.mubr.bf16.gmra.mrb[12].mxu0 %v329_v31 }
  0x53   :  { %693 = vmatmul.mubr.bf16.gmra.mrb[12].mxu1 %v329_v31  ;;  %1486 = vmatpush1.bf16.msra.mxu0 %v3015_v32  ;;  %v333_v31 = vpack.c.bf16 %v3584_v23, %v3579_v22  ;;  %v755_v32 = vcombine.high %v3236_v33, %v3236_v33  ;;  %v3074_v33 = vld [vmem:[%s4285_s2 + $0x1ac] ss:$16 sps:$4 sm:$0xff]  }
  0x54   :  { %1599 = vmatpush1.bf16.msra.mxu1 %v3018_v35  ;;  %1487 = vmatprep.subr.bf16.mxu0 %v3023_v36  ;;  %v3063_v35 = vld [vmem:[%s4285_s2 + $0x180] ss:$16 sps:$4 sm:$0xff]   ;;  %v3066_v36 = vld [vmem:[%s4285_s2 + $0x188] ss:$16 sps:$4 sm:$0xff]  }
  0x55   :  { %1600 = vmatprep.subr.bf16.mxu1 %v3026_v37  ;;  %589 = vmatprep.mubr.bf16.mxu0 %v3087_v1  ;;  %v3071_v37 = vld [vmem:[%s4285_s2 + $0x1a4] ss:$16 sps:$4 sm:$0xff]  }
  0x56   :  { %702 = vmatprep.mubr.bf16.mxu1 %v3087_v1 }
  0x57   :  { %1488 = vmatpush1.bf16.msra.mxu0 %v3021_v38  ;;  %v856_v38 = vrot.slane %v778_v26, %v3597_v30 }
  0x58   :  { %1601 = vmatpush1.bf16.msra.mxu1 %v3024_v39  ;;  %1489 = vmatprep.subr.bf16.mxu0 %v3029_v42  ;;  %v860_v39 = vrot.slane %v792_v29, %v3597_v30  ;;  %v3069_v42 = vld [vmem:[%s4285_s2 + $0x1a0] ss:$16 sps:$4 sm:$0xff]  }
  0x59   :  { %1602 = vmatprep.subr.bf16.mxu1 %v3032_v43  ;;  %v769_v43 = vrot.slane %v755_v32, %v3528_v2  ;;  %v965_v51 = vsub.f32 %v856_v38, %v3346_v5 }
  0x5a   :  { %590 = vmatmul.mubr.bf16.gmra.mrb[16].mxu0 %v330_v44 }
  0x5b   :  { %703 = vmatmul.mubr.bf16.gmra.mrb[16].mxu1 %v330_v44  ;;  %1490 = vmatpush1.bf16.msra.mxu0 %v3027_v45  ;;  %v3072_v44 = vld [vmem:[%s4285_s2 + $0x1a8] ss:$16 sps:$4 sm:$0xff]   ;;  %v3627_v45 = vld [vmem:[%s4286_s1 + $0x70] sm:$0xff] }
  0x5c   :  { %1603 = vmatpush1.bf16.msra.mxu1 %v3030_v46  ;;  %1491 = vmatprep.subr.bf16.mxu0 %v3035_v47  ;;  %v3632_v46 = vld [vmem:[%s4286_s1 + $0x78] sm:$0xff]  ;;  %v800_v47 = vcombine.high %v778_v26, %v778_v26 }
  0x5d   :  { %1604 = vmatprep.subr.bf16.mxu1 %v3038_v48  ;;  %599 = vmatprep.mubr.bf16.mxu0 %v3087_v1  ;;  %v802_v48 = vcombine.high %v792_v29, %v792_v29 }
  0x5e   :  { %712 = vmatprep.mubr.bf16.mxu1 %v3087_v1  ;;  %v864_v58 = vrot.slane %v800_v47, %v3597_v30 }
  0x5f   :  { %1492 = vmatpush1.bf16.msra.mxu0 %v3033_v52  ;;  %v966_v52 = vsub.f32 %v860_v39, %v3351_v6 }
  0x60   :  { %1605 = vmatpush1.bf16.msra.mxu1 %v3036_v53  ;;  %1493 = vmatprep.subr.bf16.mxu0 %v3041_v56  ;;  %v334_v53 = vpack.c.bf16 %v3632_v46, %v3627_v45  ;;  %v3075_v56 = vld [vmem:[%s4285_s2 + $0x1c0] ss:$16 sps:$4 sm:$0xff]   ;;  %v967_v11 = vsub.f32 %v864_v58, %v3382_v16  ;;  %v935_v19 = vmul.f32 %v864_v58, %v3382_v16 }
  0x61   :  { %1606 = vmatprep.subr.bf16.mxu1 %v3044_v57  ;;  %v3078_v57 = vld [vmem:[%s4285_s2 + $0x1c8] ss:$16 sps:$4 sm:$0xff]  }
  0x62   :  { %600 = vmatmul.mubr.bf16.gmra.mrb[20].mxu0 %v331_v60 }
  0x63   :  { %713 = vmatmul.mubr.bf16.gmra.mrb[20].mxu1 %v331_v60  ;;  %1494 = vmatpush1.bf16.msra.mxu0 %v3039_v61  ;;  %v771_v60 = vcombine.high %v769_v43, %v769_v43  ;;  %v3083_v61 = vld [vmem:[%s4285_s2 + $0x1e4] ss:$16 sps:$4 sm:$0xff]  }
  0x64   :  { %1607 = vmatpush1.bf16.msra.mxu1 %v3042_v62  ;;  %1495 = vmatprep.subr.bf16.mxu0 %v3047_v63  ;;  %v3086_v62 = vld [vmem:[%s4285_s2 + $0x1ec] ss:$16 sps:$4 sm:$0xff]   ;;  %v2745_v63 = vpack.c.bf16 %v966_v52, %v965_v51 }
  0x65   :  { %1608 = vmatprep.subr.bf16.mxu1 %v3050_v0  ;;  %609 = vmatprep.mubr.bf16.mxu0 %v3087_v1  ;;  %v933_v0 = vmul.f32 %v856_v38, %v3346_v5  ;;  %v799_v5 = vrot.slane %v771_v60, %v3528_v2 }
  0x66   :  { %722 = vmatprep.mubr.bf16.mxu1 %v3087_v1 }
  0x67   :  { %1496 = vmatpush1.bf16.msra.mxu0 %v3045_v3  ;;  %v934_v3 = vmul.f32 %v860_v39, %v3351_v6  ;;  %v803_v26 = vcombine.high %v799_v5, %v799_v5 }
  0x68   :  { %1609 = vmatpush1.bf16.msra.mxu1 %v3048_v4  ;;  %1497 = vmatprep.subr.bf16.mxu0 %v3053_v9  ;;  %v785_v4 = vrot.slane %v769_v43, %v3528_v2  ;;  %v3081_v9 = vld [vmem:[%s4285_s2 + $0x1e0] ss:$16 sps:$4 sm:$0xff]  }
  0x69   :  { %1610 = vmatprep.subr.bf16.mxu1 %v3056_v10  ;;  %v3084_v10 = vld [vmem:[%s4285_s2 + $0x1e8] ss:$16 sps:$4 sm:$0xff]   ;;  %v2744_v6 = vpack.c.bf16 %v934_v3, %v933_v0 }
  0x6a   :  { %610 = vmatmul.mubr.bf16.gmra.mrb[24].mxu0 %v332_v12 }
  0x6b   :  { %723 = vmatmul.mubr.bf16.gmra.mrb[24].mxu1 %v332_v12  ;;  %1498 = vmatpush1.bf16.msra.mxu0 %v3051_v13 }
  0x6c   :  { %1611 = vmatpush1.bf16.msra.mxu1 %v3054_v14  ;;  %1499 = vmatprep.subr.bf16.mxu0 %v3059_v15  ;;  %v872_v14 = vrot.slane %v785_v4, %v3597_v30  ;;  %v876_v15 = vrot.slane %v799_v5, %v3597_v30 }
  0x6d   :  { %1612 = vmatprep.subr.bf16.mxu1 %v3062_v18  ;;  %619 = vmatprep.mubr.bf16.mxu0 %v3087_v1  ;;  %v811_v18 = vrot.slane %v3241_v34, %v3528_v2 }
  0x6e   :  { %732 = vmatprep.mubr.bf16.mxu1 %v3087_v1  ;;  %v937_v16 = vmul.f32 %v872_v14, %v3420_v27 }
  0x6f   :  { %1500 = vmatpush1.bf16.msra.mxu0 %v3057_v20 }
  0x70   :  { %1613 = vmatpush1.bf16.msra.mxu1 %v3060_v21  ;;  %1501 = vmatprep.subr.bf16.mxu0 %v3065_v24  ;;  %v801_v21 = vcombine.high %v785_v4, %v785_v4  ;;  %v969_v24 = vsub.f32 %v872_v14, %v3420_v27 }
  0x71   :  { %1614 = vmatprep.subr.bf16.mxu1 %v3068_v25  ;;  %v970_v25 = vsub.f32 %v876_v15, %v3425_v28 }
  0x72   :  { %620 = vmatmul.mubr.bf16.gmra.mrb[28].mxu0 %v333_v31 }
  0x73   :  { %733 = vmatmul.mubr.bf16.gmra.mrb[28].mxu1 %v333_v31  ;;  %1502 = vmatpush1.bf16.msra.mxu0 %v3063_v35  ;;  %v819_v31 = vcombine.high %v811_v18, %v811_v18  ;;  %v2749_v32 = vpack.c.bf16 %v970_v25, %v969_v24  ;;  %v880_v35 = vrot.slane %v801_v21, %v3597_v30 }
  0x74   :  { %1615 = vmatpush1.bf16.msra.mxu1 %v3066_v36  ;;  %1503 = vmatprep.subr.bf16.mxu0 %v3071_v37  ;;  %v884_v36 = vrot.slane %v803_v26, %v3597_v30  ;;  %v827_v37 = vrot.slane %v811_v18, %v3528_v2 }
  0x75   :  { %1616 = vmatprep.subr.bf16.mxu1 %v3074_v33  ;;  %629 = vmatprep.mubr.bf16.mxu0 %v3087_v1  ;;  %v971_v33 = vsub.f32 %v880_v35, %v3458_v40  ;;  %v841_v39 = vrot.slane %v819_v31, %v3528_v2 }
  0x76   :  { %742 = vmatprep.mubr.bf16.mxu1 %v3087_v1  ;;  %v868_v1 = vrot.slane %v802_v48, %v3597_v30  ;;  %v972_v38 = vsub.f32 %v884_v36, %v3463_v41  ;;  %v888_v47 = vrot.slane %v827_v37, %v3597_v30  ;;  %v939_v48 = vmul.f32 %v880_v35, %v3458_v40 }
  0x77   :  { %1504 = vmatpush1.bf16.msra.mxu0 %v3069_v42  ;;  %v804_v42 = vcombine.high %v3241_v34, %v3241_v34  ;;  %v892_v27 = vrot.slane %v841_v39, %v3597_v30  ;;  %v851_v52 = vcombine.high %v841_v39, %v841_v39 }
  0x78   :  { %1617 = vmatpush1.bf16.msra.mxu1 %v3072_v44  ;;  %1505 = vmatprep.subr.bf16.mxu0 %v3077_v49  ;;  %v968_v12 = vsub.f32 %v868_v1, %v3387_v17  ;;  %v936_v20 = vmul.f32 %v868_v1, %v3387_v17  ;;  %v938_v17 = vmul.f32 %v876_v15, %v3425_v28 }
  0x79   :  { %1618 = vmatprep.subr.bf16.mxu1 %v3080_v50  ;;  %v2751_v44 = vpack.c.bf16 %v972_v38, %v971_v33  ;;  %v818_v28 = vrot.slane %v804_v42, %v3528_v2  ;;  %v940_v49 = vmul.f32 %v884_v36, %v3463_v41  ;;  %v849_v50 = vcombine.high %v827_v37, %v827_v37 }
  0x7a   :  { %630 = vmatmul.mubr.bf16.gmra.mrb[32].mxu0 %v334_v53  ;;  %v2747_v13 = vpack.c.bf16 %v968_v12, %v967_v11  ;;  %v2746_v29 = vpack.c.bf16 %v936_v20, %v935_v19  ;;  %v2748_v43 = vpack.c.bf16 %v938_v17, %v937_v16  ;;  %v973_v51 = vsub.f32 %v888_v47, %v3496_v54 }
  0x7b   :  { %743 = vmatmul.mubr.bf16.gmra.mrb[32].mxu1 %v334_v53  ;;  %1506 = vmatpush1.bf16.msra.mxu0 %v3075_v56  ;;  %v974_v34 = vsub.f32 %v892_v27, %v3501_v55  ;;  %v2750_v53 = vpack.c.bf16 %v940_v49, %v939_v48  ;;  %v900_v58 = vrot.slane %v851_v52, %v3597_v30 }
  0x7c   :  { %1619 = vmatpush1.bf16.msra.mxu1 %v3078_v57  ;;  %1507 = vmatprep.subr.bf16.mxu0 %v3083_v61  ;;  %v896_v57 = vrot.slane %v849_v50, %v3597_v30  ;;  %v820_v1 = vcombine.high %v818_v28, %v818_v28  ;;  %v941_v40 = vmul.f32 %v888_v47, %v3496_v54 }
  0x7d   :  { %1620 = vmatprep.subr.bf16.mxu1 %v3086_v62  ;;  %1509 = vmatprep.mubr.bf16.mxu0 %v2745_v63  ;;  %v2753_v56 = vpack.c.bf16 %v974_v34, %v973_v51  ;;  %v942_v41 = vmul.f32 %v892_v27, %v3501_v55  ;;  %v834_v60 = vrot.slane %v818_v28, %v3528_v2 }
  0x7e   :  { %1622 = vmatprep.mubr.bf16.mxu1 %v2745_v63  ;;  %v975_v61 = vsub.f32 %v896_v57, %v3539_v7  ;;  %v976_v62 = vsub.f32 %v900_v58, %v3544_v8  ;;  %v848_v63 = vrot.slane %v820_v1, %v3528_v2  ;;  %v943_v54 = vmul.f32 %v896_v57, %v3539_v7 }
  0x7f   :  { %1508 = vmatpush1.bf16.msra.mxu0 %v3081_v9  ;;  %v2752_v0 = vpack.c.bf16 %v942_v41, %v941_v40  ;;  %v904_v4 = vrot.slane %v834_v60, %v3597_v30  ;;  %v944_v55 = vmul.f32 %v900_v58, %v3544_v8 }
  0x80   :  { %1621 = vmatpush1.bf16.msra.mxu1 %v3084_v10  ;;  %v2755_v3 = vpack.c.bf16 %v976_v62, %v975_v61  ;;  %v908_v9 = vrot.slane %v848_v63, %v3597_v30  ;;  %v850_v10 = vcombine.high %v834_v60, %v834_v60  ;;  %v852_v5 = vcombine.high %v848_v63, %v848_v63 }
  0x81   :  { %v977_v11 = vsub.f32 %v904_v4, %v3579_v22  ;;  %v945_v7 = vmul.f32 %v904_v4, %v3579_v22  ;;  %v3734_v60 = vsub.s32 2, %v3509_v59  ;;  %v2448_v4 = vld [vmem:[%s4287_s6 + $0x18] sm:$0xff] }
  0x82   :  { %1510 = vmatmul.mubr.bf16.vlgmr.msra.gmra.mrb[4].mxu0 %v2744_v6  ;;  %v978_v12 = vsub.f32 %v908_v9, %v3584_v23  ;;  %v912_v14 = vrot.slane %v850_v10, %v3597_v30  ;;  %v916_v15 = vrot.slane %v852_v5, %v3597_v30  ;;  %v946_v8 = vmul.f32 %v908_v9, %v3584_v23  ;;  %v2449_v9 = vld [vmem:[%s4288_s7] sm:$0xff] }
  0x83   :  { %1623 = vmatmul.mubr.bf16.vlgmr.msra.gmra.mrb[4].mxu1 %v2744_v6  ;;  %1519 = vmatprep.mubr.bf16.mxu0 %v2747_v13  ;;  %v2754_v6 = vpack.c.bf16 %v944_v55, %v943_v54  ;;  %v1703_v54 = vld [vmem:[%s4289_s5] sm:$0xf]  ;;  %v3764_v10 = vsub.s32 1, %v3509_v59 }
  0x84   :  { %1632 = vmatprep.mubr.bf16.mxu1 %v2747_v13  ;;  %v2757_v13 = vpack.c.bf16 %v978_v12, %v977_v11  ;;  %v979_v18 = vsub.f32 %v912_v14, %v3627_v45  ;;  %v980_v19 = vsub.f32 %v916_v15, %v3632_v46  ;;  %v2756_v20 = vpack.c.bf16 %v946_v8, %v945_v7 }
  0x85   :  { %v947_v24 = vmul.f32 %v912_v14, %v3627_v45  ;;  %v948_v25 = vmul.f32 %v916_v15, %v3632_v46  ;;  %2452 = vperm.xlu0 %2892, %v2449_v9   ;;  %v3770_v12 = vsub.s32 3, %v3509_v59  ;;  %v3773_v5 = vrot.slane %v1703_v54, %v3597_v30 }
  0x86   :  { %v2759_v21 = vpack.c.bf16 %v980_v19, %v979_v18  ;;  %v3785_v15 = vrot.slane %v1703_v54, %v3764_v10 }
  0x87   :  { %v2758_v26 = vpack.c.bf16 %v948_v25, %v947_v24  ;;  %v3788_v7 = vrot.slane %v1703_v54, %v3770_v12 }
  0x8a   :  { %1520 = vmatmul.mubr.bf16.gmra.mrb[8].mxu0 %v2746_v29 }
  0x8b   :  { %1633 = vmatmul.mubr.bf16.gmra.mrb[8].mxu1 %v2746_v29  ;;  %1529 = vmatprep.mubr.bf16.mxu0 %v2749_v32 }
  0x8c   :  { %1642 = vmatprep.mubr.bf16.mxu1 %v2749_v32 }
  0x92   :  { %1530 = vmatmul.mubr.bf16.gmra.mrb[12].mxu0 %v2748_v43 }
  0x93   :  { %1643 = vmatmul.mubr.bf16.gmra.mrb[12].mxu1 %v2748_v43  ;;  %1539 = vmatprep.mubr.bf16.mxu0 %v2751_v44 }
  0x94   :  { %1652 = vmatprep.mubr.bf16.mxu1 %v2751_v44 }
  0x9a   :  { %1540 = vmatmul.mubr.bf16.gmra.mrb[16].mxu0 %v2750_v53 }
  0x9b   :  { %1653 = vmatmul.mubr.bf16.gmra.mrb[16].mxu1 %v2750_v53  ;;  %1549 = vmatprep.mubr.bf16.mxu0 %v2753_v56 }
  0x9c   :  { %1662 = vmatprep.mubr.bf16.mxu1 %v2753_v56 }
  0xa2   :  { %1550 = vmatmul.mubr.bf16.gmra.mrb[20].mxu0 %v2752_v0 }
  0xa3   :  { %1663 = vmatmul.mubr.bf16.gmra.mrb[20].mxu1 %v2752_v0  ;;  %1559 = vmatprep.mubr.bf16.mxu0 %v2755_v3 }
  0xa4   :  { %1672 = vmatprep.mubr.bf16.mxu1 %v2755_v3  ;;  %v2446_v3 = vld [vmem:[%s4287_s6 + $0x8] sm:$0xff] }
  0xaa   :  { %1560 = vmatmul.mubr.bf16.gmra.mrb[24].mxu0 %v2754_v6 }
  0xab   :  { %1673 = vmatmul.mubr.bf16.gmra.mrb[24].mxu1 %v2754_v6  ;;  %1569 = vmatprep.mubr.bf16.mxu0 %v2757_v13  ;;  %v3776_v6 = vrot.slane %v1703_v54, %v3734_v60 }
  0xac   :  { %1682 = vmatprep.mubr.bf16.mxu1 %v2757_v13 }
  0xb2   :  { %1570 = vmatmul.mubr.bf16.gmra.mrb[28].mxu0 %v2756_v20 }
  0xb3   :  { %1683 = vmatmul.mubr.bf16.gmra.mrb[28].mxu1 %v2756_v20  ;;  %1579 = vmatprep.mubr.bf16.mxu0 %v2759_v21 }
  0xb4   :  { %1692 = vmatprep.mubr.bf16.mxu1 %v2759_v21 }
  0xba   :  { %1580 = vmatmul.mubr.bf16.gmra.mrb[32].mxu0 %v2758_v26 }
  0xbb   :  { %1693 = vmatmul.mubr.bf16.gmra.mrb[32].mxu1 %v2758_v26  ;;  %2589 = vmatprep.mubr.f32.mxu0 %v2448_v4 }
  0xbc   :  { %2519 = vmatprep.mubr.f32.mxu1 %v2446_v3 }
  0xf5   :  { %v275_v22 = vpop.f32.mrb[0].mxu0 }
  0xf6   :  { %v318_v23 = vpop.f32.mrb[0].mxu1  ;;  %v277_v29 = vpop.f32.mrb[1].mxu0 }
  0xf7   :  { %v320_v31 = vpop.f32.mrb[1].mxu1  ;;  %v1797_v32 = vcombine.low %v275_v22, %v277_v29  ;;  %v1798_v35 = vcombine.high %v275_v22, %v277_v29  ;;  %v279_v17 = vpop.f32.mrb[2].mxu0 }
  0xf8   :  { %v1799_v36 = vcombine.low %v318_v23, %v320_v31  ;;  %v1800_v16 = vcombine.high %v318_v23, %v320_v31  ;;  %v322_v37 = vpop.f32.mrb[2].mxu1  ;;  %v281_v33 = vpop.f32.mrb[3].mxu0 }
  0xf9   :  { %v324_v38 = vpop.f32.mrb[3].mxu1  ;;  %v1807_v45 = vrot.slane %v1797_v32, %v3528_v2  ;;  %v1814_v46 = vrot.slane %v1798_v35, %v3528_v2  ;;  %v1865_v43 = vcombine.low %v279_v17, %v281_v33  ;;  %v1866_v44 = vcombine.high %v279_v17, %v281_v33 }
  0xfa   :  { %v1821_v39 = vrot.slane %v1799_v36, %v3528_v2  ;;  %v1828_v42 = vrot.slane %v1800_v16, %v3528_v2  ;;  %v1867_v47 = vcombine.low %v322_v37, %v324_v38  ;;  %v1868_v27 = vcombine.high %v322_v37, %v324_v38 }
  0xfb   :  { %v1875_v51 = vrot.slane %v1865_v43, %v3528_v2  ;;  %v1882_v34 = vrot.slane %v1866_v44, %v3528_v2 }
  0xfc   :  { %v1829_v28 = vcombine.low %v1807_v45, %v1821_v39  ;;  %v1830_v48 = vcombine.high %v1807_v45, %v1821_v39  ;;  %v1831_v49 = vcombine.low %v1814_v46, %v1828_v42  ;;  %v1832_v50 = vcombine.high %v1814_v46, %v1828_v42 }
  0xfd   :  { %v1889_v52 = vrot.slane %v1867_v47, %v3528_v2  ;;  %v1896_v53 = vrot.slane %v1868_v27, %v3528_v2 }
  0xfe   :  { %v3761_v55 = vrot.slane %v1829_v28, %v3528_v2  ;;  %v3767_v11 = vrot.slane %v1830_v48, %v3528_v2  ;;  %v3779_v13 = vrot.slane %v1831_v49, %v3528_v2  ;;  %v3782_v14 = vrot.slane %v1832_v50, %v3528_v2 }
  0xff   :  { %v1897_v56 = vcombine.low %v1875_v51, %v1889_v52  ;;  %v1898_v57 = vcombine.high %v1875_v51, %v1889_v52  ;;  %v1899_v58 = vcombine.low %v1882_v34, %v1896_v53  ;;  %v1900_v1 = vcombine.high %v1882_v34, %v1896_v53 }
 0x100   :  { %v1936_v59 = vrot.slane %v3761_v55, %v3597_v30  ;;  %v1944_v8 = vrot.slane %v3761_v55, %v3734_v60  ;;  %v1940_v18 = vrot.slane %v3761_v55, %v3764_v10  ;;  %v3798_v19 = vcombine.high %v3761_v55, %v3761_v55 }
 0x101   :  { %v3728_v40 = vrot.slane %v1899_v58, %v3528_v2  ;;  %v3731_v41 = vrot.slane %v1900_v1, %v3528_v2  ;;  %v3801_v20 = vrot.slane %v1897_v56, %v3528_v2  ;;  %v3804_v21 = vrot.slane %v1898_v57, %v3528_v2 }
 0x102   :  { %v1948_v24 = vrot.slane %v3761_v55, %v3770_v12  ;;  %v1952_v25 = vrot.slane %v3767_v11, %v3597_v30  ;;  %v1960_v26 = vrot.slane %v3767_v11, %v3734_v60  ;;  %v1956_v22 = vrot.slane %v3767_v11, %v3764_v10 }
 0x103   :  { %v3738_v61 = vcombine.high %v3728_v40, %v3728_v40  ;;  %v3742_v62 = vcombine.high %v3731_v41, %v3731_v41  ;;  %v1964_v23 = vrot.slane %v3767_v11, %v3770_v12  ;;  %v3818_v29 = vcombine.high %v3767_v11, %v3767_v11 }
 0x104   :  { %v2000_v2 = vrot.slane %v3779_v13, %v3597_v30  ;;  %v2008_v31 = vrot.slane %v3779_v13, %v3734_v60  ;;  %v2004_v32 = vrot.slane %v3779_v13, %v3764_v10  ;;  %v2012_v35 = vrot.slane %v3779_v13, %v3770_v12 }
 0x105   :  { %v1968_v36 = vrot.slane %v3798_v19, %v3597_v30  ;;  %v3836_v37 = vcombine.high %v3779_v13, %v3779_v13  ;;  %v1976_v33 = vrot.slane %v3798_v19, %v3734_v60  ;;  %v1972_v38 = vrot.slane %v3798_v19, %v3764_v10 }
 0x106   :  { %v1980_v45 = vrot.slane %v3798_v19, %v3770_v12  ;;  %v3846_v46 = vcombine.high %v3782_v14, %v3782_v14  ;;  %v1984_v39 = vrot.slane %v3818_v29, %v3597_v30  ;;  %v1992_v42 = vrot.slane %v3818_v29, %v3734_v60 }
 0x107   :  { %v1988_v43 = vrot.slane %v3818_v29, %v3764_v10  ;;  %v1996_v44 = vrot.slane %v3818_v29, %v3770_v12  ;;  %v3880_v57 = vcombine.high %v3801_v20, %v3801_v20  ;;  %v3898_v63 = vcombine.high %v3804_v21, %v3804_v21 }
 0x108   :  { %v4294_v13 = vrot.slane %v3782_v14, %v3770_v12 }
 0x155   :  { %v1511_v54 = vpop.f32.mrb[4].mxu0 }
 0x156   :  { %v1624_v48 = vpop.f32.mrb[4].mxu1  ;;  %v1725_v3 = vadd.f32 %v3773_v5, %v1511_v54  ;;  %v1513_v1 = vpop.f32.mrb[5].mxu0 }
 0x157   :  { %v1727_v4 = vadd.f32 %v3776_v6, %v1624_v48  ;;  %v1626_v9 = vpop.f32.mrb[5].mxu1  ;;  %v1726_v28 = vadd.f32 %v3785_v15, %v1513_v1  ;;  %v1515_v34 = vpop.f32.mrb[6].mxu0 }
 0x158   :  { %v1728_v56 = vadd.f32 %v3788_v7, %v1626_v9  ;;  %v1628_v53 = vpop.f32.mrb[6].mxu1  ;;  %v2253_v54 = vadd.f32 %v1936_v59, %v1725_v3  ;;  %v1729_v1 = vadd.f32 %v3773_v5, %v1515_v34  ;;  %v1517_v58 = vpop.f32.mrb[7].mxu0 }
 0x159   :  { %v2255_v0 = vadd.f32 %v1944_v8, %v1727_v4  ;;  %v1731_v9 = vadd.f32 %v3776_v6, %v1628_v53  ;;  %v1630_v52 = vpop.f32.mrb[7].mxu1  ;;  %v3939_v51 = vadd.f32 %v1940_v18, %v1726_v28  ;;  %v1730_v59 = vadd.f32 %v3785_v15, %v1517_v58 }
 0x15a   :  { %v3944_v48 = vadd.f32 %v1948_v24, %v1728_v56  ;;  %v1732_v8 = vadd.f32 %v3788_v7, %v1630_v52  ;;  %v2317_v3 = vmul.f32 0.01, %v2253_v54  ;;  %v2257_v53 = vadd.f32 %v1952_v25, %v1729_v1 }
 0x15b   :  { %v2319_v34 = vmul.f32 0.01, %v2255_v0  ;;  %v2259_v18 = vadd.f32 %v1960_v26, %v1731_v9  ;;  %v2318_v28 = vmul.f32 0.01, %v3939_v51  ;;  %v2258_v55 = vadd.f32 %v1956_v22, %v1730_v59 }
 0x15c   :  { %v2260_v24 = vadd.f32 %v1964_v23, %v1732_v8  ;;  %v2320_v56 = vmul.f32 0.01, %v3944_v48  ;;  %v2321_v25 = vmul.f32 0.01, %v2257_v53  ;;  %v2381_v4 = vmax.f32 %v2253_v54, %v2317_v3 }
 0x15d   :  { %v2323_v58 = vmul.f32 0.01, %v2259_v18  ;;  %v2383_v1 = vmax.f32 %v2255_v0, %v2319_v34  ;;  %v2322_v9 = vmul.f32 0.01, %v2258_v55  ;;  %v1521_v49 = vpop.f32.mrb[8].mxu0 }
 0x15e   :  { %v2324_v50 = vmul.f32 0.01, %v2260_v24  ;;  %v1634_v22 = vpop.f32.mrb[8].mxu1  ;;  %v2385_v59 = vmax.f32 %v2257_v53, %v2321_v25  ;;  %v1733_v11 = vadd.f32 %v3773_v5, %v1521_v49  ;;  %v1523_v8 = vpop.f32.mrb[9].mxu0 }
 0x15f   :  { %v2387_v27 = vmax.f32 %v2259_v18, %v2323_v58  ;;  %v1735_v23 = vadd.f32 %v3776_v6, %v1634_v22  ;;  %v1636_v52 = vpop.f32.mrb[9].mxu1  ;;  %v2386_v47 = vmax.f32 %v2258_v55, %v2322_v9  ;;  %v1734_v16 = vadd.f32 %v3785_v15, %v1523_v8  ;;  %v1525_v54 = vpop.f32.mrb[10].mxu0 }
 0x160   :  { %v2388_v17 = vmax.f32 %v2260_v24, %v2324_v50  ;;  %v1736_v26 = vadd.f32 %v3788_v7, %v1636_v52  ;;  %v1638_v0 = vpop.f32.mrb[10].mxu1  ;;  %v2762_v3 = vpack.c.bf16 %v2385_v59, %v2381_v4  ;;  %v2261_v53 = vadd.f32 %v1968_v36, %v1733_v11  ;;  %v1527_v18 = vpop.f32.mrb[11].mxu0 }
 0x161   :  { %v2794_v34 = vpack.c.bf16 %v2387_v27, %v2383_v1  ;;  %v2263_v49 = vadd.f32 %v1976_v33, %v1735_v23  ;;  %v1640_v25 = vpop.f32.mrb[11].mxu1  ;;  %v3979_v50 = vadd.f32 %v1972_v38, %v1734_v16  ;;  %v1737_v27 = vadd.f32 %v3773_v5, %v1525_v54 }
 0x162   :  { %v3984_v55 = vadd.f32 %v1980_v45, %v1736_v26  ;;  %v1739_v36 = vadd.f32 %v3776_v6, %v1638_v0  ;;  %v2325_v24 = vmul.f32 0.01, %v2261_v53  ;;  %v1738_v33 = vadd.f32 %v3785_v15, %v1527_v18 }
 0x163   :  { %v2327_v52 = vmul.f32 0.01, %v2263_v49  ;;  %v1740_v58 = vadd.f32 %v3788_v7, %v1640_v25  ;;  %v2265_v16 = vadd.f32 %v1984_v39, %v1737_v27  ;;  %v2148_v38 = vrot.slane %v3731_v41, %v3764_v10 }
 0x164   :  { %v2267_v19 = vadd.f32 %v1992_v42, %v1739_v36  ;;  %v2156_v45 = vrot.slane %v3731_v41, %v3770_v12  ;;  %v2382_v26 = vmax.f32 %v3939_v51, %v2318_v28  ;;  %v2384_v4 = vmax.f32 %v3944_v48, %v2320_v56 }
 0x165   :  { %v2266_v1 = vadd.f32 %v1988_v43, %v1738_v33  ;;  %v4008_v39 = vadd.f32 %v1996_v44, %v1740_v58  ;;  %v2389_v42 = vmax.f32 %v2261_v53, %v2325_v24  ;;  %v2329_v9 = vmul.f32 0.01, %v2265_v16  ;;  %v1531_v59 = vpop.f32.mrb[12].mxu0 }
 0x166   :  { %v2331_v22 = vmul.f32 0.01, %v2267_v19  ;;  %v1644_v11 = vpop.f32.mrb[12].mxu1  ;;  %v2160_v23 = vrot.slane %v3738_v61, %v3597_v30  ;;  %v2391_v51 = vmax.f32 %v2263_v49, %v2327_v52  ;;  %v2760_v48 = vpack.c.bf16 %v2386_v47, %v2382_v26  ;;  %v1533_v8 = vpop.f32.mrb[13].mxu0 }
 0x167   :  { %v2330_v28 = vmul.f32 0.01, %v2266_v1  ;;  %v2792_v56 = vpack.c.bf16 %v2388_v17, %v2384_v4  ;;  %v1646_v54 = vpop.f32.mrb[13].mxu1  ;;  %v2393_v43 = vmax.f32 %v2265_v16, %v2329_v9  ;;  %v1741_v29 = vadd.f32 %v3773_v5, %v1531_v59  ;;  %v1535_v53 = vpop.f32.mrb[14].mxu0 }
 0x168   :  { %v2395_v0 = vmax.f32 %v2267_v19, %v2331_v22  ;;  %v1743_v44 = vadd.f32 %v3776_v6, %v1644_v11  ;;  %v1648_v18 = vpop.f32.mrb[14].mxu1  ;;  %v2326_v25 = vmul.f32 0.01, %v3979_v50  ;;  %v2332_v36 = vmul.f32 0.01, %v4008_v39  ;;  %2761 = vmatprep.subr.bf16.mxu1 %v2760_v48  ;;  %v1537_v17 = vpop.f32.mrb[15].mxu0 }
 0x169   :  { %v2394_v27 = vmax.f32 %v2266_v1, %v2330_v28  ;;  %2793 = vmatprep.subr.bf16.mxu0 %v2792_v56  ;;  %v1742_v47 = vadd.f32 %v3785_v15, %v1533_v8  ;;  %v1650_v49 = vpop.f32.mrb[15].mxu1  ;;  %v2328_v24 = vmul.f32 0.01, %v3984_v55  ;;  %v2766_v52 = vpack.c.bf16 %v2393_v43, %v2389_v42  ;;  %2763 = vmatpush1.bf16.xpose.msra.mxu1 %v2762_v3 }
 0x16a   :  { %v2798_v33 = vpack.c.bf16 %v2395_v0, %v2391_v51  ;;  %2795 = vmatpush1.bf16.xpose.msra.mxu0 %v2794_v34  ;;  %v2269_v58 = vadd.f32 %v2000_v2, %v1741_v29  ;;  %v2271_v16 = vadd.f32 %v2008_v31, %v1743_v44  ;;  %v1744_v26 = vadd.f32 %v3788_v7, %v1646_v54 }
 0x16b   :  { %v4027_v19 = vadd.f32 %v2004_v32, %v1742_v47  ;;  %v1745_v4 = vadd.f32 %v3773_v5, %v1535_v53  ;;  %v1747_v3 = vadd.f32 %v3776_v6, %v1648_v18  ;;  %v1746_v34 = vadd.f32 %v3785_v15, %v1537_v17 }
 0x16c   :  { %v2333_v1 = vmul.f32 0.01, %v2269_v58  ;;  %v1748_v2 = vadd.f32 %v3788_v7, %v1650_v49  ;;  %v2396_v42 = vmax.f32 %v4008_v39, %v2332_v36  ;;  %v2335_v9 = vmul.f32 0.01, %v2271_v16 }
 0x16d   :  { %v4038_v31 = vadd.f32 %v2012_v35, %v1744_v26  ;;  %v4291_v32 = vrot.slane %v3782_v14, %v3597_v30  ;;  %v2390_v59 = vmax.f32 %v3979_v50, %v2326_v25  ;;  %v4292_v11 = vrot.slane %v3782_v14, %v3734_v60  ;;  %v1541_v48 = vpop.f32.mrb[16].mxu0 }
 0x16e   :  { %v4293_v28 = vrot.slane %v3782_v14, %v3764_v10  ;;  %v4055_v35 = vadd.f32 %v4294_v13, %v1748_v2  ;;  %v1654_v56 = vpop.f32.mrb[16].mxu1  ;;  %v2392_v8 = vmax.f32 %v3984_v55, %v2328_v24  ;;  %v2397_v54 = vmax.f32 %v2269_v58, %v2333_v1  ;;  %v1543_v0 = vpop.f32.mrb[17].mxu0 }
 0x16f   :  { %v2273_v22 = vadd.f32 %v4291_v32, %v1745_v4  ;;  %v2275_v51 = vadd.f32 %v4292_v11, %v1747_v3  ;;  %v2334_v50 = vmul.f32 0.01, %v4027_v19  ;;  %v1656_v29 = vpop.f32.mrb[17].mxu1  ;;  %v2764_v25 = vpack.c.bf16 %v2394_v27, %v2390_v59  ;;  %v1545_v49 = vpop.f32.mrb[18].mxu0 }
 0x170   :  { %v4050_v39 = vadd.f32 %v4293_v28, %v1746_v34  ;;  %v2340_v18 = vmul.f32 0.01, %v4055_v35  ;;  %v2399_v36 = vmax.f32 %v2271_v16, %v2335_v9  ;;  %v2796_v47 = vpack.c.bf16 %v2396_v42, %v2392_v8  ;;  %v1658_v26 = vpop.f32.mrb[18].mxu1  ;;  %v1547_v1 = vpop.f32.mrb[19].mxu0 }
 0x171   :  { %v2337_v43 = vmul.f32 0.01, %v2273_v22  ;;  %v2339_v44 = vmul.f32 0.01, %v2275_v51  ;;  %v1749_v17 = vadd.f32 %v3773_v5, %v1541_v48  ;;  %2765 = vmatprep.subr.bf16.mxu1 %v2764_v25  ;;  %v1751_v4 = vadd.f32 %v3776_v6, %v1654_v56  ;;  %v1660_v3 = vpop.f32.mrb[19].mxu1 }
 0x172   :  { %v2338_v53 = vmul.f32 0.01, %v4050_v39  ;;  %v2404_v58 = vmax.f32 %v4055_v35, %v2340_v18  ;;  %v2336_v34 = vmul.f32 0.01, %v4038_v31  ;;  %2797 = vmatprep.subr.bf16.mxu0 %v2796_v47  ;;  %2767 = vmatpush1.bf16.xpose.msra.mxu1 %v2766_v52  ;;  %v4295_v16 = vrot.slane %v3836_v37, %v3597_v30 }
 0x173   :  { %v2401_v14 = vmax.f32 %v2273_v22, %v2337_v43  ;;  %v2403_v55 = vmax.f32 %v2275_v51, %v2339_v44  ;;  %v1750_v42 = vadd.f32 %v3785_v15, %v1543_v0  ;;  %2799 = vmatpush1.bf16.xpose.msra.mxu0 %v2798_v33  ;;  %v4296_v32 = vrot.slane %v3836_v37, %v3734_v60 }
 0x174   :  { %v2402_v24 = vmax.f32 %v4050_v39, %v2338_v53  ;;  %v2277_v2 = vadd.f32 %v4295_v16, %v1749_v17  ;;  %v1752_v59 = vadd.f32 %v3788_v7, %v1656_v29  ;;  %v1753_v11 = vadd.f32 %v3773_v5, %v1545_v49 }
 0x175   :  { %v2770_v27 = vpack.c.bf16 %v2401_v14, %v2397_v54  ;;  %v2802_v9 = vpack.c.bf16 %v2403_v55, %v2399_v36  ;;  %v2279_v22 = vadd.f32 %v4296_v32, %v1751_v4  ;;  %v4297_v52 = vrot.slane %v3836_v37, %v3764_v10  ;;  %v1551_v43 = vpop.f32.mrb[20].mxu0 }
 0x176   :  { %v2341_v51 = vmul.f32 0.01, %v2277_v2  ;;  %v1755_v39 = vadd.f32 %v3776_v6, %v1658_v26  ;;  %v1754_v13 = vadd.f32 %v3785_v15, %v1547_v1  ;;  %v4298_v33 = vrot.slane %v3836_v37, %v3770_v12  ;;  %v1664_v0 = vpop.f32.mrb[20].mxu1  ;;  %v1553_v25 = vpop.f32.mrb[21].mxu0 }
 0x177   :  { %v4078_v28 = vadd.f32 %v4297_v52, %v1750_v42  ;;  %v2343_v35 = vmul.f32 0.01, %v2279_v22  ;;  %v4299_v56 = vrot.slane %v3846_v46, %v3597_v30  ;;  %v1756_v54 = vadd.f32 %v3788_v7, %v1660_v3  ;;  %v1666_v36 = vpop.f32.mrb[21].mxu1  ;;  %v1555_v49 = vpop.f32.mrb[22].mxu0 }
 0x178   :  { %v4085_v48 = vadd.f32 %v4298_v33, %v1752_v59  ;;  %v2398_v29 = vmax.f32 %v4027_v19, %v2334_v50  ;;  %v4300_v44 = vrot.slane %v3846_v46, %v3734_v60  ;;  %v4301_v18 = vrot.slane %v3846_v46, %v3764_v10  ;;  %v1668_v26 = vpop.f32.mrb[22].mxu1  ;;  %v1557_v42 = vpop.f32.mrb[23].mxu0 }
 0x179   :  { %v2281_v8 = vadd.f32 %v4299_v56, %v1753_v11  ;;  %v2164_v14 = vrot.slane %v3738_v61, %v3764_v10  ;;  %v2400_v47 = vmax.f32 %v4038_v31, %v2336_v34  ;;  %v4302_v19 = vrot.slane %v3846_v46, %v3770_v12  ;;  %v1670_v32 = vpop.f32.mrb[23].mxu1 }
 0x17a   :  { %v2283_v53 = vadd.f32 %v4300_v44, %v1755_v39  ;;  %v4098_v37 = vadd.f32 %v4301_v18, %v1754_v13  ;;  %v2172_v55 = vrot.slane %v3738_v61, %v3770_v12  ;;  %v2405_v4 = vmax.f32 %v2277_v2, %v2341_v51 }
 0x17b   :  { %v2345_v17 = vmul.f32 0.01, %v2281_v8  ;;  %v2284_v50 = vadd.f32 %v4302_v19, %v1756_v54  ;;  %v2768_v16 = vpack.c.bf16 %v2402_v24, %v2398_v29  ;;  %v2407_v59 = vmax.f32 %v2279_v22, %v2343_v35 }
 0x17c   :  { %v2347_v1 = vmul.f32 0.01, %v2283_v53  ;;  %v2346_v3 = vmul.f32 0.01, %v4098_v37  ;;  %v2342_v31 = vmul.f32 0.01, %v4078_v28  ;;  %v2800_v11 = vpack.c.bf16 %v2404_v58, %v2400_v47 }
 0x17d   :  { %v2409_v34 = vmax.f32 %v2281_v8, %v2345_v17  ;;  %v2348_v46 = vmul.f32 0.01, %v2284_v50  ;;  %2769 = vmatprep.subr.bf16.mxu1 %v2768_v16  ;;  %v1757_v39 = vadd.f32 %v3773_v5, %v1551_v43  ;;  %v1759_v13 = vadd.f32 %v3776_v6, %v1664_v0  ;;  %v1561_v44 = vpop.f32.mrb[24].mxu0 }
 0x17e   :  { %v2411_v52 = vmax.f32 %v2283_v53, %v2347_v1  ;;  %v2344_v2 = vmul.f32 0.01, %v4085_v48  ;;  %v2410_v33 = vmax.f32 %v4098_v37, %v2346_v3  ;;  %2801 = vmatprep.subr.bf16.mxu0 %v2800_v11  ;;  %2771 = vmatpush1.bf16.xpose.msra.mxu1 %v2770_v27  ;;  %v1758_v24 = vadd.f32 %v3785_v15, %v1553_v25  ;;  %v1674_v53 = vpop.f32.mrb[24].mxu1  ;;  %v1563_v17 = vpop.f32.mrb[25].mxu0 }
 0x17f   :  { %v2774_v51 = vpack.c.bf16 %v2409_v34, %v2405_v4  ;;  %2803 = vmatpush1.bf16.xpose.msra.mxu0 %v2802_v9  ;;  %v4303_v58 = vrot.slane %v3801_v20, %v3597_v30  ;;  %v4304_v56 = vrot.slane %v3801_v20, %v3734_v60  ;;  %v1760_v54 = vadd.f32 %v3788_v7, %v1666_v36  ;;  %v1676_v19 = vpop.f32.mrb[25].mxu1 }
 0x180   :  { %v2806_v22 = vpack.c.bf16 %v2411_v52, %v2407_v59  ;;  %v4305_v43 = vrot.slane %v3801_v20, %v3764_v10  ;;  %v1761_v27 = vadd.f32 %v3773_v5, %v1555_v49  ;;  %v1763_v29 = vadd.f32 %v3776_v6, %v1668_v26 }
 0x181   :  { %v2285_v35 = vadd.f32 %v4303_v58, %v1757_v39  ;;  %v2287_v8 = vadd.f32 %v4304_v56, %v1759_v13  ;;  %v1762_v9 = vadd.f32 %v3785_v15, %v1557_v42  ;;  %v2412_v18 = vmax.f32 %v2284_v50, %v2348_v46  ;;  %v1678_v42 = vpop.f32.mrb[26].mxu1 }
 0x182   :  { %v4125_v0 = vadd.f32 %v4305_v43, %v1758_v24  ;;  %v4306_v25 = vrot.slane %v3801_v20, %v3770_v12  ;;  %v1764_v36 = vadd.f32 %v3788_v7, %v1670_v32  ;;  %v4307_v49 = vrot.slane %v3804_v21, %v3597_v30  ;;  %v1565_v20 = vpop.f32.mrb[26].mxu0  ;;  %v1680_v46 = vpop.f32.mrb[27].mxu1 }
 0x183   :  { %v2349_v37 = vmul.f32 0.01, %v2285_v35  ;;  %v2351_v4 = vmul.f32 0.01, %v2287_v8  ;;  %v4308_v1 = vrot.slane %v3804_v21, %v3734_v60  ;;  %v4309_v50 = vrot.slane %v3804_v21, %v3764_v10  ;;  %v1567_v52 = vpop.f32.mrb[27].mxu0 }
 0x184   :  { %v4133_v47 = vadd.f32 %v4306_v25, %v1760_v54  ;;  %v2289_v26 = vadd.f32 %v4307_v49, %v1761_v27  ;;  %v2406_v32 = vmax.f32 %v4078_v28, %v2342_v31  ;;  %v2408_v59 = vmax.f32 %v4085_v48, %v2344_v2 }
 0x185   :  { %v2291_v3 = vadd.f32 %v4308_v1, %v1763_v29  ;;  %v4145_v16 = vadd.f32 %v4309_v50, %v1762_v9  ;;  %v4310_v34 = vrot.slane %v3804_v21, %v3770_v12  ;;  %v2176_v39 = vrot.slane %v3742_v62, %v3597_v30 }
 0x186   :  { %v2353_v13 = vmul.f32 0.01, %v2289_v26  ;;  %v2180_v56 = vrot.slane %v3742_v62, %v3764_v10  ;;  %v2413_v28 = vmax.f32 %v2285_v35, %v2349_v37  ;;  %v2350_v48 = vmul.f32 0.01, %v4125_v0 }
 0x187   :  { %v4152_v11 = vadd.f32 %v4310_v34, %v1764_v36  ;;  %v2355_v24 = vmul.f32 0.01, %v2291_v3  ;;  %v2354_v58 = vmul.f32 0.01, %v4145_v16  ;;  %v2772_v31 = vpack.c.bf16 %v2410_v33, %v2406_v32 }
 0x188   :  { %v2804_v2 = vpack.c.bf16 %v2412_v18, %v2408_v59  ;;  %v2415_v21 = vmax.f32 %v2287_v8, %v2351_v4  ;;  %v2417_v54 = vmax.f32 %v2289_v26, %v2353_v13  ;;  %v1765_v27 = vadd.f32 %v3773_v5, %v1561_v44  ;;  %v1571_v18 = vpop.f32.mrb[28].mxu0  ;;  %v1684_v4 = vpop.f32.mrb[28].mxu1 }
 0x189   :  { %v2419_v43 = vmax.f32 %v2291_v3, %v2355_v24  ;;  %v2418_v29 = vmax.f32 %v4145_v16, %v2354_v58  ;;  %v2356_v9 = vmul.f32 0.01, %v4152_v11  ;;  %2773 = vmatprep.subr.bf16.mxu1 %v2772_v31  ;;  %v1767_v25 = vadd.f32 %v3776_v6, %v1674_v53  ;;  %v1686_v3 = vpop.f32.mrb[29].mxu1 }
 0x18a   :  { %2805 = vmatprep.subr.bf16.mxu0 %v2804_v2  ;;  %v1766_v36 = vadd.f32 %v3785_v15, %v1563_v17  ;;  %v2352_v35 = vmul.f32 0.01, %v4133_v47  ;;  %v2778_v37 = vpack.c.bf16 %v2417_v54, %v2413_v28  ;;  %2775 = vmatpush1.bf16.xpose.msra.mxu1 %v2774_v51  ;;  %v4311_v8 = vrot.slane %v3880_v57, %v3597_v30  ;;  %v1688_v13 = vpop.f32.mrb[30].mxu1 }
 0x18b   :  { %v2810_v33 = vpack.c.bf16 %v2419_v43, %v2415_v21  ;;  %2807 = vmatpush1.bf16.xpose.msra.mxu0 %v2806_v22  ;;  %v4312_v49 = vrot.slane %v3880_v57, %v3734_v60  ;;  %v4313_v53 = vrot.slane %v3880_v57, %v3764_v10  ;;  %v1768_v1 = vadd.f32 %v3788_v7, %v1676_v19  ;;  %v1573_v22 = vpop.f32.mrb[29].mxu0 }
 0x18c   :  { %v2293_v44 = vadd.f32 %v4311_v8, %v1765_v27  ;;  %v1769_v51 = vadd.f32 %v3773_v5, %v1565_v20  ;;  %v1771_v16 = vadd.f32 %v3776_v6, %v1678_v42  ;;  %v1770_v32 = vadd.f32 %v3785_v15, %v1567_v52  ;;  %v1575_v34 = vpop.f32.mrb[30].mxu0  ;;  %v1690_v42 = vpop.f32.mrb[31].mxu1 }
 0x18d   :  { %v2295_v26 = vadd.f32 %v4312_v49, %v1767_v25  ;;  %v4175_v17 = vadd.f32 %v4313_v53, %v1766_v36  ;;  %v1772_v59 = vadd.f32 %v3788_v7, %v1680_v46  ;;  %v2420_v24 = vmax.f32 %v4152_v11, %v2356_v9  ;;  %v1577_v2 = vpop.f32.mrb[31].mxu0 }
 0x18e   :  { %v2357_v50 = vmul.f32 0.01, %v2293_v44  ;;  %v4314_v28 = vrot.slane %v3880_v57, %v3770_v12  ;;  %v4315_v20 = vrot.slane %v3898_v63, %v3597_v30  ;;  %v2414_v52 = vmax.f32 %v4125_v0, %v2350_v48 }
 0x18f   :  { %v2359_v58 = vmul.f32 0.01, %v2295_v26  ;;  %v4316_v46 = vrot.slane %v3898_v63, %v3734_v60  ;;  %v4317_v11 = vrot.slane %v3898_v63, %v3764_v10  ;;  %v4318_v57 = vrot.slane %v3898_v63, %v3770_v12 }
 0x190   :  { %v4186_v19 = vadd.f32 %v4314_v28, %v1768_v1  ;;  %v2297_v31 = vadd.f32 %v4315_v20, %v1769_v51  ;;  %v2416_v27 = vmax.f32 %v4133_v47, %v2352_v35  ;;  %v2421_v9 = vmax.f32 %v2293_v44, %v2357_v50  ;;  %v1581_v47 = vpop.f32.mrb[32].mxu0  ;;  %v1694_v35 = vpop.f32.mrb[32].mxu1 }
 0x191   :  { %v2299_v21 = vadd.f32 %v4316_v46, %v1771_v16  ;;  %v2298_v54 = vadd.f32 %v4317_v11, %v1770_v32  ;;  %v2300_v43 = vadd.f32 %v4318_v57, %v1772_v59  ;;  %v2358_v25 = vmul.f32 0.01, %v4175_v17 }
 0x192   :  { %v2361_v36 = vmul.f32 0.01, %v2297_v31  ;;  %v2776_v49 = vpack.c.bf16 %v2418_v29, %v2414_v52  ;;  %v2423_v53 = vmax.f32 %v2295_v26, %v2359_v58  ;;  %v2808_v51 = vpack.c.bf16 %v2420_v24, %v2416_v27  ;;  %v1696_v24 = vpop.f32.mrb[33].mxu1 }
 0x193   :  { %v2363_v8 = vmul.f32 0.01, %v2299_v21  ;;  %v2362_v0 = vmul.f32 0.01, %v2298_v54  ;;  %v2364_v48 = vmul.f32 0.01, %v2300_v43  ;;  %v1773_v16 = vadd.f32 %v3773_v5, %v1571_v18 }
 0x194   :  { %v2425_v1 = vmax.f32 %v2297_v31, %v2361_v36  ;;  %2777 = vmatprep.subr.bf16.mxu1 %v2776_v49  ;;  %v1775_v63 = vadd.f32 %v3776_v6, %v1684_v4  ;;  %v2360_v44 = vmul.f32 0.01, %v4186_v19  ;;  %2809 = vmatprep.subr.bf16.mxu0 %v2808_v51  ;;  %v4319_v29 = vrot.slane %v3728_v40, %v3597_v30  ;;  %v1583_v18 = vpop.f32.mrb[33].mxu0 }
 0x195   :  { %v2427_v32 = vmax.f32 %v2299_v21, %v2363_v8  ;;  %v2426_v28 = vmax.f32 %v2298_v54, %v2362_v0  ;;  %v2428_v20 = vmax.f32 %v2300_v43, %v2364_v48  ;;  %2779 = vmatpush1.bf16.xpose.msra.mxu1 %v2778_v37  ;;  %v1774_v59 = vadd.f32 %v3785_v15, %v1573_v22  ;;  %v1585_v21 = vpop.f32.mrb[34].mxu0  ;;  %v1698_v37 = vpop.f32.mrb[34].mxu1 }
 0x196   :  { %v2782_v50 = vpack.c.bf16 %v2425_v1, %v2421_v9  ;;  %v2301_v26 = vadd.f32 %v4319_v29, %v1773_v16  ;;  %2811 = vmatpush1.bf16.xpose.msra.mxu0 %v2810_v33  ;;  %v4320_v4 = vrot.slane %v3728_v40, %v3734_v60  ;;  %v1776_v52 = vadd.f32 %v3788_v7, %v1686_v3  ;;  %v1587_v43 = vpop.f32.mrb[35].mxu0  ;;  %v1700_v27 = vpop.f32.mrb[35].mxu1 }
 0x197   :  { %v2814_v58 = vpack.c.bf16 %v2427_v32, %v2423_v53  ;;  %v1777_v46 = vadd.f32 %v3773_v5, %v1575_v34  ;;  %v4321_v54 = vrot.slane %v3728_v40, %v3764_v10  ;;  %v1779_v22 = vadd.f32 %v3776_v6, %v1688_v13 }
 0x198   :  { %v2303_v31 = vadd.f32 %v4320_v4, %v1775_v63  ;;  %v2365_v11 = vmul.f32 0.01, %v2301_v26  ;;  %v1778_v33 = vadd.f32 %v3785_v15, %v1577_v2  ;;  %v4322_v3 = vrot.slane %v3728_v40, %v3770_v12 }
 0x199   :  { %v4218_v57 = vadd.f32 %v4321_v54, %v1774_v59  ;;  %v4323_v34 = vrot.slane %v3731_v41, %v3597_v30  ;;  %v1780_v0 = vadd.f32 %v3788_v7, %v1690_v42  ;;  %v2422_v48 = vmax.f32 %v4175_v17, %v2358_v25 }
 0x19a   :  { %v2367_v9 = vmul.f32 0.01, %v2303_v31  ;;  %v2304_v36 = vadd.f32 %v4322_v3, %v1776_v52  ;;  %v4324_v13 = vrot.slane %v3731_v41, %v3734_v60  ;;  %v2306_v2 = vadd.f32 %v2148_v38, %v1778_v33 }
 0x19b   :  { %v2305_v8 = vadd.f32 %v4323_v34, %v1777_v46  ;;  %v2188_v40 = vrot.slane %v3742_v62, %v3770_v12  ;;  %v2424_v53 = vmax.f32 %v4186_v19, %v2360_v44  ;;  %v2429_v1 = vmax.f32 %v2301_v26, %v2365_v11 }
 0x19c   :  { %v2307_v49 = vadd.f32 %v4324_v13, %v1779_v22  ;;  %v2308_v42 = vadd.f32 %v2156_v45, %v1780_v0  ;;  %v2366_v17 = vmul.f32 0.01, %v4218_v57  ;;  %v2370_v16 = vmul.f32 0.01, %v2306_v2  ;;  %v2445_v13 = vld [vmem:[%s4287_s6] sm:$0xff] }
 0x19d   :  { %v2369_v51 = vmul.f32 0.01, %v2305_v8  ;;  %v2780_v32 = vpack.c.bf16 %v2426_v28, %v2422_v48  ;;  %v2431_v63 = vmax.f32 %v2303_v31, %v2367_v9  ;;  %v2812_v38 = vpack.c.bf16 %v2428_v20, %v2424_v53 }
 0x19e   :  { %v2371_v25 = vmul.f32 0.01, %v2307_v49  ;;  %v2372_v59 = vmul.f32 0.01, %v2308_v42  ;;  %v2434_v52 = vmax.f32 %v2306_v2, %v2370_v16  ;;  %v1781_v19 = vadd.f32 %v3773_v5, %v1581_v47  ;;  %v2453_v2 = vpop.permute.xlu0 %2452 }
 0x19f   :  { %v2433_v29 = vmax.f32 %v2305_v8, %v2369_v51  ;;  %2781 = vmatprep.subr.bf16.mxu1 %v2780_v32  ;;  %v1783_v44 = vadd.f32 %v3776_v6, %v1694_v35  ;;  %v2368_v26 = vmul.f32 0.01, %v2304_v36  ;;  %2813 = vmatprep.subr.bf16.mxu0 %v2812_v38  ;;  %v1782_v45 = vadd.f32 %v3785_v15, %v1583_v18 }
 0x1a0   :  { %v2435_v4 = vmax.f32 %v2307_v49, %v2371_v25  ;;  %v2436_v41 = vmax.f32 %v2308_v42, %v2372_v59  ;;  %2783 = vmatpush1.bf16.xpose.msra.mxu1 %v2782_v50  ;;  %2815 = vmatpush1.bf16.xpose.msra.mxu0 %v2814_v58  ;;  %v2309_v28 = vadd.f32 %v2160_v23, %v1781_v19  ;;  %v2447_v49 = vld [vmem:[%s4287_s6 + $0x10] sm:$0xff] }
 0x1a1   :  { %v2786_v46 = vpack.c.bf16 %v2433_v29, %v2429_v1  ;;  %v4325_v20 = vrot.slane %v3738_v61, %v3734_v60  ;;  %v1784_v47 = vadd.f32 %v3788_v7, %v1696_v24  ;;  %v2310_v35 = vadd.f32 %v2164_v14, %v1782_v45 }
 0x1a2   :  { %v2818_v11 = vpack.c.bf16 %v2435_v4, %v2431_v63  ;;  %v1785_v50 = vadd.f32 %v3773_v5, %v1585_v21  ;;  %v1787_v18 = vadd.f32 %v3776_v6, %v1698_v37  ;;  %v1786_v58 = vadd.f32 %v3785_v15, %v1587_v43 }
 0x1a3   :  { %v2311_v31 = vadd.f32 %v4325_v20, %v1783_v44  ;;  %v2373_v54 = vmul.f32 0.01, %v2309_v28  ;;  %v2312_v23 = vadd.f32 %v2172_v55, %v1784_v47  ;;  %v1788_v33 = vadd.f32 %v3788_v7, %v1700_v27 }
 0x1a4   :  { %v2374_v9 = vmul.f32 0.01, %v2310_v35  ;;  %v2313_v24 = vadd.f32 %v2176_v39, %v1785_v50  ;;  %v4326_v5 = vrot.slane %v3742_v62, %v3734_v60  ;;  %v2314_v6 = vadd.f32 %v2180_v56, %v1786_v58 }
 0x1a5   :  { %v2375_v22 = vmul.f32 0.01, %v2311_v31  ;;  %v2430_v15 = vmax.f32 %v4218_v57, %v2366_v17  ;;  %v2432_v21 = vmax.f32 %v2304_v36, %v2368_v26  ;;  %v2376_v61 = vmul.f32 0.01, %v2312_v23 }
 0x1a6   :  { %v2315_v14 = vadd.f32 %v4326_v5, %v1787_v18  ;;  %v2316_v12 = vadd.f32 %v2188_v40, %v1788_v33  ;;  %v2437_v55 = vmax.f32 %v2309_v28, %v2373_v54  ;;  %v2377_v7 = vmul.f32 0.01, %v2313_v24 }
 0x1a7   :  { %v2378_v43 = vmul.f32 0.01, %v2314_v6  ;;  %v2439_v27 = vmax.f32 %v2311_v31, %v2375_v22  ;;  %v2784_v39 = vpack.c.bf16 %v2434_v52, %v2430_v15  ;;  %v2816_v3 = vpack.c.bf16 %v2436_v41, %v2432_v21 }
 0x1a8   :  { %v2379_v37 = vmul.f32 0.01, %v2315_v14  ;;  %v2380_v30 = vmul.f32 0.01, %v2316_v12  ;;  %v2438_v34 = vmax.f32 %v2310_v35, %v2374_v9  ;;  %v2441_v60 = vmax.f32 %v2313_v24, %v2377_v7 }
 0x1a9   :  { %v2442_v0 = vmax.f32 %v2314_v6, %v2378_v43  ;;  %v2440_v48 = vmax.f32 %v2312_v23, %v2376_v61  ;;  %2785 = vmatprep.subr.bf16.mxu1 %v2784_v39  ;;  %2817 = vmatprep.subr.bf16.mxu0 %v2816_v3 }
 0x1aa   :  { %v2443_v8 = vmax.f32 %v2315_v14, %v2379_v37  ;;  %v2444_v62 = vmax.f32 %v2316_v12, %v2380_v30  ;;  %v2790_v10 = vpack.c.bf16 %v2441_v60, %v2437_v55  ;;  %2787 = vmatpush1.bf16.xpose.msra.mxu1 %v2786_v46  ;;  %2819 = vmatpush1.bf16.xpose.msra.mxu0 %v2818_v11 }
 0x1ab   :  { %v2788_v57 = vpack.c.bf16 %v2442_v0, %v2438_v34 }
 0x1ac   :  { %v2822_v56 = vpack.c.bf16 %v2443_v8, %v2439_v27  ;;  %v2820_v36 = vpack.c.bf16 %v2444_v62, %v2440_v48 }
 0x1ad   :  { %2789 = vmatprep.subr.bf16.mxu1 %v2788_v57 }
 0x1ae   :  { %2821 = vmatprep.subr.bf16.mxu0 %v2820_v36 }
 0x1b2   :  { %2791 = vmatpush1.bf16.xpose.msra.mxu1 %v2790_v10  ;;  %2823 = vmatpush1.bf16.xpose.msra.mxu0 %v2822_v56 }
 0x1b9   :  { %2520 = vmatmul.mubr.f32.vlgmr.msra.gmra.mrb[36].mxu1 %v2445_v13  ;;  %2590 = vmatmul.mubr.f32.vlgmr.msra.gmra.mrb[36].mxu0 %v2447_v49 }
 0x28c   :  { %v2521_v40 = vpop.f32.mrb[36].mxu1  ;;  %v2591_v53 = vpop.f32.mrb[36].mxu0 }
 0x28d   :  { %v2522_v1 = vadd.f32 %v2521_v40, %v2453_v2  ;;  %v2523_v51 = vpop.f32.mrb[37].mxu1  ;;  %v2593_v42 = vpop.f32.mrb[37].mxu0 }
 0x28f   :  { %v2592_v17 = vadd.f32 %v2591_v53, %v2522_v1 }
 0x291   :  { %2595 = vst [vmem:[%s4290_s8] sm:$0xff] %v2592_v17 }

</bundles_post_ra>
